<compile_context>
chip_gen: v7x
topology: tpu7x:2x2x1
jax: 0.10.0
libtpu: 0.0.40
codegen_flags: <defaults>
</compile_context>

<pallas_src>
import math

import jax
import jax.numpy as jnp
from jax import lax
from jax.experimental import pallas as pl
from jax.experimental.pallas import tpu as pltpu


# --------------------------------------------------------------------------- small helpers

def _align(n, a):
    return ((n + a - 1) // a) * a


def _head_layout(num_functions, screen_width, screen_height):
    """Column layout of the packed head matrix: [action|pad][x|pad][y|pad][value|pad->128]."""
    a_pad = _align(num_functions, 64)
    x_pad = _align(screen_width, 64)
    y_pad = _align(screen_height, 64)
    segs = ((0, num_functions), (a_pad, screen_width), (a_pad + x_pad, screen_height))
    value_col = a_pad + x_pad + y_pad
    n_cols = _align(value_col + 1, 128)
    return segs, value_col, n_cols


# ------------------------------------------------------------------ conv kernel (both branches)

def _conv_elu_kernel(p_ref, w_ref, b_ref, o_ref):
    """o = ELU(w @ p + b); w:(OC,K) bf16, p:(K,M) bf16, b:(OC,1) f32 -> o:(OC,M) bf16."""
    acc = jnp.dot(w_ref[...], p_ref[...], preferred_element_type=jnp.float32)
    acc = acc + b_ref[...]                                               # lane broadcast
    # PyTorch ELU(alpha=1): x if x > 0 else exp(x) - 1  (overflow-safe), in f32
    acc = jnp.where(acc > 0.0, acc, jnp.exp(jnp.minimum(acc, 0.0)) - 1.0)
    o_ref[...] = acc.astype(o_ref.dtype)


def _conv_pair_elu(patches, weights, biases):
    """Run the screen and minimap conv branches in one pallas_call via grid=(2,).

    patches: (2, K, Mp) bf16, weights: (2, OC, K) bf16, biases: (2, OC, 1) f32
    returns (2, OC, Mp) bf16, layout (branch, OC, (B, OH, OW)).
    """
    g, k, mp = patches.shape
    oc = weights.shape[1]
    return pl.pallas_call(
        _conv_elu_kernel,
        grid=(g,),
        in_specs=[
            pl.BlockSpec((None, k, mp), lambda i: (i, 0, 0)),
            pl.BlockSpec((None, oc, k), lambda i: (i, 0, 0)),
            pl.BlockSpec((None, oc, 1), lambda i: (i, 0, 0)),
        ],
        out_specs=pl.BlockSpec((None, oc, mp), lambda i: (i, 0, 0)),
        out_shape=jax.ShapeDtypeStruct((g, oc, mp), jnp.bfloat16),
        compiler_params=pltpu.CompilerParams(dimension_semantics=("parallel",)),
        cost_estimate=pl.CostEstimate(
            flops=2 * g * oc * k * mp,
            transcendentals=g * oc * mp,
            bytes_accessed=2 * (patches.size + weights.size + g * oc * mp) + 4 * biases.size,
        ),
    )(patches, weights, biases)


def _branch_patches(x, k, stride, pad, lhs_spec):
    """im2col via one XLA op. Output (C*k*k, N*OH*OW): feature dim ordered (C, KH, KW)
    (matches PyTorch Conv2d weight.reshape(OC, -1)); M ordered (N, OH, OW)."""
    p = lax.conv_general_dilated_patches(
        x, (k, k), (stride, stride), ((pad, pad), (pad, pad)),
        dimension_numbers=(lhs_spec, "OIHW", "CNHW"))
    kk, n, oh, ow = p.shape
    return p.reshape(kk, n * oh * ow), oh, ow


# ---------------------------------------------------------------- fused fc + four-head kernel

def _make_fc_heads_kernel(softmax_segs, value_col):
    """ns = ELU(st @ fc_w + fc_b);  logits = ns @ head_w + head_b  (lane-dense 256-wide);
    softmax applied independently on each static segment; value column passes through."""

    def kernel(st_ref, fcw_ref, fcb_ref, hw_ref, hb_ref, o_ref):
        ns = jnp.dot(st_ref[...], fcw_ref[...], preferred_element_type=jnp.float32)
        ns = ns + fcb_ref[...]
        ns = jnp.where(ns > 0.0, ns, jnp.exp(jnp.minimum(ns, 0.0)) - 1.0)     # ELU, f32
        logits = jnp.dot(ns.astype(hw_ref.dtype), hw_ref[...],
                         preferred_element_type=jnp.float32) + hb_ref[...]    # (b, 256) f32

        col = lax.broadcasted_iota(jnp.int32, logits.shape, 1)
        out = logits                                   # value head (and padding) pass-through
        for lo, size in softmax_segs:                  # static -> unrolled
            seg = (col >= lo) & (col < lo + size)
            masked = jnp.where(seg, logits, -jnp.inf)
            m = jnp.max(masked, axis=-1, keepdims=True)
            e = jnp.exp(masked - m)                    # exactly 0 outside the segment
            s = jnp.sum(e, axis=-1, keepdims=True)     # >= 1
            r = pl.reciprocal(s, approx=True)          # EUP slot
            r = r * (2.0 - s * r)                      # one Newton step -> ~f32 exact
            out = jnp.where(seg, e * r, out)
        o_ref[...] = out                               # single lane-dense (b, 256) store

    return kernel


def _fused_fc_heads(kernel, st, fc_w, fc_b, head_w, head_b):
    b = st.shape[0]
    k, h = fc_w.shape
    n = head_w.shape[1]
    vmem = pl.BlockSpec(memory_space=pltpu.MemorySpace.VMEM)
    return pl.pallas_call(
        kernel,
        out_shape=jax.ShapeDtypeStruct((b, n), jnp.float32),
        in_specs=[vmem, vmem, vmem, vmem, vmem],
        out_specs=vmem,
        cost_estimate=pl.CostEstimate(
            flops=2 * b * (k * h + h * n),
            transcendentals=b * (h + 3 * n),
            bytes_accessed=2 * (st.size + fc_w.size + head_w.size)
                           + 4 * (fc_b.size + head_b.size + b * n),
        ),
    )(st, fc_w, fc_b, head_w, head_b)


# -------------------------------------------------------------------------------- parameters

def init_params(key, num_functions, screen_width, screen_height):
    """Deterministic init matching A2CModel._initialize_weights shapes/distributions."""
    ks = jax.random.split(key, 16)

    def conv_w(k, oc, ic, ksz):
        std = math.sqrt(2.0 / (ksz * ksz * oc))
        return jax.random.normal(k, (oc, ic, ksz, ksz), jnp.float32) * std

    def lin(kw, kb, in_f, out_f):
        w = jax.random.normal(kw, (in_f, out_f), jnp.float32) * 0.01
        bound = 1.0 / math.sqrt(in_f)
        b = jax.random.uniform(kb, (out_f,), jnp.float32, -bound, bound)
        return w, b

    p = {}
    p["embed"] = jax.random.normal(ks[0], (5, 8), jnp.float32)     # nn.Embedding(5, 8)
    p["embed_mm"] = jax.random.normal(ks[1], (5, 8), jnp.float32)
    p["conv1_w"] = conv_w(ks[2], 16, 8, 8)
    p["conv1_b"] = jnp.zeros((16,), jnp.float32)
    p["conv2_w"] = conv_w(ks[3], 32, 16, 4)
    p["conv2_b"] = jnp.zeros((32,), jnp.float32)
    p["conv_mm1_w"] = conv_w(ks[4], 16, 8, 8)
    p["conv_mm1_b"] = jnp.zeros((16,), jnp.float32)
    p["conv_mm2_w"] = conv_w(ks[5], 32, 16, 4)
    p["conv_mm2_b"] = jnp.zeros((32,), jnp.float32)
    p["fc_w"], p["fc_b"] = lin(ks[6], ks[7], 64 * 64, 128)
    p["action_w"], p["action_b"] = lin(ks[8], ks[9], 128, num_functions)
    p["value_w"], p["value_b"] = lin(ks[10], ks[11], 128, 1)
    p["x_w"], p["x_b"] = lin(ks[12], ks[13], 128, screen_width)
    p["y_w"], p["y_b"] = lin(ks[14], ks[15], 128, screen_height)
    # NOTE: feature_input (Linear(11,128)) exists in __init__ but is never used in forward.
    return p


def prepare_params(p, num_functions, screen_width, screen_height):
    """One-time repack of PyTorch-layout params into kernel-friendly layout (done outside jit)."""
    f32, bf16 = jnp.float32, jnp.bfloat16
    segs, value_col, n_cols = _head_layout(num_functions, screen_width, screen_height)

    packed = {
        "embed": p["embed"].astype(bf16),
        "embed_mm": p["embed_mm"].astype(bf16),
        "c1_w": jnp.stack([p["conv1_w"].reshape(16, -1),
                           p["conv_mm1_w"].reshape(16, -1)]).astype(bf16),        # (2, 16, 512)
        "c1_b": jnp.stack([p["conv1_b"], p["conv_mm1_b"]])[:, :, None].astype(f32),
        "c2_w": jnp.stack([p["conv2_w"].reshape(32, -1),
                           p["conv_mm2_w"].reshape(32, -1)]).astype(bf16),        # (2, 32, 256)
        "c2_b": jnp.stack([p["conv2_b"], p["conv_mm2_b"]])[:, :, None].astype(f32),
        "fc_w": p["fc_w"].astype(bf16),                                           # (4096, 128)
        "fc_b": p["fc_b"].reshape(1, -1).astype(f32),
    }

    hidden = p["fc_w"].shape[1]
    hw = jnp.zeros((hidden, n_cols), f32)
    hb = jnp.zeros((n_cols,), f32)
    (a_off, nf), (x_off, sw), (y_off, sh) = segs
    hw = hw.at[:, a_off:a_off + nf].set(p["action_w"])
    hb = hb.at[a_off:a_off + nf].set(p["action_b"])
    hw = hw.at[:, x_off:x_off + sw].set(p["x_w"])
    hb = hb.at[x_off:x_off + sw].set(p["x_b"])
    hw = hw.at[:, y_off:y_off + sh].set(p["y_w"])
    hb = hb.at[y_off:y_off + sh].set(p["y_b"])
    hw = hw.at[:, value_col:value_col + 1].set(p["value_w"])
    hb = hb.at[value_col].set(p["value_b"][0])
    packed["head_w"] = hw.astype(bf16)                                            # (128, 256)
    packed["head_b"] = hb.reshape(1, -1)                                          # (1, 256) f32
    return packed


# ------------------------------------------------------------------------------------ forward

def make_a2c_forward(num_functions, screen_width, screen_height):
    segs, value_col, _ = _head_layout(num_functions, screen_width, screen_height)
    fc_heads_kernel = _make_fc_heads_kernel(segs, value_col)

    def forward(packed, screen, minimap, game):
        """screen/minimap: (b, 1, h, w) int32 in [0, 5); game is unused (as in PyTorch)."""
        del game                                          # never used by A2CModel.forward
        b, c, h, w = screen.shape
        embed_dim = 8

        # Embedding lookups reproduce PyTorch's exact view sequence (row-major reinterpretation,
        # relies on c == 1 and h == w like the original).  Gathers stay in XLA; everything
        # downstream runs in Pallas.
        emb = packed["embed"][screen.reshape(-1, h)].reshape(b, embed_dim, h, w)
        emb_mm = packed["embed_mm"][minimap.reshape(-1, h)].reshape(b, embed_dim, h, w)

        # ---- conv1 / conv_mm1: both branches in one Pallas call, transposed (OC, M) layout ----
        ps1, oh1, ow1 = _branch_patches(emb, 8, 4, 1, "NCHW")        # (512, b*oh1*ow1)
        pm1, _, _ = _branch_patches(emb_mm, 8, 4, 1, "NCHW")
        m1 = ps1.shape[1]
        mp1 = _align(m1, 128)                                        # lane-dense M (450 -> 512)
        p1 = jnp.stack([jnp.pad(ps1, ((0, 0), (0, mp1 - m1))),
                        jnp.pad(pm1, ((0, 0), (0, mp1 - m1)))])      # (2, 512, mp1) bf16
        o1 = _conv_pair_elu(p1, packed["c1_w"], packed["c1_b"])      # (2, 16, mp1) bf16

        # ---- conv2 / conv_mm2 ----
        o1 = o1[:, :, :m1].reshape(2, 16, b, oh1, ow1)               # per-branch CNHW
        ps2, oh2, ow2 = _branch_patches(o1[0], 4, 2, 2, "CNHW")      # (256, b*oh2*ow2)
        pm2, _, _ = _branch_patches(o1[1], 4, 2, 2, "CNHW")
        m2 = ps2.shape[1]
        mp2 = _align(m2, 128)
        p2 = jnp.stack([jnp.pad(ps2, ((0, 0), (0, mp2 - m2))),
                        jnp.pad(pm2, ((0, 0), (0, mp2 - m2)))])      # (2, 256, mp2) bf16
        o2 = _conv_pair_elu(p2, packed["c2_w"], packed["c2_b"])      # (2, 32, mp2) bf16

        # ---- flatten to PyTorch's NCHW .view(b, -1) order and concat the two branches ----
        o2 = o2[:, :, :m2].reshape(2, 32, b, oh2 * ow2).transpose(0, 2, 1, 3)
        st = jnp.concatenate([o2[0].reshape(b, -1), o2[1].reshape(b, -1)], axis=1)  # (b, 4096)

        # ---- fused fc + ELU + all four heads in one Pallas call ----
        out = _fused_fc_heads(fc_heads_kernel, st, packed["fc_w"], packed["fc_b"],
                              packed["head_w"], packed["head_b"])    # (b, 256) f32
        probs = out[:, segs[0][0]:segs[0][0] + num_functions]
        x = out[:, segs[1][0]:segs[1][0] + screen_width]
        y = out[:, segs[2][0]:segs[2][0] + screen_height]
        values = out[:, value_col:value_col + 1]
        return probs, x, y, values

    return forward


# --------------------------------------------------------------------------------------- main

if __name__ == "__main__":
    num_functions = 12
    # fc = Linear(64*64, 128) hard-wires the conv stack to 64x64 inputs
    # (conv1: 64 -> 15, conv2: 15 -> 8; 2 * 32*8*8 = 4096).
    spatial = 64
    batch = 2

    key = jax.random.PRNGKey(0)
    kp, k_s, k_m, k_g = jax.random.split(key, 4)

    params = init_params(kp, num_functions, spatial, spatial)
    packed = prepare_params(params, num_functions, spatial, spatial)
    forward = jax.jit(make_a2c_forward(num_functions, spatial, spatial))

    screen = jax.random.randint(k_s, (batch, 1, spatial, spatial), 0, 5, jnp.int32)
    minimap = jax.random.randint(k_m, (batch, 1, spatial, spatial), 0, 5, jnp.int32)
    game = jax.random.normal(k_g, (batch, 11), jnp.float32)   # unused, kept for signature parity

    probs, x, y, values = forward(packed, screen, minimap, game)
    jax.block_until_ready((probs, x, y, values))

    assert probs.shape == (batch, num_functions)
    assert x.shape == (batch, spatial)
    assert y.shape == (batch, spatial)
    assert values.shape == (batch, 1)
    assert bool(jnp.all(jnp.isfinite(probs))) and bool(jnp.all(jnp.isfinite(values)))
    assert bool(jnp.all(jnp.isfinite(x))) and bool(jnp.all(jnp.isfinite(y)))
    assert bool(jnp.allclose(jnp.sum(probs, axis=1), 1.0, atol=1e-5))
    assert bool(jnp.allclose(jnp.sum(x, axis=1), 1.0, atol=1e-5))
    assert bool(jnp.allclose(jnp.sum(y, axis=1), 1.0, atol=1e-5))

    print("KERNEL_OK")
</pallas_src>

<mosaic_0001>
module attributes {stable_mosaic.version = 11 : i64} {
  func.func @_conv_elu_kernel(%arg0: i32, %arg1: memref<1x512x512xbf16, #tpu.memory_space<vmem>>, %arg2: memref<1x16x512xbf16, #tpu.memory_space<vmem>>, %arg3: memref<1x16x1xf32, #tpu.memory_space<vmem>>, %arg4: memref<1x16x512xbf16, #tpu.memory_space<vmem>>) attributes {dimension_semantics = [#tpu.dimension_semantics<parallel>], iteration_bounds = array<i64: 2>, scalar_prefetch = 0 : i64, scratch_operands = 0 : i64, tpu.core_type = #tpu.core_type<tc>, window_params = [{transform_indices = @transform_0, window_bounds = array<i64: 1, 512, 512>}, {transform_indices = @transform_1, window_bounds = array<i64: 1, 16, 512>}, {transform_indices = @transform_2, window_bounds = array<i64: 1, 16, 1>}, {transform_indices = @transform_3, window_bounds = array<i64: 1, 16, 512>}]} {
    %c0 = arith.constant 0 : index
    %c0_0 = arith.constant 0 : index
    %c0_1 = arith.constant 0 : index
    %0 = vector.load %arg2[%c0, %c0_0, %c0_1] : memref<1x16x512xbf16, #tpu.memory_space<vmem>>, vector<1x16x512xbf16>
    %1 = vector.shape_cast %0 : vector<1x16x512xbf16> to vector<16x512xbf16>
    %c0_2 = arith.constant 0 : index
    %c0_3 = arith.constant 0 : index
    %c0_4 = arith.constant 0 : index
    %2 = vector.load %arg1[%c0_2, %c0_3, %c0_4] : memref<1x512x512xbf16, #tpu.memory_space<vmem>>, vector<1x512x512xbf16>
    %3 = vector.shape_cast %2 : vector<1x512x512xbf16> to vector<512x512xbf16>
    %cst = arith.constant dense<0.000000e+00> : vector<16x512xf32>
    %4 = tpu.matmul %1, %3, %cst {dimension_numbers = #tpu.dot_dimension_numbers<[1], [0], [0], [1], [0, 0, 1, 1], [], []>} : vector<16x512xbf16>, vector<512x512xbf16>, vector<16x512xf32> -> vector<16x512xf32>
    %c0_5 = arith.constant 0 : index
    %c0_6 = arith.constant 0 : index
    %c0_7 = arith.constant 0 : index
    %5 = vector.load %arg3[%c0_5, %c0_6, %c0_7] : memref<1x16x1xf32, #tpu.memory_space<vmem>>, vector<1x16x1xf32>
    %6 = vector.shape_cast %5 : vector<1x16x1xf32> to vector<16x1xf32>
    %7 = vector.broadcast %6 : vector<16x1xf32> to vector<16x512xf32>
    %8 = arith.addf %4, %7 : vector<16x512xf32>
    %cst_8 = arith.constant 0.000000e+00 : f32
    %9 = vector.broadcast %cst_8 : f32 to vector<16x512xf32>
    %10 = arith.cmpf ogt, %8, %9 : vector<16x512xf32>
    %cst_9 = arith.constant 0.000000e+00 : f32
    %11 = vector.broadcast %cst_9 : f32 to vector<16x512xf32>
    %12 = arith.minimumf %8, %11 : vector<16x512xf32>
    %13 = math.exp %12 : vector<16x512xf32>
    %cst_10 = arith.constant 1.000000e+00 : f32
    %14 = vector.broadcast %cst_10 : f32 to vector<16x512xf32>
    %15 = arith.subf %13, %14 : vector<16x512xf32>
    %16 = arith.select %10, %8, %15 : vector<16x512xi1>, vector<16x512xf32>
    %17 = arith.truncf %16 : vector<16x512xf32> to vector<16x512xbf16>
    %c0_11 = arith.constant 0 : index
    %c0_12 = arith.constant 0 : index
    %c0_13 = arith.constant 0 : index
    %18 = vector.load %arg4[%c0_11, %c0_12, %c0_13] : memref<1x16x512xbf16, #tpu.memory_space<vmem>>, vector<1x16x512xbf16>
    %19 = vector.shape_cast %18 : vector<1x16x512xbf16> to vector<16x512xbf16>
    %20 = vector.shape_cast %17 : vector<16x512xbf16> to vector<1x16x512xbf16>
    tpu.vector_store %arg4[%c0_11, %c0_12, %c0_13], %20 {strides = array<i32>} : memref<1x16x512xbf16, #tpu.memory_space<vmem>>, vector<1x16x512xbf16>,
    return
  }
  func.func @transform_0(%arg0: i32) -> (i32, i32, i32) {
    %c0_i32 = arith.constant 0 : i32
    %c0_i32_0 = arith.constant 0 : i32
    %c0_i32_1 = arith.constant 0 : i32
    return %arg0, %c0_i32, %c0_i32_0 : i32, i32, i32
  }
  func.func @transform_1(%arg0: i32) -> (i32, i32, i32) {
    %c0_i32 = arith.constant 0 : i32
    %c0_i32_0 = arith.constant 0 : i32
    %c0_i32_1 = arith.constant 0 : i32
    return %arg0, %c0_i32, %c0_i32_0 : i32, i32, i32
  }
  func.func @transform_2(%arg0: i32) -> (i32, i32, i32) {
    %c0_i32 = arith.constant 0 : i32
    %c0_i32_0 = arith.constant 0 : i32
    %c0_i32_1 = arith.constant 0 : i32
    return %arg0, %c0_i32, %c0_i32_0 : i32, i32, i32
  }
  func.func @transform_3(%arg0: i32) -> (i32, i32, i32) {
    %c0_i32 = arith.constant 0 : i32
    %c0_i32_0 = arith.constant 0 : i32
    %c0_i32_1 = arith.constant 0 : i32
    return %arg0, %c0_i32, %c0_i32_0 : i32, i32, i32
  }
}

module attributes {stable_mosaic.version = 11 : i64} {
  func.func @_conv_elu_kernel(%arg0: i32, %arg1: memref<1x256x128xbf16, #tpu.memory_space<vmem>>, %arg2: memref<1x32x256xbf16, #tpu.memory_space<vmem>>, %arg3: memref<1x32x1xf32, #tpu.memory_space<vmem>>, %arg4: memref<1x32x128xbf16, #tpu.memory_space<vmem>>) attributes {dimension_semantics = [#tpu.dimension_semantics<parallel>], iteration_bounds = array<i64: 2>, scalar_prefetch = 0 : i64, scratch_operands = 0 : i64, tpu.core_type = #tpu.core_type<tc>, window_params = [{transform_indices = @transform_0, window_bounds = array<i64: 1, 256, 128>}, {transform_indices = @transform_1, window_bounds = array<i64: 1, 32, 256>}, {transform_indices = @transform_2, window_bounds = array<i64: 1, 32, 1>}, {transform_indices = @transform_3, window_bounds = array<i64: 1, 32, 128>}]} {
    %c0 = arith.constant 0 : index
    %c0_0 = arith.constant 0 : index
    %c0_1 = arith.constant 0 : index
    %0 = vector.load %arg2[%c0, %c0_0, %c0_1] : memref<1x32x256xbf16, #tpu.memory_space<vmem>>, vector<1x32x256xbf16>
    %1 = vector.shape_cast %0 : vector<1x32x256xbf16> to vector<32x256xbf16>
    %c0_2 = arith.constant 0 : index
    %c0_3 = arith.constant 0 : index
    %c0_4 = arith.constant 0 : index
    %2 = vector.load %arg1[%c0_2, %c0_3, %c0_4] : memref<1x256x128xbf16, #tpu.memory_space<vmem>>, vector<1x256x128xbf16>
    %3 = vector.shape_cast %2 : vector<1x256x128xbf16> to vector<256x128xbf16>
    %cst = arith.constant dense<0.000000e+00> : vector<32x128xf32>
    %4 = tpu.matmul %1, %3, %cst {dimension_numbers = #tpu.dot_dimension_numbers<[1], [0], [0], [1], [0, 0, 1, 1], [], []>} : vector<32x256xbf16>, vector<256x128xbf16>, vector<32x128xf32> -> vector<32x128xf32>
    %c0_5 = arith.constant 0 : index
    %c0_6 = arith.constant 0 : index
    %c0_7 = arith.constant 0 : index
    %5 = vector.load %arg3[%c0_5, %c0_6, %c0_7] : memref<1x32x1xf32, #tpu.memory_space<vmem>>, vector<1x32x1xf32>
    %6 = vector.shape_cast %5 : vector<1x32x1xf32> to vector<32x1xf32>
    %7 = vector.broadcast %6 : vector<32x1xf32> to vector<32x128xf32>
    %8 = arith.addf %4, %7 : vector<32x128xf32>
    %cst_8 = arith.constant 0.000000e+00 : f32
    %9 = vector.broadcast %cst_8 : f32 to vector<32x128xf32>
    %10 = arith.cmpf ogt, %8, %9 : vector<32x128xf32>
    %cst_9 = arith.constant 0.000000e+00 : f32
    %11 = vector.broadcast %cst_9 : f32 to vector<32x128xf32>
    %12 = arith.minimumf %8, %11 : vector<32x128xf32>
    %13 = math.exp %12 : vector<32x128xf32>
    %cst_10 = arith.constant 1.000000e+00 : f32
    %14 = vector.broadcast %cst_10 : f32 to vector<32x128xf32>
    %15 = arith.subf %13, %14 : vector<32x128xf32>
    %16 = arith.select %10, %8, %15 : vector<32x128xi1>, vector<32x128xf32>
    %17 = arith.truncf %16 : vector<32x128xf32> to vector<32x128xbf16>
    %c0_11 = arith.constant 0 : index
    %c0_12 = arith.constant 0 : index
    %c0_13 = arith.constant 0 : index
    %18 = vector.load %arg4[%c0_11, %c0_12, %c0_13] : memref<1x32x128xbf16, #tpu.memory_space<vmem>>, vector<1x32x128xbf16>
    %19 = vector.shape_cast %18 : vector<1x32x128xbf16> to vector<32x128xbf16>
    %20 = vector.shape_cast %17 : vector<32x128xbf16> to vector<1x32x128xbf16>
    tpu.vector_store %arg4[%c0_11, %c0_12, %c0_13], %20 {strides = array<i32>} : memref<1x32x128xbf16, #tpu.memory_space<vmem>>, vector<1x32x128xbf16>,
    return
  }
  func.func @transform_0(%arg0: i32) -> (i32, i32, i32) {
    %c0_i32 = arith.constant 0 : i32
    %c0_i32_0 = arith.constant 0 : i32
    %c0_i32_1 = arith.constant 0 : i32
    return %arg0, %c0_i32, %c0_i32_0 : i32, i32, i32
  }
  func.func @transform_1(%arg0: i32) -> (i32, i32, i32) {
    %c0_i32 = arith.constant 0 : i32
    %c0_i32_0 = arith.constant 0 : i32
    %c0_i32_1 = arith.constant 0 : i32
    return %arg0, %c0_i32, %c0_i32_0 : i32, i32, i32
  }
  func.func @transform_2(%arg0: i32) -> (i32, i32, i32) {
    %c0_i32 = arith.constant 0 : i32
    %c0_i32_0 = arith.constant 0 : i32
    %c0_i32_1 = arith.constant 0 : i32
    return %arg0, %c0_i32, %c0_i32_0 : i32, i32, i32
  }
  func.func @transform_3(%arg0: i32) -> (i32, i32, i32) {
    %c0_i32 = arith.constant 0 : i32
    %c0_i32_0 = arith.constant 0 : i32
    %c0_i32_1 = arith.constant 0 : i32
    return %arg0, %c0_i32, %c0_i32_0 : i32, i32, i32
  }
}

module attributes {stable_mosaic.version = 11 : i64} {
  func.func @kernel(%arg0: memref<2x4096xbf16, #tpu.memory_space<vmem>>, %arg1: memref<4096x128xbf16, #tpu.memory_space<vmem>>, %arg2: memref<1x128xf32, #tpu.memory_space<vmem>>, %arg3: memref<128x256xbf16, #tpu.memory_space<vmem>>, %arg4: memref<1x256xf32, #tpu.memory_space<vmem>>, %arg5: memref<2x256xf32, #tpu.memory_space<vmem>>) attributes {dimension_semantics = [], scalar_prefetch = 0 : i64, scratch_operands = 0 : i64, tpu.core_type = #tpu.core_type<tc>} {
    %c0 = arith.constant 0 : index
    %c0_0 = arith.constant 0 : index
    %0 = vector.load %arg0[%c0, %c0_0] : memref<2x4096xbf16, #tpu.memory_space<vmem>>, vector<2x4096xbf16>
    %c0_1 = arith.constant 0 : index
    %c0_2 = arith.constant 0 : index
    %1 = vector.load %arg1[%c0_1, %c0_2] : memref<4096x128xbf16, #tpu.memory_space<vmem>>, vector<4096x128xbf16>
    %cst = arith.constant dense<0.000000e+00> : vector<2x128xf32>
    %2 = tpu.matmul %0, %1, %cst {dimension_numbers = #tpu.dot_dimension_numbers<[1], [0], [0], [1], [0, 0, 1, 1], [], []>} : vector<2x4096xbf16>, vector<4096x128xbf16>, vector<2x128xf32> -> vector<2x128xf32>
    %c0_3 = arith.constant 0 : index
    %c0_4 = arith.constant 0 : index
    %3 = vector.load %arg2[%c0_3, %c0_4] : memref<1x128xf32, #tpu.memory_space<vmem>>, vector<1x128xf32>
    %4 = vector.broadcast %3 : vector<1x128xf32> to vector<2x128xf32>
    %5 = arith.addf %2, %4 : vector<2x128xf32>
    %cst_5 = arith.constant 0.000000e+00 : f32
    %6 = vector.broadcast %cst_5 : f32 to vector<2x128xf32>
    %7 = arith.cmpf ogt, %5, %6 : vector<2x128xf32>
    %cst_6 = arith.constant 0.000000e+00 : f32
    %8 = vector.broadcast %cst_6 : f32 to vector<2x128xf32>
    %9 = arith.minimumf %5, %8 : vector<2x128xf32>
    %10 = math.exp %9 : vector<2x128xf32>
    %cst_7 = arith.constant 1.000000e+00 : f32
    %11 = vector.broadcast %cst_7 : f32 to vector<2x128xf32>
    %12 = arith.subf %10, %11 : vector<2x128xf32>
    %13 = arith.select %7, %5, %12 : vector<2x128xi1>, vector<2x128xf32>
    %14 = arith.truncf %13 : vector<2x128xf32> to vector<2x128xbf16>
    %c0_8 = arith.constant 0 : index
    %c0_9 = arith.constant 0 : index
    %15 = vector.load %arg3[%c0_8, %c0_9] : memref<128x256xbf16, #tpu.memory_space<vmem>>, vector<128x256xbf16>
    %cst_10 = arith.constant dense<0.000000e+00> : vector<2x256xf32>
    %16 = tpu.matmul %14, %15, %cst_10 {dimension_numbers = #tpu.dot_dimension_numbers<[1], [0], [0], [1], [0, 0, 1, 1], [], []>} : vector<2x128xbf16>, vector<128x256xbf16>, vector<2x256xf32> -> vector<2x256xf32>
    %c0_11 = arith.constant 0 : index
    %c0_12 = arith.constant 0 : index
    %17 = vector.load %arg4[%c0_11, %c0_12] : memref<1x256xf32, #tpu.memory_space<vmem>>, vector<1x256xf32>
    %18 = vector.broadcast %17 : vector<1x256xf32> to vector<2x256xf32>
    %19 = arith.addf %16, %18 : vector<2x256xf32>
    %20 = tpu.iota {dimensions = array<i32: 1>} : vector<2x256xi32>
    %c0_i32 = arith.constant 0 : i32
    %21 = vector.broadcast %c0_i32 : i32 to vector<2x256xi32>
    %22 = arith.cmpi sge, %20, %21 : vector<2x256xi32>
    %c12_i32 = arith.constant 12 : i32
    %23 = vector.broadcast %c12_i32 : i32 to vector<2x256xi32>
    %24 = arith.cmpi slt, %20, %23 : vector<2x256xi32>
    %25 = arith.andi %22, %24 : vector<2x256xi1>
    %cst_13 = arith.constant 0xFF800000 : f32
    %26 = vector.broadcast %cst_13 : f32 to vector<2x256xf32>
    %27 = arith.select %25, %19, %26 : vector<2x256xi1>, vector<2x256xf32>
    %cst_14 = arith.constant dense<0xFF800000> : vector<2xf32>
    %28 = vector.multi_reduction <maximumf>, %27, %cst_14 [1] : vector<2x256xf32> to vector<2xf32>
    %29 = vector.shape_cast %28 : vector<2xf32> to vector<2x1xf32>
    %30 = vector.broadcast %29 : vector<2x1xf32> to vector<2x256xf32>
    %31 = arith.subf %27, %30 : vector<2x256xf32>
    %32 = math.exp %31 : vector<2x256xf32>
    %cst_15 = arith.constant dense<0.000000e+00> : vector<2xf32>
    %33 = vector.multi_reduction <add>, %32, %cst_15 [1] : vector<2x256xf32> to vector<2xf32>
    %34 = vector.shape_cast %33 : vector<2xf32> to vector<2x1xf32>
    %35 = tpu.reciprocal %34 {approx = true} : vector<2x1xf32> -> vector<2x1xf32>
    %36 = arith.mulf %34, %35 : vector<2x1xf32>
    %cst_16 = arith.constant 2.000000e+00 : f32
    %37 = vector.broadcast %cst_16 : f32 to vector<2x1xf32>
    %38 = arith.subf %37, %36 : vector<2x1xf32>
    %39 = arith.mulf %35, %38 : vector<2x1xf32>
    %40 = vector.broadcast %39 : vector<2x1xf32> to vector<2x256xf32>
    %41 = arith.mulf %32, %40 : vector<2x256xf32>
    %42 = arith.select %25, %41, %19 : vector<2x256xi1>, vector<2x256xf32>
    %c64_i32 = arith.constant 64 : i32
    %43 = vector.broadcast %c64_i32 : i32 to vector<2x256xi32>
    %44 = arith.cmpi sge, %20, %43 : vector<2x256xi32>
    %c128_i32 = arith.constant 128 : i32
    %45 = vector.broadcast %c128_i32 : i32 to vector<2x256xi32>
    %46 = arith.cmpi slt, %20, %45 : vector<2x256xi32>
    %47 = arith.andi %44, %46 : vector<2x256xi1>
    %cst_17 = arith.constant 0xFF800000 : f32
    %48 = vector.broadcast %cst_17 : f32 to vector<2x256xf32>
    %49 = arith.select %47, %19, %48 : vector<2x256xi1>, vector<2x256xf32>
    %cst_18 = arith.constant dense<0xFF800000> : vector<2xf32>
    %50 = vector.multi_reduction <maximumf>, %49, %cst_18 [1] : vector<2x256xf32> to vector<2xf32>
    %51 = vector.shape_cast %50 : vector<2xf32> to vector<2x1xf32>
    %52 = vector.broadcast %51 : vector<2x1xf32> to vector<2x256xf32>
    %53 = arith.subf %49, %52 : vector<2x256xf32>
    %54 = math.exp %53 : vector<2x256xf32>
    %cst_19 = arith.constant dense<0.000000e+00> : vector<2xf32>
    %55 = vector.multi_reduction <add>, %54, %cst_19 [1] : vector<2x256xf32> to vector<2xf32>
    %56 = vector.shape_cast %55 : vector<2xf32> to vector<2x1xf32>
    %57 = tpu.reciprocal %56 {approx = true} : vector<2x1xf32> -> vector<2x1xf32>
    %58 = arith.mulf %56, %57 : vector<2x1xf32>
    %cst_20 = arith.constant 2.000000e+00 : f32
    %59 = vector.broadcast %cst_20 : f32 to vector<2x1xf32>
    %60 = arith.subf %59, %58 : vector<2x1xf32>
    %61 = arith.mulf %57, %60 : vector<2x1xf32>
    %62 = vector.broadcast %61 : vector<2x1xf32> to vector<2x256xf32>
    %63 = arith.mulf %54, %62 : vector<2x256xf32>
    %64 = arith.select %47, %63, %42 : vector<2x256xi1>, vector<2x256xf32>
    %c128_i32_21 = arith.constant 128 : i32
    %65 = vector.broadcast %c128_i32_21 : i32 to vector<2x256xi32>
    %66 = arith.cmpi sge, %20, %65 : vector<2x256xi32>
    %c192_i32 = arith.constant 192 : i32
    %67 = vector.broadcast %c192_i32 : i32 to vector<2x256xi32>
    %68 = arith.cmpi slt, %20, %67 : vector<2x256xi32>
    %69 = arith.andi %66, %68 : vector<2x256xi1>
    %cst_22 = arith.constant 0xFF800000 : f32
    %70 = vector.broadcast %cst_22 : f32 to vector<2x256xf32>
    %71 = arith.select %69, %19, %70 : vector<2x256xi1>, vector<2x256xf32>
    %cst_23 = arith.constant dense<0xFF800000> : vector<2xf32>
    %72 = vector.multi_reduction <maximumf>, %71, %cst_23 [1] : vector<2x256xf32> to vector<2xf32>
    %73 = vector.shape_cast %72 : vector<2xf32> to vector<2x1xf32>
    %74 = vector.broadcast %73 : vector<2x1xf32> to vector<2x256xf32>
    %75 = arith.subf %71, %74 : vector<2x256xf32>
    %76 = math.exp %75 : vector<2x256xf32>
    %cst_24 = arith.constant dense<0.000000e+00> : vector<2xf32>
    %77 = vector.multi_reduction <add>, %76, %cst_24 [1] : vector<2x256xf32> to vector<2xf32>
    %78 = vector.shape_cast %77 : vector<2xf32> to vector<2x1xf32>
    %79 = tpu.reciprocal %78 {approx = true} : vector<2x1xf32> -> vector<2x1xf32>
    %80 = arith.mulf %78, %79 : vector<2x1xf32>
    %cst_25 = arith.constant 2.000000e+00 : f32
    %81 = vector.broadcast %cst_25 : f32 to vector<2x1xf32>
    %82 = arith.subf %81, %80 : vector<2x1xf32>
    %83 = arith.mulf %79, %82 : vector<2x1xf32>
    %84 = vector.broadcast %83 : vector<2x1xf32> to vector<2x256xf32>
    %85 = arith.mulf %76, %84 : vector<2x256xf32>
    %86 = arith.select %69, %85, %64 : vector<2x256xi1>, vector<2x256xf32>
    %c0_26 = arith.constant 0 : index
    %c0_27 = arith.constant 0 : index
    %87 = vector.load %arg5[%c0_26, %c0_27] : memref<2x256xf32, #tpu.memory_space<vmem>>, vector<2x256xf32>
    tpu.vector_store %arg5[%c0_26, %c0_27], %86 {strides = array<i32>} : memref<2x256xf32, #tpu.memory_space<vmem>>, vector<2x256xf32>,
    return
  }
}

</mosaic_0001>

<bundles_post_ra>
// kernel: forward.3
= control target key start
LH: loop header
LB: loop body
LE: loop exit
PB: predicated region body
PF: predicated region fallthrough
CT: control target
= control target key end

     0   :  { %s1778_s12 = smov 0   ;;  %s1946_s0 = inlined_call_operand.vmem [shape: bf16[2,512,512], index: 0, kind: input, shape index: {}]   ;;  %s1947_s1 = inlined_call_operand.vmem [shape: bf16[2,16,512], index: 1, kind: input, shape index: {}]   ;;  %s1948_s2 = inlined_call_operand.vmem [shape: f32[2,16,1], index: 2, kind: input, shape index: {}]   ;;  %s1949_s3 = inlined_call_operand.vmem [shape: bf16[2,16,512], index: 3, kind: output, shape index: {}]  }
   0x1 LB: > { %s1342_s13 = sadd.s32 4294967295, %s1755_s12   ;;  %p1346_p0 = scmp.ge.s32.totalorder %s1755_s12, 1  ;;  %s1755_s12 = sphi %s1778_s12, %s13_s12  }
   0x2   : > { %p157_p1 = scmp.lt.s32.totalorder %s1755_s12, 3 }
   0x4   : > { %p158_p2 = pnand %p1346_p0, %p157_p1 }
   0x5   : > { %p191_p3 = scmp.lt.s32.totalorder (!%p158_p2), %s1342_s13, 1  ;;  %v1757_v8 = vmov (!%p158_p2), 0  }
   0x6   : > { %161 = sbr.rel (%p158_p2) target bundleno = 387 (0x183), region = 32  ;;  %1534 = vset.pattern.permute.xlu0 (!%p158_p2), %v1757_v8 }
   0xd   : > { %s1951_s13 = smov (!%p191_p3, %s1342_s13), 1 }
   0xe   : > { %s1501_s14 = sshll.u32 %s1951_s13, 10  ;;  %s1502_s18 = sshll.u32 %s1951_s13, 5 }
   0xf   : > { %s1792_s17 = scalar_lea.vmem %s1946_s0, %s1501_s14  ;;  %s1845_s21 = scalar_lea.vmem %s1947_s1, %s1502_s18 }
  0x10   : > { %v1535_v0 = vld [vmem:[%s1792_s17 + $0x4] ss:$16 sps:$4 sm:$0xff]   ;;  %v1537_v1 = vld [vmem:[%s1792_s17 + $0xc] ss:$16 sps:$4 sm:$0xff]   ;;  %v1539_v2 = vld [vmem:[%s1792_s17] ss:$16 sps:$4 sm:$0xff]   ;;  %s210_s28 = scalar_lea.vmem %s1949_s3, %s1502_s18 }
  0x11   : > { %1015 = vmatprep.subr.bf16.mxu0 %v1535_v0  ;;  %v1540_v3 = vld [vmem:[%s1792_s17 + $0x8] ss:$16 sps:$4 sm:$0xff]   ;;  %1101 = vmatprep.subr.bf16.mxu1 %v1537_v1  ;;  %v1541_v4 = vld [vmem:[%s1792_s17 + $0x24] ss:$16 sps:$4 sm:$0xff]   ;;  %v1543_v5 = vld [vmem:[%s1792_s17 + $0x2c] ss:$16 sps:$4 sm:$0xff]  }
  0x12   : > { %1016 = vmatpush1.bf16.msra.mxu0 %v1539_v2  ;;  %1102 = vmatpush1.bf16.msra.mxu1 %v1540_v3  ;;  %v1545_v6 = vld [vmem:[%s1792_s17 + $0x20] ss:$16 sps:$4 sm:$0xff]   ;;  %v1546_v7 = vld [vmem:[%s1792_s17 + $0x28] ss:$16 sps:$4 sm:$0xff]   ;;  %v1547_v9 = vld [vmem:[%s1792_s17 + $0x44] ss:$16 sps:$4 sm:$0xff]  }
  0x13   : > { %1017 = vmatprep.subr.bf16.mxu0 %v1541_v4  ;;  %1103 = vmatprep.subr.bf16.mxu1 %v1543_v5  ;;  %v1549_v10 = vld [vmem:[%s1792_s17 + $0x4c] ss:$16 sps:$4 sm:$0xff]   ;;  %v1551_v11 = vld [vmem:[%s1792_s17 + $0x40] ss:$16 sps:$4 sm:$0xff]   ;;  %v1552_v12 = vld [vmem:[%s1792_s17 + $0x48] ss:$16 sps:$4 sm:$0xff]  }
  0x14   : > { %v1553_v13 = vld [vmem:[%s1792_s17 + $0x64] ss:$16 sps:$4 sm:$0xff]   ;;  %v1555_v14 = vld [vmem:[%s1792_s17 + $0x6c] ss:$16 sps:$4 sm:$0xff]   ;;  %v1557_v15 = vld [vmem:[%s1792_s17 + $0x60] ss:$16 sps:$4 sm:$0xff]  }
  0x15   : > { %v1558_v16 = vld [vmem:[%s1792_s17 + $0x68] ss:$16 sps:$4 sm:$0xff]   ;;  %v1559_v17 = vld [vmem:[%s1792_s17 + $0x84] ss:$16 sps:$4 sm:$0xff]   ;;  %v1561_v18 = vld [vmem:[%s1792_s17 + $0x8c] ss:$16 sps:$4 sm:$0xff]  }
  0x16   : > { %1018 = vmatpush1.bf16.msra.mxu0 %v1545_v6  ;;  %1104 = vmatpush1.bf16.msra.mxu1 %v1546_v7  ;;  %v1563_v19 = vld [vmem:[%s1792_s17 + $0x80] ss:$16 sps:$4 sm:$0xff]   ;;  %v1564_v20 = vld [vmem:[%s1792_s17 + $0x88] ss:$16 sps:$4 sm:$0xff]   ;;  %v1565_v21 = vld [vmem:[%s1792_s17 + $0xa4] ss:$16 sps:$4 sm:$0xff]  }
  0x17   : > { %1019 = vmatprep.subr.bf16.mxu0 %v1547_v9  ;;  %1105 = vmatprep.subr.bf16.mxu1 %v1549_v10  ;;  %v1567_v22 = vld [vmem:[%s1792_s17 + $0xac] ss:$16 sps:$4 sm:$0xff]   ;;  %v1569_v23 = vld [vmem:[%s1792_s17 + $0xa0] ss:$16 sps:$4 sm:$0xff]   ;;  %v1570_v24 = vld [vmem:[%s1792_s17 + $0xa8] ss:$16 sps:$4 sm:$0xff]  }
  0x18   : > { %v1571_v25 = vld [vmem:[%s1792_s17 + $0xc4] ss:$16 sps:$4 sm:$0xff]   ;;  %v1573_v26 = vld [vmem:[%s1792_s17 + $0xcc] ss:$16 sps:$4 sm:$0xff]   ;;  %v1575_v27 = vld [vmem:[%s1792_s17 + $0xc0] ss:$16 sps:$4 sm:$0xff]  }
  0x19   : > { %v1576_v28 = vld [vmem:[%s1792_s17 + $0xc8] ss:$16 sps:$4 sm:$0xff]   ;;  %v1577_v29 = vld [vmem:[%s1792_s17 + $0xe4] ss:$16 sps:$4 sm:$0xff]   ;;  %v1579_v30 = vld [vmem:[%s1792_s17 + $0xec] ss:$16 sps:$4 sm:$0xff]  }
  0x1a   : > { %1020 = vmatpush1.bf16.msra.mxu0 %v1551_v11  ;;  %1106 = vmatpush1.bf16.msra.mxu1 %v1552_v12  ;;  %v1581_v31 = vld [vmem:[%s1792_s17 + $0xe0] ss:$16 sps:$4 sm:$0xff]   ;;  %v1582_v32 = vld [vmem:[%s1792_s17 + $0xe8] ss:$16 sps:$4 sm:$0xff]   ;;  %v1583_v33 = vld [vmem:[%s1792_s17 + $0x104] ss:$16 sps:$4 sm:$0xff]  }
  0x1b   : > { %1021 = vmatprep.subr.bf16.mxu0 %v1553_v13  ;;  %1107 = vmatprep.subr.bf16.mxu1 %v1555_v14  ;;  %v1585_v34 = vld [vmem:[%s1792_s17 + $0x10c] ss:$16 sps:$4 sm:$0xff]   ;;  %v1587_v35 = vld [vmem:[%s1792_s17 + $0x100] ss:$16 sps:$4 sm:$0xff]   ;;  %v1588_v36 = vld [vmem:[%s1792_s17 + $0x108] ss:$16 sps:$4 sm:$0xff]  }
  0x1c   : > { %v1589_v37 = vld [vmem:[%s1792_s17 + $0x124] ss:$16 sps:$4 sm:$0xff]   ;;  %v1591_v38 = vld [vmem:[%s1792_s17 + $0x12c] ss:$16 sps:$4 sm:$0xff]   ;;  %v1593_v39 = vld [vmem:[%s1792_s17 + $0x120] ss:$16 sps:$4 sm:$0xff]  }
  0x1d   : > { %v1594_v40 = vld [vmem:[%s1792_s17 + $0x128] ss:$16 sps:$4 sm:$0xff]   ;;  %v1595_v41 = vld [vmem:[%s1792_s17 + $0x144] ss:$16 sps:$4 sm:$0xff]   ;;  %v1597_v42 = vld [vmem:[%s1792_s17 + $0x14c] ss:$16 sps:$4 sm:$0xff]  }
  0x1e   : > { %1022 = vmatpush1.bf16.msra.mxu0 %v1557_v15  ;;  %1108 = vmatpush1.bf16.msra.mxu1 %v1558_v16  ;;  %v1599_v43 = vld [vmem:[%s1792_s17 + $0x140] ss:$16 sps:$4 sm:$0xff]   ;;  %v1600_v44 = vld [vmem:[%s1792_s17 + $0x148] ss:$16 sps:$4 sm:$0xff]   ;;  %v1601_v45 = vld [vmem:[%s1792_s17 + $0x164] ss:$16 sps:$4 sm:$0xff]  }
  0x1f   : > { %1023 = vmatprep.subr.bf16.mxu0 %v1559_v17  ;;  %1109 = vmatprep.subr.bf16.mxu1 %v1561_v18  ;;  %v1603_v46 = vld [vmem:[%s1792_s17 + $0x16c] ss:$16 sps:$4 sm:$0xff]   ;;  %v1605_v47 = vld [vmem:[%s1792_s17 + $0x160] ss:$16 sps:$4 sm:$0xff]   ;;  %v1606_v48 = vld [vmem:[%s1792_s17 + $0x168] ss:$16 sps:$4 sm:$0xff]  }
  0x20   : > { %v1633_v49 = vld [vmem:[%s1845_s21 + $0x4] ss:$16 sps:$4 sm:$0xff]   ;;  %v1609_v51 = vld [vmem:[%s1792_s17 + $0x18c] ss:$16 sps:$4 sm:$0xff]   ;;  %v1611_v52 = vld [vmem:[%s1792_s17 + $0x180] ss:$16 sps:$4 sm:$0xff]  }
  0x21   : > { %v1607_v50 = vld [vmem:[%s1792_s17 + $0x184] ss:$16 sps:$4 sm:$0xff]   ;;  %1047 = vmatprep.mubr.bf16.mxu0 %v1633_v49  ;;  %1133 = vmatprep.mubr.bf16.mxu1 %v1633_v49  ;;  %v1612_v53 = vld [vmem:[%s1792_s17 + $0x188] ss:$16 sps:$4 sm:$0xff]   ;;  %v1615_v55 = vld [vmem:[%s1792_s17 + $0x1ac] ss:$16 sps:$4 sm:$0xff]  }
  0x22   : > { %1024 = vmatpush1.bf16.msra.mxu0 %v1563_v19  ;;  %1110 = vmatpush1.bf16.msra.mxu1 %v1564_v20  ;;  %v1613_v54 = vld [vmem:[%s1792_s17 + $0x1a4] ss:$16 sps:$4 sm:$0xff]   ;;  %v1617_v56 = vld [vmem:[%s1792_s17 + $0x1a0] ss:$16 sps:$4 sm:$0xff]   ;;  %v1618_v57 = vld [vmem:[%s1792_s17 + $0x1a8] ss:$16 sps:$4 sm:$0xff]  }
  0x23   : > { %1025 = vmatprep.subr.bf16.mxu0 %v1565_v21  ;;  %1111 = vmatprep.subr.bf16.mxu1 %v1567_v22  ;;  %v1619_v58 = vld [vmem:[%s1792_s17 + $0x1c4] ss:$16 sps:$4 sm:$0xff]   ;;  %v1621_v59 = vld [vmem:[%s1792_s17 + $0x1cc] ss:$16 sps:$4 sm:$0xff]   ;;  %v1623_v60 = vld [vmem:[%s1792_s17 + $0x1c0] ss:$16 sps:$4 sm:$0xff]  }
  0x24   : > { %v1624_v61 = vld [vmem:[%s1792_s17 + $0x1c8] ss:$16 sps:$4 sm:$0xff]   ;;  %v1625_v62 = vld [vmem:[%s1792_s17 + $0x1e4] ss:$16 sps:$4 sm:$0xff]   ;;  %v1627_v63 = vld [vmem:[%s1792_s17 + $0x1ec] ss:$16 sps:$4 sm:$0xff]  }
  0x25   : > { %v1629_v0 = vld [vmem:[%s1792_s17 + $0x1e0] ss:$16 sps:$4 sm:$0xff]   ;;  %v1630_v1 = vld [vmem:[%s1792_s17 + $0x1e8] ss:$16 sps:$4 sm:$0xff]   ;;  %v1636_v2 = vld [vmem:[%s1792_s17 + $0x204] ss:$16 sps:$4 sm:$0xff]  }
  0x26   : > { %1026 = vmatpush1.bf16.msra.mxu0 %v1569_v23  ;;  %1112 = vmatpush1.bf16.msra.mxu1 %v1570_v24  ;;  %v1639_v3 = vld [vmem:[%s1792_s17 + $0x20c] ss:$16 sps:$4 sm:$0xff]   ;;  %v1631_v4 = vld [vmem:[%s1845_s21] ss:$16 sps:$4 sm:$0xff]   ;;  %v1637_v6 = vld [vmem:[%s1792_s17 + $0x208] ss:$16 sps:$4 sm:$0xff]  }
  0x27   : > { %1027 = vmatprep.subr.bf16.mxu0 %v1571_v25  ;;  %1113 = vmatprep.subr.bf16.mxu1 %v1573_v26  ;;  %v1634_v5 = vld [vmem:[%s1792_s17 + $0x200] ss:$16 sps:$4 sm:$0xff]   ;;  %v1642_v7 = vld [vmem:[%s1792_s17 + $0x224] ss:$16 sps:$4 sm:$0xff]   ;;  %v1645_v8 = vld [vmem:[%s1792_s17 + $0x22c] ss:$16 sps:$4 sm:$0xff]  }
  0x28   : > { %v1640_v9 = vld [vmem:[%s1792_s17 + $0x220] ss:$16 sps:$4 sm:$0xff]   ;;  %v1643_v10 = vld [vmem:[%s1792_s17 + $0x228] ss:$16 sps:$4 sm:$0xff]   ;;  %v1648_v11 = vld [vmem:[%s1792_s17 + $0x244] ss:$16 sps:$4 sm:$0xff]  }
  0x29   : > { %v1651_v12 = vld [vmem:[%s1792_s17 + $0x24c] ss:$16 sps:$4 sm:$0xff]   ;;  %v1646_v13 = vld [vmem:[%s1792_s17 + $0x240] ss:$16 sps:$4 sm:$0xff]   ;;  %v1649_v14 = vld [vmem:[%s1792_s17 + $0x248] ss:$16 sps:$4 sm:$0xff]  }
  0x2a   : > { %1028 = vmatpush1.bf16.msra.mxu0 %v1575_v27  ;;  %1114 = vmatpush1.bf16.msra.mxu1 %v1576_v28  ;;  %v1654_v15 = vld [vmem:[%s1792_s17 + $0x264] ss:$16 sps:$4 sm:$0xff]   ;;  %v1657_v16 = vld [vmem:[%s1792_s17 + $0x26c] ss:$16 sps:$4 sm:$0xff]   ;;  %v1652_v17 = vld [vmem:[%s1792_s17 + $0x260] ss:$16 sps:$4 sm:$0xff]  }
  0x2b   : > { %1029 = vmatprep.subr.bf16.mxu0 %v1577_v29  ;;  %1115 = vmatprep.subr.bf16.mxu1 %v1579_v30  ;;  %v1655_v18 = vld [vmem:[%s1792_s17 + $0x268] ss:$16 sps:$4 sm:$0xff]   ;;  %v1660_v19 = vld [vmem:[%s1792_s17 + $0x284] ss:$16 sps:$4 sm:$0xff]   ;;  %v1663_v20 = vld [vmem:[%s1792_s17 + $0x28c] ss:$16 sps:$4 sm:$0xff]  }
  0x2c   : > { %v1658_v21 = vld [vmem:[%s1792_s17 + $0x280] ss:$16 sps:$4 sm:$0xff]   ;;  %v1661_v22 = vld [vmem:[%s1792_s17 + $0x288] ss:$16 sps:$4 sm:$0xff]   ;;  %v1666_v23 = vld [vmem:[%s1792_s17 + $0x2a4] ss:$16 sps:$4 sm:$0xff]  }
  0x2d   : > { %v1669_v24 = vld [vmem:[%s1792_s17 + $0x2ac] ss:$16 sps:$4 sm:$0xff]   ;;  %s1503_s22 = sshll.u32 %s1951_s13, 4  ;;  %v1664_v25 = vld [vmem:[%s1792_s17 + $0x2a0] ss:$16 sps:$4 sm:$0xff]  }
  0x2e   : > { %1030 = vmatpush1.bf16.msra.mxu0 %v1581_v31  ;;  %1116 = vmatpush1.bf16.msra.mxu1 %v1582_v32  ;;  %v1667_v26 = vld [vmem:[%s1792_s17 + $0x2a8] ss:$16 sps:$4 sm:$0xff]   ;;  %v1672_v27 = vld [vmem:[%s1792_s17 + $0x2c4] ss:$16 sps:$4 sm:$0xff]   ;;  %v1675_v28 = vld [vmem:[%s1792_s17 + $0x2cc] ss:$16 sps:$4 sm:$0xff]   ;;  %s205_s25 = scalar_lea.vmem %s1948_s2, %s1503_s22 }
  0x2f   : > { %1031 = vmatprep.subr.bf16.mxu0 %v1583_v33  ;;  %1117 = vmatprep.subr.bf16.mxu1 %v1585_v34  ;;  %v1732_v29 = vld [vmem:[%s1845_s21 + $0xc] ss:$16 sps:$4 sm:$0xff]   ;;  %v1670_v30 = vld [vmem:[%s1792_s17 + $0x2c0] ss:$16 sps:$4 sm:$0xff]   ;;  %v1673_v31 = vld [vmem:[%s1792_s17 + $0x2c8] ss:$16 sps:$4 sm:$0xff]  }
  0x30   : > { %v343_v32 = vld [vmem:[%s205_s25] sm:$0xff]  ;;  %v1681_v34 = vld [vmem:[%s1792_s17 + $0x2ec] ss:$16 sps:$4 sm:$0xff]   ;;  %v1697_v49 = vld [vmem:[%s1792_s17 + $0x348] ss:$16 sps:$4 sm:$0xff]  }
  0x31   : > { %v1678_v33 = vld [vmem:[%s1792_s17 + $0x2e4] ss:$16 sps:$4 sm:$0xff]   ;;  %347 = vperm.xlu0 %1534, %v343_v32  }
  0x32   : > { %1032 = vmatpush1.bf16.msra.mxu0 %v1587_v35  ;;  %1118 = vmatpush1.bf16.msra.mxu1 %v1588_v36  ;;  %v1676_v35 = vld [vmem:[%s1792_s17 + $0x2e0] ss:$16 sps:$4 sm:$0xff]   ;;  %v1679_v36 = vld [vmem:[%s1792_s17 + $0x2e8] ss:$16 sps:$4 sm:$0xff]  }
  0x33   : > { %1033 = vmatprep.subr.bf16.mxu0 %v1589_v37  ;;  %1119 = vmatprep.subr.bf16.mxu1 %v1591_v38  ;;  %v344_v37 = vld [vmem:[%s205_s25 + $0x8] sm:$0xff]  ;;  %v1684_v38 = vld [vmem:[%s1792_s17 + $0x304] ss:$16 sps:$4 sm:$0xff]  }
  0x35   : > { %352 = vperm.xlu0 %1534, %v344_v37  }
  0x36   : > { %1034 = vmatpush1.bf16.msra.mxu0 %v1593_v39  ;;  %1120 = vmatpush1.bf16.msra.mxu1 %v1594_v40  ;;  %v1687_v39 = vld [vmem:[%s1792_s17 + $0x30c] ss:$16 sps:$4 sm:$0xff]   ;;  %v1682_v40 = vld [vmem:[%s1792_s17 + $0x300] ss:$16 sps:$4 sm:$0xff]  }
  0x37   : > { %1035 = vmatprep.subr.bf16.mxu0 %v1595_v41  ;;  %1121 = vmatprep.subr.bf16.mxu1 %v1597_v42  ;;  %v1685_v41 = vld [vmem:[%s1792_s17 + $0x308] ss:$16 sps:$4 sm:$0xff]   ;;  %v1690_v42 = vld [vmem:[%s1792_s17 + $0x324] ss:$16 sps:$4 sm:$0xff]  }
  0x3a   : > { %1036 = vmatpush1.bf16.msra.mxu0 %v1599_v43  ;;  %1122 = vmatpush1.bf16.msra.mxu1 %v1600_v44  ;;  %v1693_v43 = vld [vmem:[%s1792_s17 + $0x32c] ss:$16 sps:$4 sm:$0xff]   ;;  %v1688_v44 = vld [vmem:[%s1792_s17 + $0x320] ss:$16 sps:$4 sm:$0xff]  }
  0x3b   : > { %1037 = vmatprep.subr.bf16.mxu0 %v1601_v45  ;;  %1123 = vmatprep.subr.bf16.mxu1 %v1603_v46  ;;  %v1691_v45 = vld [vmem:[%s1792_s17 + $0x328] ss:$16 sps:$4 sm:$0xff]   ;;  %v1696_v46 = vld [vmem:[%s1792_s17 + $0x344] ss:$16 sps:$4 sm:$0xff]  }
  0x3e   : > { %1038 = vmatpush1.bf16.msra.mxu0 %v1605_v47  ;;  %1124 = vmatpush1.bf16.msra.mxu1 %v1606_v48  ;;  %v1699_v47 = vld [vmem:[%s1792_s17 + $0x34c] ss:$16 sps:$4 sm:$0xff]   ;;  %v1694_v48 = vld [vmem:[%s1792_s17 + $0x340] ss:$16 sps:$4 sm:$0xff]  }
  0x3f   : > { %1039 = vmatprep.subr.bf16.mxu0 %v1607_v50  ;;  %1125 = vmatprep.subr.bf16.mxu1 %v1609_v51  ;;  %v1702_v50 = vld [vmem:[%s1792_s17 + $0x364] ss:$16 sps:$4 sm:$0xff]   ;;  %v1705_v51 = vld [vmem:[%s1792_s17 + $0x36c] ss:$16 sps:$4 sm:$0xff]  }
  0x42   : > { %1040 = vmatpush1.bf16.msra.mxu0 %v1611_v52  ;;  %1126 = vmatpush1.bf16.msra.mxu1 %v1612_v53  ;;  %v1700_v52 = vld [vmem:[%s1792_s17 + $0x360] ss:$16 sps:$4 sm:$0xff]   ;;  %v1703_v53 = vld [vmem:[%s1792_s17 + $0x368] ss:$16 sps:$4 sm:$0xff]  }
  0x43   : > { %1041 = vmatprep.subr.bf16.mxu0 %v1613_v54  ;;  %1127 = vmatprep.subr.bf16.mxu1 %v1615_v55  ;;  %v1708_v54 = vld [vmem:[%s1792_s17 + $0x384] ss:$16 sps:$4 sm:$0xff]   ;;  %v1711_v55 = vld [vmem:[%s1792_s17 + $0x38c] ss:$16 sps:$4 sm:$0xff]  }
  0x46   : > { %1042 = vmatpush1.bf16.msra.mxu0 %v1617_v56  ;;  %1128 = vmatpush1.bf16.msra.mxu1 %v1618_v57  ;;  %v1706_v56 = vld [vmem:[%s1792_s17 + $0x380] ss:$16 sps:$4 sm:$0xff]   ;;  %v1709_v57 = vld [vmem:[%s1792_s17 + $0x388] ss:$16 sps:$4 sm:$0xff]  }
  0x47   : > { %1043 = vmatprep.subr.bf16.mxu0 %v1619_v58  ;;  %1129 = vmatprep.subr.bf16.mxu1 %v1621_v59  ;;  %v1714_v58 = vld [vmem:[%s1792_s17 + $0x3a4] ss:$16 sps:$4 sm:$0xff]   ;;  %v1717_v59 = vld [vmem:[%s1792_s17 + $0x3ac] ss:$16 sps:$4 sm:$0xff]  }
  0x4a   : > { %1044 = vmatpush1.bf16.msra.mxu0 %v1623_v60  ;;  %1130 = vmatpush1.bf16.msra.mxu1 %v1624_v61  ;;  %v1712_v60 = vld [vmem:[%s1792_s17 + $0x3a0] ss:$16 sps:$4 sm:$0xff]   ;;  %v1715_v61 = vld [vmem:[%s1792_s17 + $0x3a8] ss:$16 sps:$4 sm:$0xff]  }
  0x4b   : > { %1045 = vmatprep.subr.bf16.mxu0 %v1625_v62  ;;  %1131 = vmatprep.subr.bf16.mxu1 %v1627_v63  ;;  %v1720_v62 = vld [vmem:[%s1792_s17 + $0x3c4] ss:$16 sps:$4 sm:$0xff]   ;;  %v1723_v63 = vld [vmem:[%s1792_s17 + $0x3cc] ss:$16 sps:$4 sm:$0xff]  }
  0x4e   : > { %1046 = vmatpush1.bf16.msra.mxu0 %v1629_v0  ;;  %1132 = vmatpush1.bf16.msra.mxu1 %v1630_v1  ;;  %v1718_v0 = vld [vmem:[%s1792_s17 + $0x3c0] ss:$16 sps:$4 sm:$0xff]   ;;  %v1721_v1 = vld [vmem:[%s1792_s17 + $0x3c8] ss:$16 sps:$4 sm:$0xff]  }
  0x4f   : > { %1058 = vmatprep.subr.bf16.mxu0 %v1636_v2  ;;  %1144 = vmatprep.subr.bf16.mxu1 %v1639_v3  ;;  %v1726_v2 = vld [vmem:[%s1792_s17 + $0x3e4] ss:$16 sps:$4 sm:$0xff]   ;;  %v1729_v3 = vld [vmem:[%s1792_s17 + $0x3ec] ss:$16 sps:$4 sm:$0xff]  }
  0x51   : > { %1048 = vmatmul.mubr.bf16.vlgmr.msra.gmra.mrb[0].mxu0 %v1631_v4  ;;  %1134 = vmatmul.mubr.bf16.vlgmr.msra.gmra.mrb[0].mxu1 %v1631_v4  ;;  %v1724_v4 = vld [vmem:[%s1792_s17 + $0x3e0] ss:$16 sps:$4 sm:$0xff]  }
  0x52   : > { %1059 = vmatpush1.bf16.msra.mxu0 %v1634_v5  ;;  %1145 = vmatpush1.bf16.msra.mxu1 %v1637_v6  ;;  %v1727_v5 = vld [vmem:[%s1792_s17 + $0x3e8] ss:$16 sps:$4 sm:$0xff]  }
  0x53   : > { %1060 = vmatprep.subr.bf16.mxu0 %v1642_v7  ;;  %1146 = vmatprep.subr.bf16.mxu1 %v1645_v8  ;;  %v1730_v6 = vld [vmem:[%s1845_s21 + $0x8] ss:$16 sps:$4 sm:$0xff]  }
  0x54   : > { %1090 = vmatprep.mubr.bf16.mxu0 %v1732_v29  ;;  %1176 = vmatprep.mubr.bf16.mxu1 %v1732_v29 }
  0x56   : > { %1061 = vmatpush1.bf16.msra.mxu0 %v1640_v9  ;;  %1147 = vmatpush1.bf16.msra.mxu1 %v1643_v10 }
  0x57   : > { %1062 = vmatprep.subr.bf16.mxu0 %v1648_v11  ;;  %1148 = vmatprep.subr.bf16.mxu1 %v1651_v12 }
  0x5a   : > { %1063 = vmatpush1.bf16.msra.mxu0 %v1646_v13  ;;  %1149 = vmatpush1.bf16.msra.mxu1 %v1649_v14 }
  0x5b   : > { %1064 = vmatprep.subr.bf16.mxu0 %v1654_v15  ;;  %1150 = vmatprep.subr.bf16.mxu1 %v1657_v16 }
  0x5e   : > { %1065 = vmatpush1.bf16.msra.mxu0 %v1652_v17  ;;  %1151 = vmatpush1.bf16.msra.mxu1 %v1655_v18 }
  0x5f   : > { %1066 = vmatprep.subr.bf16.mxu0 %v1660_v19  ;;  %1152 = vmatprep.subr.bf16.mxu1 %v1663_v20 }
  0x62   : > { %1067 = vmatpush1.bf16.msra.mxu0 %v1658_v21  ;;  %1153 = vmatpush1.bf16.msra.mxu1 %v1661_v22 }
  0x63   : > { %1068 = vmatprep.subr.bf16.mxu0 %v1666_v23  ;;  %1154 = vmatprep.subr.bf16.mxu1 %v1669_v24 }
  0x66   : > { %1069 = vmatpush1.bf16.msra.mxu0 %v1664_v25  ;;  %1155 = vmatpush1.bf16.msra.mxu1 %v1667_v26 }
  0x67   : > { %1070 = vmatprep.subr.bf16.mxu0 %v1672_v27  ;;  %1156 = vmatprep.subr.bf16.mxu1 %v1675_v28 }
  0x6a   : > { %1071 = vmatpush1.bf16.msra.mxu0 %v1670_v30  ;;  %1157 = vmatpush1.bf16.msra.mxu1 %v1673_v31 }
  0x6b   : > { %1072 = vmatprep.subr.bf16.mxu0 %v1678_v33  ;;  %1158 = vmatprep.subr.bf16.mxu1 %v1681_v34 }
  0x6e   : > { %1073 = vmatpush1.bf16.msra.mxu0 %v1676_v35  ;;  %1159 = vmatpush1.bf16.msra.mxu1 %v1679_v36 }
  0x6f   : > { %1074 = vmatprep.subr.bf16.mxu0 %v1684_v38  ;;  %1160 = vmatprep.subr.bf16.mxu1 %v1687_v39 }
  0x72   : > { %1075 = vmatpush1.bf16.msra.mxu0 %v1682_v40  ;;  %1161 = vmatpush1.bf16.msra.mxu1 %v1685_v41 }
  0x73   : > { %1076 = vmatprep.subr.bf16.mxu0 %v1690_v42  ;;  %1162 = vmatprep.subr.bf16.mxu1 %v1693_v43 }
  0x76   : > { %1077 = vmatpush1.bf16.msra.mxu0 %v1688_v44  ;;  %1163 = vmatpush1.bf16.msra.mxu1 %v1691_v45 }
  0x77   : > { %1078 = vmatprep.subr.bf16.mxu0 %v1696_v46  ;;  %1164 = vmatprep.subr.bf16.mxu1 %v1699_v47 }
  0x7a   : > { %1079 = vmatpush1.bf16.msra.mxu0 %v1694_v48  ;;  %1165 = vmatpush1.bf16.msra.mxu1 %v1697_v49 }
  0x7b   : > { %1080 = vmatprep.subr.bf16.mxu0 %v1702_v50  ;;  %1166 = vmatprep.subr.bf16.mxu1 %v1705_v51 }
  0x7e   : > { %1081 = vmatpush1.bf16.msra.mxu0 %v1700_v52  ;;  %1167 = vmatpush1.bf16.msra.mxu1 %v1703_v53 }
  0x7f   : > { %1082 = vmatprep.subr.bf16.mxu0 %v1708_v54  ;;  %1168 = vmatprep.subr.bf16.mxu1 %v1711_v55 }
  0x82   : > { %1083 = vmatpush1.bf16.msra.mxu0 %v1706_v56  ;;  %1169 = vmatpush1.bf16.msra.mxu1 %v1709_v57 }
  0x83   : > { %1084 = vmatprep.subr.bf16.mxu0 %v1714_v58  ;;  %1170 = vmatprep.subr.bf16.mxu1 %v1717_v59 }
  0x86   : > { %1085 = vmatpush1.bf16.msra.mxu0 %v1712_v60  ;;  %1171 = vmatpush1.bf16.msra.mxu1 %v1715_v61 }
  0x87   : > { %1086 = vmatprep.subr.bf16.mxu0 %v1720_v62  ;;  %1172 = vmatprep.subr.bf16.mxu1 %v1723_v63 }
  0x8a   : > { %1087 = vmatpush1.bf16.msra.mxu0 %v1718_v0  ;;  %1173 = vmatpush1.bf16.msra.mxu1 %v1721_v1 }
  0x8b   : > { %1088 = vmatprep.subr.bf16.mxu0 %v1726_v2  ;;  %1174 = vmatprep.subr.bf16.mxu1 %v1729_v3 }
  0x8e   : > { %1089 = vmatpush1.bf16.msra.mxu0 %v1724_v4  ;;  %1175 = vmatpush1.bf16.msra.mxu1 %v1727_v5 }
  0x91   : > { %1091 = vmatmul.mubr.bf16.vlgmr.msra.gmra.mrb[0].mxu0 %v1730_v6  ;;  %1177 = vmatmul.mubr.bf16.vlgmr.msra.gmra.mrb[0].mxu1 %v1730_v6 }
  0xb0   : > { %v348_v7 = vpop.permute.xlu0 %347 }
  0xb4   : > { %v353_v22 = vpop.permute.xlu0 %352 }
 0x164   : > { %v1092_v8 = vpop.f32.mrb[0].mxu0  ;;  %v1178_v9 = vpop.f32.mrb[0].mxu1 }
 0x165   : > { %v1509_v10 = vadd.f32 %v1092_v8, %v348_v7  ;;  %v1513_v11 = vadd.f32 %v1178_v9, %v348_v7  ;;  %v1094_v12 = vpop.f32.mrb[1].mxu0  ;;  %v1180_v13 = vpop.f32.mrb[1].mxu1 }
 0x166   : > { %v1510_v14 = vadd.f32 %v1094_v12, %v348_v7  ;;  %v1514_v15 = vadd.f32 %v1180_v13, %v348_v7  ;;  %v1096_v16 = vpop.f32.mrb[2].mxu0  ;;  %v1182_v17 = vpop.f32.mrb[2].mxu1 }
 0x167   : > { %v1195_v18 = vmin.f32 %v1509_v10, 0.0  ;;  %v1197_v19 = vmin.f32 %v1513_v11, 0.0  ;;  %v1098_v20 = vpop.f32.mrb[3].mxu0  ;;  %v1184_v21 = vpop.f32.mrb[3].mxu1  ;;  %v1511_v27 = vadd.f32 %v1096_v16, %v353_v22  ;;  %v1515_v28 = vadd.f32 %v1182_v17, %v353_v22 }
 0x168   : > { %v1196_v23 = vmin.f32 %v1510_v14, 0.0  ;;  %v1198_v24 = vmin.f32 %v1514_v15, 0.0  ;;  %v1512_v31 = vadd.f32 %v1098_v20, %v353_v22  ;;  %v1516_v32 = vadd.f32 %v1184_v21, %v353_v22 }
 0x169   : > { %v1203_v25 = vmul.f32 1.442695, %v1195_v18  ;;  %v1207_v26 = vmul.f32 1.442695, %v1197_v19  ;;  %v1199_v33 = vmin.f32 %v1511_v27, 0.0  ;;  %v1201_v34 = vmin.f32 %v1515_v28, 0.0 }
 0x16a   : > { %v1205_v29 = vmul.f32 1.442695, %v1196_v23  ;;  %v1209_v30 = vmul.f32 1.442695, %v1198_v24  ;;  %v1200_v35 = vmin.f32 %v1512_v31, 0.0  ;;  %v1202_v37 = vmin.f32 %v1516_v32, 0.0 }
 0x16b   : > { %1733 = vpow2.f32 %v1203_v25  ;;  %v1211_v36 = vmul.f32 1.442695, %v1199_v33  ;;  %v1215_v38 = vmul.f32 1.442695, %v1201_v34  ;;  %vm1187_vm0 = vcmp.gt.f32.partialorder %v1509_v10, 0.0 }
 0x16c   : > { %1735 = vpow2.f32 %v1207_v26  ;;  %v1213_v39 = vmul.f32 1.442695, %v1200_v35  ;;  %v1217_v40 = vmul.f32 1.442695, %v1202_v37  ;;  %vm1189_vm1 = vcmp.gt.f32.partialorder %v1513_v11, 0.0 }
 0x16d   : > { %1737 = vpow2.f32 %v1205_v29  ;;  %vm1188_vm2 = vcmp.gt.f32.partialorder %v1510_v14, 0.0  ;;  %vm1190_vm3 = vcmp.gt.f32.partialorder %v1514_v15, 0.0  ;;  %vm1191_vm4 = vcmp.gt.f32.partialorder %v1511_v27, 0.0 }
 0x16e   : > { %1739 = vpow2.f32 %v1209_v30  ;;  %vm1193_vm5 = vcmp.gt.f32.partialorder %v1515_v28, 0.0  ;;  %vm1192_vm6 = vcmp.gt.f32.partialorder %v1512_v31, 0.0  ;;  %vm1194_vm7 = vcmp.gt.f32.partialorder %v1516_v32, 0.0 }
 0x16f   : > { %1741 = vpow2.f32 %v1211_v36 }
 0x170   : > { %1743 = vpow2.f32 %v1215_v38 }
 0x171   : > { %1745 = vpow2.f32 %v1213_v39 }
 0x172   : > { %1747 = vpow2.f32 %v1217_v40 }
 0x175   : > { %v1734_v41 = vpop.eup %1733 }
 0x176   : > { %v1736_v42 = vpop.eup %1735  ;;  %v1487_v43 = vadd.f32 -1.0, %v1734_v41 }
 0x177   : > { %v1738_v44 = vpop.eup %1737  ;;  %v1489_v45 = vadd.f32 -1.0, %v1736_v42 }
 0x178   : > { %v1740_v46 = vpop.eup %1739  ;;  %v1227_v47 = vsel %vm1187_vm0, %v1509_v10, %v1487_v43  ;;  %v1488_v48 = vadd.f32 -1.0, %v1738_v44 }
 0x179   : > { %v1742_v49 = vpop.eup %1741  ;;  %v1229_v50 = vsel %vm1189_vm1, %v1513_v11, %v1489_v45  ;;  %v1490_v51 = vadd.f32 -1.0, %v1740_v46 }
 0x17a   : > { %v1744_v52 = vpop.eup %1743  ;;  %v1228_v53 = vsel %vm1188_vm2, %v1510_v14, %v1488_v48  ;;  %v1491_v54 = vadd.f32 -1.0, %v1742_v49 }
 0x17b   : > { %v1746_v55 = vpop.eup %1745  ;;  %v1505_v56 = vpack.c.bf16 %v1228_v53, %v1227_v47  ;;  %v1230_v57 = vsel %vm1190_vm3, %v1514_v15, %v1490_v51  ;;  %v1493_v58 = vadd.f32 -1.0, %v1744_v52 }
 0x17c   : > { %v1748_v59 = vpop.eup %1747  ;;  %v1506_v60 = vpack.c.bf16 %v1230_v57, %v1229_v50  ;;  %v1231_v61 = vsel %vm1191_vm4, %v1511_v27, %v1491_v54  ;;  %v1492_v62 = vadd.f32 -1.0, %v1746_v55 }
 0x17d   : > { %1259 = vst [vmem:[%s210_s28] sm:$0xff] %v1505_v56  ;;  %v1233_v63 = vsel %vm1193_vm5, %v1515_v28, %v1493_v58  ;;  %v1494_v0 = vadd.f32 -1.0, %v1748_v59 }
 0x17e   : > { %1260 = vst [vmem:[%s210_s28 + $0x8] sm:$0xff] %v1506_v60  ;;  %v1232_v1 = vsel %vm1192_vm6, %v1512_v31, %v1492_v62 }
 0x17f   : > { %v1507_v2 = vpack.c.bf16 %v1232_v1, %v1231_v61  ;;  %v1234_v3 = vsel %vm1194_vm7, %v1516_v32, %v1494_v0 }
 0x180   : > { %v1508_v4 = vpack.c.bf16 %v1234_v3, %v1233_v63 }
 0x181   : > { %1261 = vst [vmem:[%s210_s28 + $0x10] sm:$0xff] %v1507_v2 }
 0x182   : > { %1262 = vst [vmem:[%s210_s28 + $0x18] sm:$0xff] %v1508_v4 }
 0x183 PF: > { %s13_s12 = sadd.s32 1, %s1755_s12  }
 0x184   : > { %p10_p4 = scmp.ge.s32.totalorder %s13_s12, 4  }
 0x186   :  { %12 = sbr.rel (!%p10_p4) target bundleno = 1 (0x1), region = 68 }

// kernel: squeeze.4
= control target key start
LH: loop header
LB: loop body
LE: loop exit
PB: predicated region body
PF: predicated region fallthrough
CT: control target
= control target key end

     0   :  { %s2472_s14 = smov 114   ;;  %s2473_s15 = smov 121   ;;  %vm130_vm0 = vcmask 121856   ;;  %vm1337_vm1 = vcmask 982016   ;;  %vm1254_vm2 = vcmask 973824   ;;  %vm1421_vm3 = vcmask 1039360   ;;  %s3197_s0 = inlined_call_operand.vmem [shape: bf16[1,16,450], index: 0, kind: input, shape index: {}]   ;;  %s3198_s1 = inlined_call_operand.vmem [shape: bf16[16,2,15,15], index: 1, kind: output, shape index: {}]  }
   0x1   :  { %v2263_v0 = vld [vmem:[%s3197_s0 + $0x18] sm:$0xff]   ;;  %v2265_v1 = vld [vmem:[%s3197_s0 + $0x8] sm:$0xff]   ;;  %v2264_v2 = vld [vmem:[%s3197_s0 + $0x10] sm:$0xff]   ;;  %s2474_s16 = smov 113   ;;  %s2475_s17 = smov 107   ;;  %vm1258_vm4 = vcmask 72704  }
   0x2   :  { %v2090_v3 = vunpack.c.h.bf16 %v2263_v0  ;;  %v2519_v4 = vunpack.c.l.bf16 %v2265_v1  ;;  %v2098_v5 = vunpack.c.h.bf16 %v2265_v1  ;;  %v2089_v6 = vunpack.c.l.bf16 %v2263_v0  ;;  %v2100_v7 = vld [vmem:[%s3197_s0] sm:$0xff]   ;;  %s2471_s0 = smov 122   ;;  %s2476_s18 = smov 106  }
   0x3   :  { %v2094_v8 = vunpack.c.h.bf16 %v2264_v2  ;;  %v2102_v9 = vunpack.c.h.bf16 %v2100_v7  ;;  %v2093_v10 = vunpack.c.l.bf16 %v2264_v2  ;;  %v2101_v11 = vunpack.c.l.bf16 %v2100_v7  ;;  %s2477_s19 = smov 99   ;;  %s2478_s20 = smov 98  }
   0x4   :  { %v2326_v12 = vpack.i.bf16 %v2090_v3, %v2098_v5  ;;  %v2525_v13 = vpack.i.bf16 %v2089_v6, %v2519_v4  ;;  %s2479_s21 = smov 92   ;;  %s2480_s22 = smov 91   ;;  %v1255_v18 = vsel %vm1254_vm2, %v2098_v5, %v2519_v4  ;;  %v1297_v19 = vsel %vm1254_vm2, %v2090_v3, %v2089_v6 }
   0x5   :  { %v2528_v14 = vpack.i.bf16 %v2094_v8, %v2102_v9  ;;  %v2530_v15 = vpack.i.bf16 %v2093_v10, %v2101_v11  ;;  %131 = vst.msk [vmem:[#allocation0] sm:$0x1] %vm130_vm0, %v2101_v11   ;;  %133 = vst.msk [vmem:[#allocation0 + $0x1f] sm:$0x2] %vm130_vm0, %v2101_v11   ;;  %v1338_v16 = vsel %vm1337_vm1, %v2102_v9, %v2101_v11  ;;  %s2481_s23 = smov 84   ;;  %s2482_s24 = smov 83  }
   0x6   :  { %2327 = vrot.lane.b32.xlu0 %v2326_v12, %s2471_s0  ;;  %2337 = vrot.lane.b32.xlu1 %v2525_v13, %s2472_s14  ;;  %135 = vst.msk [vmem:[#allocation0 + $0x3e] sm:$0x4] %vm130_vm0, %v2101_v11   ;;  %137 = vst.msk [vmem:[#allocation0 + $0x5d] sm:$0x8] %vm130_vm0, %v2101_v11   ;;  %v1380_v17 = vsel %vm1337_vm1, %v2094_v8, %v2093_v10  ;;  %v2386_v21 = vpack.i.bf16 %v1297_v19, %v1255_v18  ;;  %s2483_s25 = smov 8   ;;  %s2484_s26 = smov 9  }
   0x7   :  { %139 = vst.msk [vmem:[#allocation0 + $0x7c] sm:$0x10] %vm130_vm0, %v2101_v11   ;;  %141 = vst.msk [vmem:[#allocation0 + $0x9b] sm:$0x20] %vm130_vm0, %v2101_v11   ;;  %v2391_v20 = vpack.i.bf16 %v1380_v17, %v1338_v16  ;;  %v1422_v22 = vsel %vm1421_vm3, %v2519_v4, %v2102_v9  ;;  %v1464_v23 = vsel %vm1421_vm3, %v2089_v6, %v2094_v8  ;;  %s2485_s27 = smov 77   ;;  %s2486_s28 = smov 1  }
   0x8   :  { %143 = vst.msk [vmem:[#allocation0 + $0xba] sm:$0x40] %vm130_vm0, %v2101_v11   ;;  %145 = vst.msk [vmem:[#allocation0 + $0xd9] sm:$0x80] %vm130_vm0, %v2101_v11   ;;  %v2396_v24 = vpack.i.bf16 %v1464_v23, %v1422_v22  ;;  %s2487_s29 = smov 69   ;;  %s2488_s30 = smov 76  }
   0x9   :  { %150 = vst.msk [vmem:[#allocation0 + $0x100] sm:$0x1] %vm130_vm0, %v2093_v10   ;;  %152 = vst.msk [vmem:[#allocation0 + $0x11f] sm:$0x2] %vm130_vm0, %v2093_v10   ;;  %s2489_s2 = smov 61   ;;  %s2490_s3 = smov 68  }
   0xa   :  { %2332 = vrot.lane.b32.xlu0 %v2528_v14, %s2473_s15  ;;  %2342 = vrot.lane.b32.xlu1 %v2530_v15, %s2474_s16  ;;  %154 = vst.msk [vmem:[#allocation0 + $0x13e] sm:$0x4] %vm130_vm0, %v2093_v10   ;;  %156 = vst.msk [vmem:[#allocation0 + $0x15d] sm:$0x8] %vm130_vm0, %v2093_v10   ;;  %s2491_s4 = smov 53   ;;  %s2492_s5 = smov 54  }
   0xb   :  { %158 = vst.msk [vmem:[#allocation0 + $0x17c] sm:$0x10] %vm130_vm0, %v2093_v10   ;;  %160 = vst.msk [vmem:[#allocation0 + $0x19b] sm:$0x20] %vm130_vm0, %v2093_v10   ;;  %s2493_s6 = smov 39   ;;  %s2494_s7 = smov 46  }
   0xc   :  { %162 = vst.msk [vmem:[#allocation0 + $0x1ba] sm:$0x40] %vm130_vm0, %v2093_v10   ;;  %164 = vst.msk [vmem:[#allocation0 + $0x1d9] sm:$0x80] %vm130_vm0, %v2093_v10   ;;  %s2495_s8 = smov 31   ;;  %s2496_s9 = smov 38  }
   0xd   :  { %s2497_s10 = smov 23   ;;  %s2498_s11 = smov 24   ;;  %vm1275_vm5 = vcmask 121928   ;;  %vm1341_vm6 = vcmask 64512   ;;  %vm1358_vm7 = vcmask 121920   ;;  %vm1425_vm8 = vcmask 7168  }
   0xe   :  { %2347 = vrot.lane.b32.xlu0 %v2326_v12, %s2475_s17  ;;  %2352 = vrot.lane.b32.xlu1 %v2528_v14, %s2476_s18  ;;  %s2499_s12 = smov 16   ;;  %vm1442_vm9 = vcmask 121864  }
  0x12   :  { %2357 = vrot.lane.b32.xlu0 %v2525_v13, %s2477_s19  ;;  %2362 = vrot.lane.b32.xlu1 %v2530_v15, %s2478_s20 }
  0x16   :  { %2367 = vrot.lane.b32.xlu0 %v2326_v12, %s2479_s21  ;;  %2372 = vrot.lane.b32.xlu1 %v2528_v14, %s2480_s22 }
  0x1a   :  { %2377 = vrot.lane.b32.xlu0 %v2525_v13, %s2481_s23  ;;  %2382 = vrot.lane.b32.xlu1 %v2530_v15, %s2482_s24 }
  0x1e   :  { %2392 = vrot.lane.b32.xlu1 %v2391_v20, %s2483_s25  ;;  %2387 = vrot.lane.b32.xlu0 %v2386_v21, %s2484_s26 }
  0x22   :  { %2402 = vrot.lane.b32.xlu1 %v2326_v12, %s2485_s27  ;;  %2397 = vrot.lane.b32.xlu0 %v2396_v24, %s2486_s28 }
  0x26   :  { %2412 = vrot.lane.b32.xlu1 %v2525_v13, %s2487_s29  ;;  %2407 = vrot.lane.b32.xlu0 %v2528_v14, %s2488_s30 }
  0x2a   :  { %2422 = vrot.lane.b32.xlu1 %v2528_v14, %s2489_s2  ;;  %2417 = vrot.lane.b32.xlu0 %v2530_v15, %s2490_s3 }
  0x2e   :  { %2432 = vrot.lane.b32.xlu1 %v2530_v15, %s2491_s4  ;;  %2427 = vrot.lane.b32.xlu0 %v2525_v13, %s2492_s5 }
  0x32   :  { %2442 = vrot.lane.b32.xlu1 %v2525_v13, %s2493_s6  ;;  %2437 = vrot.lane.b32.xlu0 %v2528_v14, %s2494_s7 }
  0x36   :  { %2452 = vrot.lane.b32.xlu1 %v2528_v14, %s2495_s8  ;;  %2447 = vrot.lane.b32.xlu0 %v2530_v15, %s2496_s9 }
  0x3a   :  { %2462 = vrot.lane.b32.xlu1 %v2530_v15, %s2497_s10  ;;  %2457 = vrot.lane.b32.xlu0 %v2525_v13, %s2498_s11 }
  0x3e   :  { %2467 = vrot.lane.b32.xlu0 %v2528_v14, %s2499_s12 }
  0x78   :  { %v2328_v25 = vpop.permute.xlu0 %2327  ;;  %v2338_v26 = vpop.permute.xlu1 %2337 }
  0x79   :  { %v2330_v27 = vunpack.i.h.bf16 %v2328_v25  ;;  %v2329_v28 = vunpack.i.l.bf16 %v2328_v25  ;;  %v2340_v29 = vunpack.i.h.bf16 %v2338_v26  ;;  %v2339_v30 = vunpack.i.l.bf16 %v2338_v26 }
  0x7b   :  { %192 = vst.msk [vmem:[#allocation0 + $0x11b] sm:$0x1] %vm130_vm0, %v2330_v27   ;;  %194 = vst.msk [vmem:[#allocation0 + $0x13a] sm:$0x2] %vm130_vm0, %v2330_v27  }
  0x7c   :  { %196 = vst.msk [vmem:[#allocation0 + $0x159] sm:$0x4] %vm130_vm0, %v2330_v27   ;;  %198 = vst.msk [vmem:[#allocation0 + $0x178] sm:$0x8] %vm130_vm0, %v2330_v27   ;;  %v2333_v31 = vpop.permute.xlu0 %2332  ;;  %v2343_v32 = vpop.permute.xlu1 %2342 }
  0x7d   :  { %200 = vst.msk [vmem:[#allocation0 + $0x197] sm:$0x10] %vm130_vm0, %v2330_v27   ;;  %202 = vst.msk [vmem:[#allocation0 + $0x1b6] sm:$0x20] %vm130_vm0, %v2330_v27   ;;  %v2335_v33 = vunpack.i.h.bf16 %v2333_v31  ;;  %v2334_v34 = vunpack.i.l.bf16 %v2333_v31  ;;  %v2345_v35 = vunpack.i.h.bf16 %v2343_v32  ;;  %v2344_v36 = vunpack.i.l.bf16 %v2343_v32 }
  0x7e   :  { %204 = vst.msk [vmem:[#allocation0 + $0x1d5] sm:$0x40] %vm130_vm0, %v2330_v27   ;;  %206 = vst.msk [vmem:[#allocation0 + $0x1f4] sm:$0x80] %vm130_vm0, %v2330_v27  }
  0x7f   :  { %171 = vst.msk [vmem:[#allocation0 + $0x1b] sm:$0x1] %vm130_vm0, %v2329_v28   ;;  %173 = vst.msk [vmem:[#allocation0 + $0x3a] sm:$0x2] %vm130_vm0, %v2329_v28  }
  0x80   :  { %175 = vst.msk [vmem:[#allocation0 + $0x59] sm:$0x4] %vm130_vm0, %v2329_v28   ;;  %177 = vst.msk [vmem:[#allocation0 + $0x78] sm:$0x8] %vm130_vm0, %v2329_v28   ;;  %v2348_v37 = vpop.permute.xlu0 %2347  ;;  %v2353_v38 = vpop.permute.xlu1 %2352 }
  0x81   :  { %179 = vst.msk [vmem:[#allocation0 + $0x97] sm:$0x10] %vm130_vm0, %v2329_v28   ;;  %181 = vst.msk [vmem:[#allocation0 + $0xb6] sm:$0x20] %vm130_vm0, %v2329_v28   ;;  %v2350_v39 = vunpack.i.h.bf16 %v2348_v37  ;;  %v2349_v40 = vunpack.i.l.bf16 %v2348_v37  ;;  %v2355_v41 = vunpack.i.h.bf16 %v2353_v38  ;;  %v2354_v42 = vunpack.i.l.bf16 %v2353_v38 }
  0x82   :  { %183 = vst.msk [vmem:[#allocation0 + $0xd5] sm:$0x40] %vm130_vm0, %v2329_v28   ;;  %185 = vst.msk [vmem:[#allocation0 + $0xf4] sm:$0x80] %vm130_vm0, %v2329_v28  }
  0x83   :  { %276 = vst.msk [vmem:[#allocation0 + $0x113] sm:$0x1] %vm130_vm0, %v2340_v29   ;;  %278 = vst.msk [vmem:[#allocation0 + $0x132] sm:$0x2] %vm130_vm0, %v2340_v29  }
  0x84   :  { %280 = vst.msk [vmem:[#allocation0 + $0x151] sm:$0x4] %vm130_vm0, %v2340_v29   ;;  %282 = vst.msk [vmem:[#allocation0 + $0x170] sm:$0x8] %vm130_vm0, %v2340_v29   ;;  %v2358_v43 = vpop.permute.xlu0 %2357  ;;  %v2363_v44 = vpop.permute.xlu1 %2362 }
  0x85   :  { %284 = vst.msk [vmem:[#allocation0 + $0x18f] sm:$0x10] %vm130_vm0, %v2340_v29   ;;  %286 = vst.msk [vmem:[#allocation0 + $0x1ae] sm:$0x20] %vm130_vm0, %v2340_v29   ;;  %v2360_v45 = vunpack.i.h.bf16 %v2358_v43  ;;  %v2359_v46 = vunpack.i.l.bf16 %v2358_v43  ;;  %v2365_v47 = vunpack.i.h.bf16 %v2363_v44  ;;  %v2364_v48 = vunpack.i.l.bf16 %v2363_v44 }
  0x86   :  { %288 = vst.msk [vmem:[#allocation0 + $0x1cd] sm:$0x40] %vm130_vm0, %v2340_v29   ;;  %290 = vst.msk [vmem:[#allocation0 + $0x1ec] sm:$0x80] %vm130_vm0, %v2340_v29  }
  0x87   :  { %255 = vst.msk [vmem:[#allocation0 + $0x13] sm:$0x1] %vm130_vm0, %v2339_v30   ;;  %257 = vst.msk [vmem:[#allocation0 + $0x32] sm:$0x2] %vm130_vm0, %v2339_v30  }
  0x88   :  { %259 = vst.msk [vmem:[#allocation0 + $0x51] sm:$0x4] %vm130_vm0, %v2339_v30   ;;  %261 = vst.msk [vmem:[#allocation0 + $0x70] sm:$0x8] %vm130_vm0, %v2339_v30   ;;  %v2368_v49 = vpop.permute.xlu0 %2367  ;;  %v2373_v50 = vpop.permute.xlu1 %2372 }
  0x89   :  { %263 = vst.msk [vmem:[#allocation0 + $0x8f] sm:$0x10] %vm130_vm0, %v2339_v30   ;;  %265 = vst.msk [vmem:[#allocation0 + $0xae] sm:$0x20] %vm130_vm0, %v2339_v30   ;;  %v2370_v51 = vunpack.i.h.bf16 %v2368_v49  ;;  %v2369_v52 = vunpack.i.l.bf16 %v2368_v49  ;;  %v2375_v53 = vunpack.i.h.bf16 %v2373_v50  ;;  %v2374_v54 = vunpack.i.l.bf16 %v2373_v50 }
  0x8a   :  { %267 = vst.msk [vmem:[#allocation0 + $0xcd] sm:$0x40] %vm130_vm0, %v2339_v30   ;;  %269 = vst.msk [vmem:[#allocation0 + $0xec] sm:$0x80] %vm130_vm0, %v2339_v30  }
  0x8b   :  { %234 = vst.msk [vmem:[#allocation0 + $0x109] sm:$0x1] %vm130_vm0, %v2335_v33   ;;  %236 = vst.msk [vmem:[#allocation0 + $0x128] sm:$0x2] %vm130_vm0, %v2335_v33  }
  0x8c   :  { %238 = vst.msk [vmem:[#allocation0 + $0x147] sm:$0x4] %vm130_vm0, %v2335_v33   ;;  %240 = vst.msk [vmem:[#allocation0 + $0x166] sm:$0x8] %vm130_vm0, %v2335_v33   ;;  %v2378_v55 = vpop.permute.xlu0 %2377  ;;  %v2383_v56 = vpop.permute.xlu1 %2382 }
  0x8d   :  { %242 = vst.msk [vmem:[#allocation0 + $0x185] sm:$0x10] %vm130_vm0, %v2335_v33   ;;  %244 = vst.msk [vmem:[#allocation0 + $0x1a4] sm:$0x20] %vm130_vm0, %v2335_v33   ;;  %v2380_v57 = vunpack.i.h.bf16 %v2378_v55  ;;  %v2379_v58 = vunpack.i.l.bf16 %v2378_v55  ;;  %v2385_v59 = vunpack.i.h.bf16 %v2383_v56  ;;  %v2384_v60 = vunpack.i.l.bf16 %v2383_v56 }
  0x8e   :  { %246 = vst.msk [vmem:[#allocation0 + $0x1c3] sm:$0x40] %vm130_vm0, %v2335_v33   ;;  %248 = vst.msk [vmem:[#allocation0 + $0x1e2] sm:$0x80] %vm130_vm0, %v2335_v33  }
  0x8f   :  { %213 = vst.msk [vmem:[#allocation0 + $0x9] sm:$0x1] %vm130_vm0, %v2334_v34   ;;  %215 = vst.msk [vmem:[#allocation0 + $0x28] sm:$0x2] %vm130_vm0, %v2334_v34  }
  0x90   :  { %217 = vst.msk [vmem:[#allocation0 + $0x47] sm:$0x4] %vm130_vm0, %v2334_v34   ;;  %219 = vst.msk [vmem:[#allocation0 + $0x66] sm:$0x8] %vm130_vm0, %v2334_v34   ;;  %v2393_v61 = vpop.permute.xlu1 %2392  ;;  %v2388_v62 = vpop.permute.xlu0 %2387 }
  0x91   :  { %221 = vst.msk [vmem:[#allocation0 + $0x85] sm:$0x10] %vm130_vm0, %v2334_v34   ;;  %223 = vst.msk [vmem:[#allocation0 + $0xa4] sm:$0x20] %vm130_vm0, %v2334_v34   ;;  %v2763_v63 = vunpack.i.h.bf16 %v2393_v61  ;;  %v2394_v0 = vunpack.i.l.bf16 %v2393_v61  ;;  %v2390_v1 = vunpack.i.h.bf16 %v2388_v62  ;;  %v2389_v2 = vunpack.i.l.bf16 %v2388_v62 }
  0x92   :  { %225 = vst.msk [vmem:[#allocation0 + $0xc3] sm:$0x40] %vm130_vm0, %v2334_v34   ;;  %227 = vst.msk [vmem:[#allocation0 + $0xe2] sm:$0x80] %vm130_vm0, %v2334_v34  }
  0x93   :  { %317 = vst.msk [vmem:[#allocation0 + $0x101] sm:$0x1] %vm130_vm0, %v2345_v35   ;;  %319 = vst.msk [vmem:[#allocation0 + $0x120] sm:$0x2] %vm130_vm0, %v2345_v35  }
  0x94   :  { %321 = vst.msk [vmem:[#allocation0 + $0x13f] sm:$0x4] %vm130_vm0, %v2345_v35   ;;  %323 = vst.msk [vmem:[#allocation0 + $0x15e] sm:$0x8] %vm130_vm0, %v2345_v35   ;;  %v2403_v3 = vpop.permute.xlu1 %2402  ;;  %v2398_v4 = vpop.permute.xlu0 %2397 }
  0x95   :  { %325 = vst.msk [vmem:[#allocation0 + $0x17d] sm:$0x10] %vm130_vm0, %v2345_v35   ;;  %327 = vst.msk [vmem:[#allocation0 + $0x19c] sm:$0x20] %vm130_vm0, %v2345_v35   ;;  %v2405_v5 = vunpack.i.h.bf16 %v2403_v3  ;;  %v2404_v6 = vunpack.i.l.bf16 %v2403_v3  ;;  %v2400_v7 = vunpack.i.h.bf16 %v2398_v4  ;;  %v2399_v8 = vunpack.i.l.bf16 %v2398_v4 }
  0x96   :  { %329 = vst.msk [vmem:[#allocation0 + $0x1bb] sm:$0x40] %vm130_vm0, %v2345_v35   ;;  %331 = vst.msk [vmem:[#allocation0 + $0x1da] sm:$0x80] %vm130_vm0, %v2345_v35  }
  0x97   :  { %296 = vst.msk [vmem:[#allocation0 + $0x1] sm:$0x1] %vm130_vm0, %v2344_v36   ;;  %298 = vst.msk [vmem:[#allocation0 + $0x20] sm:$0x2] %vm130_vm0, %v2344_v36  }
  0x98   :  { %300 = vst.msk [vmem:[#allocation0 + $0x3f] sm:$0x4] %vm130_vm0, %v2344_v36   ;;  %302 = vst.msk [vmem:[#allocation0 + $0x5e] sm:$0x8] %vm130_vm0, %v2344_v36   ;;  %v2413_v9 = vpop.permute.xlu1 %2412  ;;  %v2408_v10 = vpop.permute.xlu0 %2407 }
  0x99   :  { %304 = vst.msk [vmem:[#allocation0 + $0x7d] sm:$0x10] %vm130_vm0, %v2344_v36   ;;  %306 = vst.msk [vmem:[#allocation0 + $0x9c] sm:$0x20] %vm130_vm0, %v2344_v36   ;;  %v2415_v11 = vunpack.i.h.bf16 %v2413_v9  ;;  %v2414_v12 = vunpack.i.l.bf16 %v2413_v9  ;;  %v2410_v13 = vunpack.i.h.bf16 %v2408_v10  ;;  %v2409_v14 = vunpack.i.l.bf16 %v2408_v10 }
  0x9a   :  { %308 = vst.msk [vmem:[#allocation0 + $0xbb] sm:$0x40] %vm130_vm0, %v2344_v36   ;;  %310 = vst.msk [vmem:[#allocation0 + $0xda] sm:$0x80] %vm130_vm0, %v2344_v36  }
  0x9b   :  { %359 = vst.msk [vmem:[#allocation0 + $0x11c] sm:$0x1] %vm130_vm0, %v2350_v39   ;;  %361 = vst.msk [vmem:[#allocation0 + $0x13b] sm:$0x2] %vm130_vm0, %v2350_v39  }
  0x9c   :  { %363 = vst.msk [vmem:[#allocation0 + $0x15a] sm:$0x4] %vm130_vm0, %v2350_v39   ;;  %365 = vst.msk [vmem:[#allocation0 + $0x179] sm:$0x8] %vm130_vm0, %v2350_v39   ;;  %v2423_v15 = vpop.permute.xlu1 %2422  ;;  %v2418_v16 = vpop.permute.xlu0 %2417 }
  0x9d   :  { %367 = vst.msk [vmem:[#allocation0 + $0x198] sm:$0x10] %vm130_vm0, %v2350_v39   ;;  %369 = vst.msk [vmem:[#allocation0 + $0x1b7] sm:$0x20] %vm130_vm0, %v2350_v39   ;;  %v2425_v17 = vunpack.i.h.bf16 %v2423_v15  ;;  %v2424_v18 = vunpack.i.l.bf16 %v2423_v15  ;;  %v2420_v19 = vunpack.i.h.bf16 %v2418_v16  ;;  %v2419_v20 = vunpack.i.l.bf16 %v2418_v16 }
  0x9e   :  { %371 = vst.msk [vmem:[#allocation0 + $0x1d6] sm:$0x40] %vm130_vm0, %v2350_v39   ;;  %373 = vst.msk [vmem:[#allocation0 + $0x1f5] sm:$0x80] %vm130_vm0, %v2350_v39  }
  0x9f   :  { %338 = vst.msk [vmem:[#allocation0 + $0x1c] sm:$0x1] %vm130_vm0, %v2349_v40   ;;  %340 = vst.msk [vmem:[#allocation0 + $0x3b] sm:$0x2] %vm130_vm0, %v2349_v40  }
  0xa0   :  { %342 = vst.msk [vmem:[#allocation0 + $0x5a] sm:$0x4] %vm130_vm0, %v2349_v40   ;;  %344 = vst.msk [vmem:[#allocation0 + $0x79] sm:$0x8] %vm130_vm0, %v2349_v40   ;;  %v2433_v21 = vpop.permute.xlu1 %2432  ;;  %v2428_v22 = vpop.permute.xlu0 %2427 }
  0xa1   :  { %346 = vst.msk [vmem:[#allocation0 + $0x98] sm:$0x10] %vm130_vm0, %v2349_v40   ;;  %348 = vst.msk [vmem:[#allocation0 + $0xb7] sm:$0x20] %vm130_vm0, %v2349_v40   ;;  %v2435_v23 = vunpack.i.h.bf16 %v2433_v21  ;;  %v2434_v24 = vunpack.i.l.bf16 %v2433_v21  ;;  %v2430_v25 = vunpack.i.h.bf16 %v2428_v22  ;;  %v2429_v26 = vunpack.i.l.bf16 %v2428_v22 }
  0xa2   :  { %350 = vst.msk [vmem:[#allocation0 + $0xd6] sm:$0x40] %vm130_vm0, %v2349_v40   ;;  %352 = vst.msk [vmem:[#allocation0 + $0xf5] sm:$0x80] %vm130_vm0, %v2349_v40  }
  0xa3   :  { %401 = vst.msk [vmem:[#allocation0 + $0x10a] sm:$0x1] %vm130_vm0, %v2355_v41   ;;  %403 = vst.msk [vmem:[#allocation0 + $0x129] sm:$0x2] %vm130_vm0, %v2355_v41  }
  0xa4   :  { %405 = vst.msk [vmem:[#allocation0 + $0x148] sm:$0x4] %vm130_vm0, %v2355_v41   ;;  %407 = vst.msk [vmem:[#allocation0 + $0x167] sm:$0x8] %vm130_vm0, %v2355_v41   ;;  %v2443_v27 = vpop.permute.xlu1 %2442  ;;  %v2438_v28 = vpop.permute.xlu0 %2437 }
  0xa5   :  { %409 = vst.msk [vmem:[#allocation0 + $0x186] sm:$0x10] %vm130_vm0, %v2355_v41   ;;  %411 = vst.msk [vmem:[#allocation0 + $0x1a5] sm:$0x20] %vm130_vm0, %v2355_v41   ;;  %v2445_v29 = vunpack.i.h.bf16 %v2443_v27  ;;  %v2444_v30 = vunpack.i.l.bf16 %v2443_v27  ;;  %v2440_v31 = vunpack.i.h.bf16 %v2438_v28  ;;  %v2439_v32 = vunpack.i.l.bf16 %v2438_v28 }
  0xa6   :  { %413 = vst.msk [vmem:[#allocation0 + $0x1c4] sm:$0x40] %vm130_vm0, %v2355_v41   ;;  %415 = vst.msk [vmem:[#allocation0 + $0x1e3] sm:$0x80] %vm130_vm0, %v2355_v41  }
  0xa7   :  { %380 = vst.msk [vmem:[#allocation0 + $0xa] sm:$0x1] %vm130_vm0, %v2354_v42   ;;  %382 = vst.msk [vmem:[#allocation0 + $0x29] sm:$0x2] %vm130_vm0, %v2354_v42  }
  0xa8   :  { %384 = vst.msk [vmem:[#allocation0 + $0x48] sm:$0x4] %vm130_vm0, %v2354_v42   ;;  %386 = vst.msk [vmem:[#allocation0 + $0x67] sm:$0x8] %vm130_vm0, %v2354_v42   ;;  %v2453_v33 = vpop.permute.xlu1 %2452  ;;  %v2448_v34 = vpop.permute.xlu0 %2447 }
  0xa9   :  { %388 = vst.msk [vmem:[#allocation0 + $0x86] sm:$0x10] %vm130_vm0, %v2354_v42   ;;  %390 = vst.msk [vmem:[#allocation0 + $0xa5] sm:$0x20] %vm130_vm0, %v2354_v42   ;;  %v2455_v35 = vunpack.i.h.bf16 %v2453_v33  ;;  %v2454_v36 = vunpack.i.l.bf16 %v2453_v33  ;;  %v2450_v37 = vunpack.i.h.bf16 %v2448_v34  ;;  %v2449_v38 = vunpack.i.l.bf16 %v2448_v34 }
  0xaa   :  { %392 = vst.msk [vmem:[#allocation0 + $0xc4] sm:$0x40] %vm130_vm0, %v2354_v42   ;;  %394 = vst.msk [vmem:[#allocation0 + $0xe3] sm:$0x80] %vm130_vm0, %v2354_v42  }
  0xab   :  { %443 = vst.msk [vmem:[#allocation0 + $0x114] sm:$0x1] %vm130_vm0, %v2360_v45   ;;  %445 = vst.msk [vmem:[#allocation0 + $0x133] sm:$0x2] %vm130_vm0, %v2360_v45  }
  0xac   :  { %447 = vst.msk [vmem:[#allocation0 + $0x152] sm:$0x4] %vm130_vm0, %v2360_v45   ;;  %449 = vst.msk [vmem:[#allocation0 + $0x171] sm:$0x8] %vm130_vm0, %v2360_v45   ;;  %v2463_v39 = vpop.permute.xlu1 %2462  ;;  %v2458_v40 = vpop.permute.xlu0 %2457 }
  0xad   :  { %451 = vst.msk [vmem:[#allocation0 + $0x190] sm:$0x10] %vm130_vm0, %v2360_v45   ;;  %453 = vst.msk [vmem:[#allocation0 + $0x1af] sm:$0x20] %vm130_vm0, %v2360_v45   ;;  %v2465_v41 = vunpack.i.h.bf16 %v2463_v39  ;;  %v2464_v42 = vunpack.i.l.bf16 %v2463_v39  ;;  %v2460_v43 = vunpack.i.h.bf16 %v2458_v40  ;;  %v2459_v44 = vunpack.i.l.bf16 %v2458_v40 }
  0xae   :  { %455 = vst.msk [vmem:[#allocation0 + $0x1ce] sm:$0x40] %vm130_vm0, %v2360_v45   ;;  %457 = vst.msk [vmem:[#allocation0 + $0x1ed] sm:$0x80] %vm130_vm0, %v2360_v45  }
  0xaf   :  { %422 = vst.msk [vmem:[#allocation0 + $0x14] sm:$0x1] %vm130_vm0, %v2359_v46   ;;  %424 = vst.msk [vmem:[#allocation0 + $0x33] sm:$0x2] %vm130_vm0, %v2359_v46  }
  0xb0   :  { %426 = vst.msk [vmem:[#allocation0 + $0x52] sm:$0x4] %vm130_vm0, %v2359_v46   ;;  %428 = vst.msk [vmem:[#allocation0 + $0x71] sm:$0x8] %vm130_vm0, %v2359_v46   ;;  %v2468_v45 = vpop.permute.xlu0 %2467 }
  0xb1   :  { %430 = vst.msk [vmem:[#allocation0 + $0x90] sm:$0x10] %vm130_vm0, %v2359_v46   ;;  %432 = vst.msk [vmem:[#allocation0 + $0xaf] sm:$0x20] %vm130_vm0, %v2359_v46  }
  0xb2   :  { %434 = vst.msk [vmem:[#allocation0 + $0xce] sm:$0x40] %vm130_vm0, %v2359_v46   ;;  %436 = vst.msk [vmem:[#allocation0 + $0xed] sm:$0x80] %vm130_vm0, %v2359_v46   ;;  %v2470_v46 = vunpack.i.h.bf16 %v2468_v45 }
  0xb3   :  { %484 = vst.msk [vmem:[#allocation0 + $0x102] sm:$0x1] %vm130_vm0, %v2365_v47   ;;  %486 = vst.msk [vmem:[#allocation0 + $0x121] sm:$0x2] %vm130_vm0, %v2365_v47  }
  0xb4   :  { %488 = vst.msk [vmem:[#allocation0 + $0x140] sm:$0x4] %vm130_vm0, %v2365_v47   ;;  %490 = vst.msk [vmem:[#allocation0 + $0x15f] sm:$0x8] %vm130_vm0, %v2365_v47  }
  0xb5   :  { %492 = vst.msk [vmem:[#allocation0 + $0x17e] sm:$0x10] %vm130_vm0, %v2365_v47   ;;  %494 = vst.msk [vmem:[#allocation0 + $0x19d] sm:$0x20] %vm130_vm0, %v2365_v47  }
  0xb6   :  { %496 = vst.msk [vmem:[#allocation0 + $0x1bc] sm:$0x40] %vm130_vm0, %v2365_v47   ;;  %498 = vst.msk [vmem:[#allocation0 + $0x1db] sm:$0x80] %vm130_vm0, %v2365_v47   ;;  %v2469_v47 = vunpack.i.l.bf16 %v2468_v45 }
  0xb7   :  { %463 = vst.msk [vmem:[#allocation0 + $0x2] sm:$0x1] %vm130_vm0, %v2364_v48   ;;  %465 = vst.msk [vmem:[#allocation0 + $0x21] sm:$0x2] %vm130_vm0, %v2364_v48  }
  0xb8   :  { %467 = vst.msk [vmem:[#allocation0 + $0x40] sm:$0x4] %vm130_vm0, %v2364_v48   ;;  %469 = vst.msk [vmem:[#allocation0 + $0x5f] sm:$0x8] %vm130_vm0, %v2364_v48  }
  0xb9   :  { %471 = vst.msk [vmem:[#allocation0 + $0x7e] sm:$0x10] %vm130_vm0, %v2364_v48   ;;  %473 = vst.msk [vmem:[#allocation0 + $0x9d] sm:$0x20] %vm130_vm0, %v2364_v48  }
  0xba   :  { %475 = vst.msk [vmem:[#allocation0 + $0xbc] sm:$0x40] %vm130_vm0, %v2364_v48   ;;  %477 = vst.msk [vmem:[#allocation0 + $0xdb] sm:$0x80] %vm130_vm0, %v2364_v48  }
  0xbb   :  { %526 = vst.msk [vmem:[#allocation0 + $0x11d] sm:$0x1] %vm130_vm0, %v2370_v51   ;;  %528 = vst.msk [vmem:[#allocation0 + $0x13c] sm:$0x2] %vm130_vm0, %v2370_v51  }
  0xbc   :  { %530 = vst.msk [vmem:[#allocation0 + $0x15b] sm:$0x4] %vm130_vm0, %v2370_v51   ;;  %532 = vst.msk [vmem:[#allocation0 + $0x17a] sm:$0x8] %vm130_vm0, %v2370_v51  }
  0xbd   :  { %534 = vst.msk [vmem:[#allocation0 + $0x199] sm:$0x10] %vm130_vm0, %v2370_v51   ;;  %536 = vst.msk [vmem:[#allocation0 + $0x1b8] sm:$0x20] %vm130_vm0, %v2370_v51  }
  0xbe   :  { %538 = vst.msk [vmem:[#allocation0 + $0x1d7] sm:$0x40] %vm130_vm0, %v2370_v51   ;;  %540 = vst.msk [vmem:[#allocation0 + $0x1f6] sm:$0x80] %vm130_vm0, %v2370_v51  }
  0xbf   :  { %505 = vst.msk [vmem:[#allocation0 + $0x1d] sm:$0x1] %vm130_vm0, %v2369_v52   ;;  %507 = vst.msk [vmem:[#allocation0 + $0x3c] sm:$0x2] %vm130_vm0, %v2369_v52  }
  0xc0   :  { %509 = vst.msk [vmem:[#allocation0 + $0x5b] sm:$0x4] %vm130_vm0, %v2369_v52   ;;  %511 = vst.msk [vmem:[#allocation0 + $0x7a] sm:$0x8] %vm130_vm0, %v2369_v52  }
  0xc1   :  { %513 = vst.msk [vmem:[#allocation0 + $0x99] sm:$0x10] %vm130_vm0, %v2369_v52   ;;  %515 = vst.msk [vmem:[#allocation0 + $0xb8] sm:$0x20] %vm130_vm0, %v2369_v52  }
  0xc2   :  { %517 = vst.msk [vmem:[#allocation0 + $0xd7] sm:$0x40] %vm130_vm0, %v2369_v52   ;;  %519 = vst.msk [vmem:[#allocation0 + $0xf6] sm:$0x80] %vm130_vm0, %v2369_v52  }
  0xc3   :  { %568 = vst.msk [vmem:[#allocation0 + $0x10b] sm:$0x1] %vm130_vm0, %v2375_v53   ;;  %570 = vst.msk [vmem:[#allocation0 + $0x12a] sm:$0x2] %vm130_vm0, %v2375_v53  }
  0xc4   :  { %572 = vst.msk [vmem:[#allocation0 + $0x149] sm:$0x4] %vm130_vm0, %v2375_v53   ;;  %574 = vst.msk [vmem:[#allocation0 + $0x168] sm:$0x8] %vm130_vm0, %v2375_v53  }
  0xc5   :  { %576 = vst.msk [vmem:[#allocation0 + $0x187] sm:$0x10] %vm130_vm0, %v2375_v53   ;;  %578 = vst.msk [vmem:[#allocation0 + $0x1a6] sm:$0x20] %vm130_vm0, %v2375_v53  }
  0xc6   :  { %580 = vst.msk [vmem:[#allocation0 + $0x1c5] sm:$0x40] %vm130_vm0, %v2375_v53   ;;  %582 = vst.msk [vmem:[#allocation0 + $0x1e4] sm:$0x80] %vm130_vm0, %v2375_v53  }
  0xc7   :  { %547 = vst.msk [vmem:[#allocation0 + $0xb] sm:$0x1] %vm130_vm0, %v2374_v54   ;;  %549 = vst.msk [vmem:[#allocation0 + $0x2a] sm:$0x2] %vm130_vm0, %v2374_v54  }
  0xc8   :  { %551 = vst.msk [vmem:[#allocation0 + $0x49] sm:$0x4] %vm130_vm0, %v2374_v54   ;;  %553 = vst.msk [vmem:[#allocation0 + $0x68] sm:$0x8] %vm130_vm0, %v2374_v54  }
  0xc9   :  { %555 = vst.msk [vmem:[#allocation0 + $0x87] sm:$0x10] %vm130_vm0, %v2374_v54   ;;  %557 = vst.msk [vmem:[#allocation0 + $0xa6] sm:$0x20] %vm130_vm0, %v2374_v54  }
  0xca   :  { %559 = vst.msk [vmem:[#allocation0 + $0xc5] sm:$0x40] %vm130_vm0, %v2374_v54   ;;  %561 = vst.msk [vmem:[#allocation0 + $0xe4] sm:$0x80] %vm130_vm0, %v2374_v54  }
  0xcb   :  { %610 = vst.msk [vmem:[#allocation0 + $0x115] sm:$0x1] %vm130_vm0, %v2380_v57   ;;  %612 = vst.msk [vmem:[#allocation0 + $0x134] sm:$0x2] %vm130_vm0, %v2380_v57  }
  0xcc   :  { %614 = vst.msk [vmem:[#allocation0 + $0x153] sm:$0x4] %vm130_vm0, %v2380_v57   ;;  %616 = vst.msk [vmem:[#allocation0 + $0x172] sm:$0x8] %vm130_vm0, %v2380_v57  }
  0xcd   :  { %618 = vst.msk [vmem:[#allocation0 + $0x191] sm:$0x10] %vm130_vm0, %v2380_v57   ;;  %620 = vst.msk [vmem:[#allocation0 + $0x1b0] sm:$0x20] %vm130_vm0, %v2380_v57  }
  0xce   :  { %622 = vst.msk [vmem:[#allocation0 + $0x1cf] sm:$0x40] %vm130_vm0, %v2380_v57   ;;  %624 = vst.msk [vmem:[#allocation0 + $0x1ee] sm:$0x80] %vm130_vm0, %v2380_v57  }
  0xcf   :  { %589 = vst.msk [vmem:[#allocation0 + $0x15] sm:$0x1] %vm130_vm0, %v2379_v58   ;;  %591 = vst.msk [vmem:[#allocation0 + $0x34] sm:$0x2] %vm130_vm0, %v2379_v58  }
  0xd0   :  { %593 = vst.msk [vmem:[#allocation0 + $0x53] sm:$0x4] %vm130_vm0, %v2379_v58   ;;  %595 = vst.msk [vmem:[#allocation0 + $0x72] sm:$0x8] %vm130_vm0, %v2379_v58  }
  0xd1   :  { %597 = vst.msk [vmem:[#allocation0 + $0x91] sm:$0x10] %vm130_vm0, %v2379_v58   ;;  %599 = vst.msk [vmem:[#allocation0 + $0xb0] sm:$0x20] %vm130_vm0, %v2379_v58  }
  0xd2   :  { %601 = vst.msk [vmem:[#allocation0 + $0xcf] sm:$0x40] %vm130_vm0, %v2379_v58   ;;  %603 = vst.msk [vmem:[#allocation0 + $0xee] sm:$0x80] %vm130_vm0, %v2379_v58  }
  0xd3   :  { %651 = vst.msk [vmem:[#allocation0 + $0x103] sm:$0x1] %vm130_vm0, %v2385_v59   ;;  %653 = vst.msk [vmem:[#allocation0 + $0x122] sm:$0x2] %vm130_vm0, %v2385_v59  }
  0xd4   :  { %655 = vst.msk [vmem:[#allocation0 + $0x141] sm:$0x4] %vm130_vm0, %v2385_v59   ;;  %657 = vst.msk [vmem:[#allocation0 + $0x160] sm:$0x8] %vm130_vm0, %v2385_v59  }
  0xd5   :  { %659 = vst.msk [vmem:[#allocation0 + $0x17f] sm:$0x10] %vm130_vm0, %v2385_v59   ;;  %661 = vst.msk [vmem:[#allocation0 + $0x19e] sm:$0x20] %vm130_vm0, %v2385_v59  }
  0xd6   :  { %663 = vst.msk [vmem:[#allocation0 + $0x1bd] sm:$0x40] %vm130_vm0, %v2385_v59   ;;  %665 = vst.msk [vmem:[#allocation0 + $0x1dc] sm:$0x80] %vm130_vm0, %v2385_v59  }
  0xd7   :  { %630 = vst.msk [vmem:[#allocation0 + $0x3] sm:$0x1] %vm130_vm0, %v2384_v60   ;;  %632 = vst.msk [vmem:[#allocation0 + $0x22] sm:$0x2] %vm130_vm0, %v2384_v60  }
  0xd8   :  { %634 = vst.msk [vmem:[#allocation0 + $0x41] sm:$0x4] %vm130_vm0, %v2384_v60   ;;  %636 = vst.msk [vmem:[#allocation0 + $0x60] sm:$0x8] %vm130_vm0, %v2384_v60  }
  0xd9   :  { %638 = vst.msk [vmem:[#allocation0 + $0x7f] sm:$0x10] %vm130_vm0, %v2384_v60   ;;  %640 = vst.msk [vmem:[#allocation0 + $0x9e] sm:$0x20] %vm130_vm0, %v2384_v60  }
  0xda   :  { %642 = vst.msk [vmem:[#allocation0 + $0xbd] sm:$0x40] %vm130_vm0, %v2384_v60   ;;  %644 = vst.msk [vmem:[#allocation0 + $0xdc] sm:$0x80] %vm130_vm0, %v2384_v60  }
  0xdb   :  { %1262 = vst.msk [vmem:[#allocation0 + $0x39] sm:$0x2] %vm1258_vm4, %v2389_v2   ;;  %1260 = vst.msk [vmem:[#allocation0 + $0x1a] sm:$0x1] %vm1258_vm4, %v2389_v2  }
  0xdc   :  { %1264 = vst.msk [vmem:[#allocation0 + $0x58] sm:$0x4] %vm1258_vm4, %v2389_v2   ;;  %1266 = vst.msk [vmem:[#allocation0 + $0x77] sm:$0x8] %vm1258_vm4, %v2389_v2  }
  0xdd   :  { %1268 = vst.msk [vmem:[#allocation0 + $0x96] sm:$0x10] %vm1258_vm4, %v2389_v2   ;;  %1270 = vst.msk [vmem:[#allocation0 + $0xb5] sm:$0x20] %vm1258_vm4, %v2389_v2  }
  0xde   :  { %1272 = vst.msk [vmem:[#allocation0 + $0xd4] sm:$0x40] %vm1258_vm4, %v2389_v2   ;;  %1274 = vst.msk [vmem:[#allocation0 + $0xf3] sm:$0x80] %vm1258_vm4, %v2389_v2  }
  0xdf   :  { %1302 = vst.msk [vmem:[#allocation0 + $0x11a] sm:$0x1] %vm1258_vm4, %v2390_v1   ;;  %1304 = vst.msk [vmem:[#allocation0 + $0x139] sm:$0x2] %vm1258_vm4, %v2390_v1  }
  0xe0   :  { %1306 = vst.msk [vmem:[#allocation0 + $0x158] sm:$0x4] %vm1258_vm4, %v2390_v1   ;;  %1308 = vst.msk [vmem:[#allocation0 + $0x177] sm:$0x8] %vm1258_vm4, %v2390_v1  }
  0xe1   :  { %1310 = vst.msk [vmem:[#allocation0 + $0x196] sm:$0x10] %vm1258_vm4, %v2390_v1   ;;  %1312 = vst.msk [vmem:[#allocation0 + $0x1b5] sm:$0x20] %vm1258_vm4, %v2390_v1  }
  0xe2   :  { %1314 = vst.msk [vmem:[#allocation0 + $0x1d4] sm:$0x40] %vm1258_vm4, %v2390_v1   ;;  %1316 = vst.msk [vmem:[#allocation0 + $0x1f3] sm:$0x80] %vm1258_vm4, %v2390_v1  }
  0xe3   :  { %1385 = vst.msk [vmem:[#allocation0 + $0x108] sm:$0x1] %vm1341_vm6, %v2763_v63   ;;  %1343 = vst.msk [vmem:[#allocation0 + $0x8] sm:$0x1] %vm1341_vm6, %v2394_v0  }
  0xe4   :  { %1345 = vst.msk [vmem:[#allocation0 + $0x27] sm:$0x2] %vm1341_vm6, %v2394_v0   ;;  %1347 = vst.msk [vmem:[#allocation0 + $0x46] sm:$0x4] %vm1341_vm6, %v2394_v0  }
  0xe5   :  { %1349 = vst.msk [vmem:[#allocation0 + $0x65] sm:$0x8] %vm1341_vm6, %v2394_v0   ;;  %1351 = vst.msk [vmem:[#allocation0 + $0x84] sm:$0x10] %vm1341_vm6, %v2394_v0  }
  0xe6   :  { %1353 = vst.msk [vmem:[#allocation0 + $0xa3] sm:$0x20] %vm1341_vm6, %v2394_v0   ;;  %1355 = vst.msk [vmem:[#allocation0 + $0xc2] sm:$0x40] %vm1341_vm6, %v2394_v0  }
  0xe7   :  { %1357 = vst.msk [vmem:[#allocation0 + $0xe1] sm:$0x80] %vm1341_vm6, %v2394_v0   ;;  %1387 = vst.msk [vmem:[#allocation0 + $0x127] sm:$0x2] %vm1341_vm6, %v2763_v63  }
  0xe8   :  { %1389 = vst.msk [vmem:[#allocation0 + $0x146] sm:$0x4] %vm1341_vm6, %v2763_v63   ;;  %1391 = vst.msk [vmem:[#allocation0 + $0x165] sm:$0x8] %vm1341_vm6, %v2763_v63  }
  0xe9   :  { %1393 = vst.msk [vmem:[#allocation0 + $0x184] sm:$0x10] %vm1341_vm6, %v2763_v63   ;;  %1395 = vst.msk [vmem:[#allocation0 + $0x1a3] sm:$0x20] %vm1341_vm6, %v2763_v63  }
  0xea   :  { %1397 = vst.msk [vmem:[#allocation0 + $0x1c2] sm:$0x40] %vm1341_vm6, %v2763_v63   ;;  %1399 = vst.msk [vmem:[#allocation0 + $0x1e1] sm:$0x80] %vm1341_vm6, %v2763_v63  }
  0xeb   :  { %1279 = vst.msk [vmem:[#allocation0 + $0x39] sm:$0x2] %vm1275_vm5, %v2389_v2   ;;  %1277 = vst.msk [vmem:[#allocation0 + $0x1a] sm:$0x1] %vm1275_vm5, %v2389_v2  }
  0xec   :  { %1281 = vst.msk [vmem:[#allocation0 + $0x58] sm:$0x4] %vm1275_vm5, %v2389_v2   ;;  %1283 = vst.msk [vmem:[#allocation0 + $0x77] sm:$0x8] %vm1275_vm5, %v2389_v2  }
  0xed   :  { %1285 = vst.msk [vmem:[#allocation0 + $0x96] sm:$0x10] %vm1275_vm5, %v2389_v2   ;;  %1287 = vst.msk [vmem:[#allocation0 + $0xb5] sm:$0x20] %vm1275_vm5, %v2389_v2  }
  0xee   :  { %1289 = vst.msk [vmem:[#allocation0 + $0xd4] sm:$0x40] %vm1275_vm5, %v2389_v2   ;;  %1291 = vst.msk [vmem:[#allocation0 + $0xf3] sm:$0x80] %vm1275_vm5, %v2389_v2  }
  0xef   :  { %1319 = vst.msk [vmem:[#allocation0 + $0x11a] sm:$0x1] %vm1275_vm5, %v2390_v1   ;;  %1321 = vst.msk [vmem:[#allocation0 + $0x139] sm:$0x2] %vm1275_vm5, %v2390_v1  }
  0xf0   :  { %1323 = vst.msk [vmem:[#allocation0 + $0x158] sm:$0x4] %vm1275_vm5, %v2390_v1   ;;  %1325 = vst.msk [vmem:[#allocation0 + $0x177] sm:$0x8] %vm1275_vm5, %v2390_v1  }
  0xf1   :  { %1327 = vst.msk [vmem:[#allocation0 + $0x196] sm:$0x10] %vm1275_vm5, %v2390_v1   ;;  %1329 = vst.msk [vmem:[#allocation0 + $0x1b5] sm:$0x20] %vm1275_vm5, %v2390_v1  }
  0xf2   :  { %1331 = vst.msk [vmem:[#allocation0 + $0x1d4] sm:$0x40] %vm1275_vm5, %v2390_v1   ;;  %1333 = vst.msk [vmem:[#allocation0 + $0x1f3] sm:$0x80] %vm1275_vm5, %v2390_v1  }
  0xf3   :  { %1402 = vst.msk [vmem:[#allocation0 + $0x108] sm:$0x1] %vm1358_vm7, %v2763_v63   ;;  %1360 = vst.msk [vmem:[#allocation0 + $0x8] sm:$0x1] %vm1358_vm7, %v2394_v0  }
  0xf4   :  { %1362 = vst.msk [vmem:[#allocation0 + $0x27] sm:$0x2] %vm1358_vm7, %v2394_v0   ;;  %1364 = vst.msk [vmem:[#allocation0 + $0x46] sm:$0x4] %vm1358_vm7, %v2394_v0  }
  0xf5   :  { %1366 = vst.msk [vmem:[#allocation0 + $0x65] sm:$0x8] %vm1358_vm7, %v2394_v0   ;;  %1368 = vst.msk [vmem:[#allocation0 + $0x84] sm:$0x10] %vm1358_vm7, %v2394_v0  }
  0xf6   :  { %1370 = vst.msk [vmem:[#allocation0 + $0xa3] sm:$0x20] %vm1358_vm7, %v2394_v0   ;;  %1372 = vst.msk [vmem:[#allocation0 + $0xc2] sm:$0x40] %vm1358_vm7, %v2394_v0  }
  0xf7   :  { %1374 = vst.msk [vmem:[#allocation0 + $0xe1] sm:$0x80] %vm1358_vm7, %v2394_v0   ;;  %1404 = vst.msk [vmem:[#allocation0 + $0x127] sm:$0x2] %vm1358_vm7, %v2763_v63  }
  0xf8   :  { %1406 = vst.msk [vmem:[#allocation0 + $0x146] sm:$0x4] %vm1358_vm7, %v2763_v63   ;;  %1408 = vst.msk [vmem:[#allocation0 + $0x165] sm:$0x8] %vm1358_vm7, %v2763_v63  }
  0xf9   :  { %1410 = vst.msk [vmem:[#allocation0 + $0x184] sm:$0x10] %vm1358_vm7, %v2763_v63   ;;  %1412 = vst.msk [vmem:[#allocation0 + $0x1a3] sm:$0x20] %vm1358_vm7, %v2763_v63  }
  0xfa   :  { %1414 = vst.msk [vmem:[#allocation0 + $0x1c2] sm:$0x40] %vm1358_vm7, %v2763_v63   ;;  %1416 = vst.msk [vmem:[#allocation0 + $0x1e1] sm:$0x80] %vm1358_vm7, %v2763_v63  }
  0xfb   :  { %693 = vst.msk [vmem:[#allocation0 + $0x11e] sm:$0x1] %vm130_vm0, %v2405_v5   ;;  %695 = vst.msk [vmem:[#allocation0 + $0x13d] sm:$0x2] %vm130_vm0, %v2405_v5  }
  0xfc   :  { %697 = vst.msk [vmem:[#allocation0 + $0x15c] sm:$0x4] %vm130_vm0, %v2405_v5   ;;  %699 = vst.msk [vmem:[#allocation0 + $0x17b] sm:$0x8] %vm130_vm0, %v2405_v5  }
  0xfd   :  { %701 = vst.msk [vmem:[#allocation0 + $0x19a] sm:$0x10] %vm130_vm0, %v2405_v5   ;;  %703 = vst.msk [vmem:[#allocation0 + $0x1b9] sm:$0x20] %vm130_vm0, %v2405_v5  }
  0xfe   :  { %705 = vst.msk [vmem:[#allocation0 + $0x1d8] sm:$0x40] %vm130_vm0, %v2405_v5   ;;  %707 = vst.msk [vmem:[#allocation0 + $0x1f7] sm:$0x80] %vm130_vm0, %v2405_v5  }
  0xff   :  { %672 = vst.msk [vmem:[#allocation0 + $0x1e] sm:$0x1] %vm130_vm0, %v2404_v6   ;;  %674 = vst.msk [vmem:[#allocation0 + $0x3d] sm:$0x2] %vm130_vm0, %v2404_v6  }
 0x100   :  { %676 = vst.msk [vmem:[#allocation0 + $0x5c] sm:$0x4] %vm130_vm0, %v2404_v6   ;;  %678 = vst.msk [vmem:[#allocation0 + $0x7b] sm:$0x8] %vm130_vm0, %v2404_v6  }
 0x101   :  { %680 = vst.msk [vmem:[#allocation0 + $0x9a] sm:$0x10] %vm130_vm0, %v2404_v6   ;;  %682 = vst.msk [vmem:[#allocation0 + $0xb9] sm:$0x20] %vm130_vm0, %v2404_v6  }
 0x102   :  { %684 = vst.msk [vmem:[#allocation0 + $0xd8] sm:$0x40] %vm130_vm0, %v2404_v6   ;;  %686 = vst.msk [vmem:[#allocation0 + $0xf7] sm:$0x80] %vm130_vm0, %v2404_v6  }
 0x103   :  { %1431 = vst.msk [vmem:[#allocation0 + $0x50] sm:$0x4] %vm1425_vm8, %v2399_v8   ;;  %1433 = vst.msk [vmem:[#allocation0 + $0x6f] sm:$0x8] %vm1425_vm8, %v2399_v8  }
 0x104   :  { %1435 = vst.msk [vmem:[#allocation0 + $0x8e] sm:$0x10] %vm1425_vm8, %v2399_v8   ;;  %1479 = vst.msk [vmem:[#allocation0 + $0x1ad] sm:$0x20] %vm1425_vm8, %v2400_v7  }
 0x105   :  { %1481 = vst.msk [vmem:[#allocation0 + $0x1cc] sm:$0x40] %vm1425_vm8, %v2400_v7   ;;  %1427 = vst.msk [vmem:[#allocation0 + $0x12] sm:$0x1] %vm1425_vm8, %v2399_v8  }
 0x106   :  { %1429 = vst.msk [vmem:[#allocation0 + $0x31] sm:$0x2] %vm1425_vm8, %v2399_v8   ;;  %1437 = vst.msk [vmem:[#allocation0 + $0xad] sm:$0x20] %vm1425_vm8, %v2399_v8  }
 0x107   :  { %1439 = vst.msk [vmem:[#allocation0 + $0xcc] sm:$0x40] %vm1425_vm8, %v2399_v8   ;;  %1441 = vst.msk [vmem:[#allocation0 + $0xeb] sm:$0x80] %vm1425_vm8, %v2399_v8  }
 0x108   :  { %1469 = vst.msk [vmem:[#allocation0 + $0x112] sm:$0x1] %vm1425_vm8, %v2400_v7   ;;  %1471 = vst.msk [vmem:[#allocation0 + $0x131] sm:$0x2] %vm1425_vm8, %v2400_v7  }
 0x109   :  { %1473 = vst.msk [vmem:[#allocation0 + $0x150] sm:$0x4] %vm1425_vm8, %v2400_v7   ;;  %1475 = vst.msk [vmem:[#allocation0 + $0x16f] sm:$0x8] %vm1425_vm8, %v2400_v7  }
 0x10a   :  { %1477 = vst.msk [vmem:[#allocation0 + $0x18e] sm:$0x10] %vm1425_vm8, %v2400_v7   ;;  %1483 = vst.msk [vmem:[#allocation0 + $0x1eb] sm:$0x80] %vm1425_vm8, %v2400_v7  }
 0x10b   :  { %1448 = vst.msk [vmem:[#allocation0 + $0x50] sm:$0x4] %vm1442_vm9, %v2399_v8   ;;  %1450 = vst.msk [vmem:[#allocation0 + $0x6f] sm:$0x8] %vm1442_vm9, %v2399_v8  }
 0x10c   :  { %1452 = vst.msk [vmem:[#allocation0 + $0x8e] sm:$0x10] %vm1442_vm9, %v2399_v8   ;;  %1496 = vst.msk [vmem:[#allocation0 + $0x1ad] sm:$0x20] %vm1442_vm9, %v2400_v7  }
 0x10d   :  { %1498 = vst.msk [vmem:[#allocation0 + $0x1cc] sm:$0x40] %vm1442_vm9, %v2400_v7   ;;  %1444 = vst.msk [vmem:[#allocation0 + $0x12] sm:$0x1] %vm1442_vm9, %v2399_v8  }
 0x10e   :  { %1446 = vst.msk [vmem:[#allocation0 + $0x31] sm:$0x2] %vm1442_vm9, %v2399_v8   ;;  %1454 = vst.msk [vmem:[#allocation0 + $0xad] sm:$0x20] %vm1442_vm9, %v2399_v8  }
 0x10f   :  { %1456 = vst.msk [vmem:[#allocation0 + $0xcc] sm:$0x40] %vm1442_vm9, %v2399_v8   ;;  %1458 = vst.msk [vmem:[#allocation0 + $0xeb] sm:$0x80] %vm1442_vm9, %v2399_v8  }
 0x110   :  { %1486 = vst.msk [vmem:[#allocation0 + $0x112] sm:$0x1] %vm1442_vm9, %v2400_v7   ;;  %1488 = vst.msk [vmem:[#allocation0 + $0x131] sm:$0x2] %vm1442_vm9, %v2400_v7  }
 0x111   :  { %1490 = vst.msk [vmem:[#allocation0 + $0x150] sm:$0x4] %vm1442_vm9, %v2400_v7   ;;  %1492 = vst.msk [vmem:[#allocation0 + $0x16f] sm:$0x8] %vm1442_vm9, %v2400_v7  }
 0x112   :  { %1494 = vst.msk [vmem:[#allocation0 + $0x18e] sm:$0x10] %vm1442_vm9, %v2400_v7   ;;  %1500 = vst.msk [vmem:[#allocation0 + $0x1eb] sm:$0x80] %vm1442_vm9, %v2400_v7  }
 0x113   :  { %777 = vst.msk [vmem:[#allocation0 + $0x116] sm:$0x1] %vm130_vm0, %v2415_v11   ;;  %779 = vst.msk [vmem:[#allocation0 + $0x135] sm:$0x2] %vm130_vm0, %v2415_v11  }
 0x114   :  { %781 = vst.msk [vmem:[#allocation0 + $0x154] sm:$0x4] %vm130_vm0, %v2415_v11   ;;  %783 = vst.msk [vmem:[#allocation0 + $0x173] sm:$0x8] %vm130_vm0, %v2415_v11  }
 0x115   :  { %785 = vst.msk [vmem:[#allocation0 + $0x192] sm:$0x10] %vm130_vm0, %v2415_v11   ;;  %787 = vst.msk [vmem:[#allocation0 + $0x1b1] sm:$0x20] %vm130_vm0, %v2415_v11  }
 0x116   :  { %789 = vst.msk [vmem:[#allocation0 + $0x1d0] sm:$0x40] %vm130_vm0, %v2415_v11   ;;  %791 = vst.msk [vmem:[#allocation0 + $0x1ef] sm:$0x80] %vm130_vm0, %v2415_v11  }
 0x117   :  { %756 = vst.msk [vmem:[#allocation0 + $0x16] sm:$0x1] %vm130_vm0, %v2414_v12   ;;  %758 = vst.msk [vmem:[#allocation0 + $0x35] sm:$0x2] %vm130_vm0, %v2414_v12  }
 0x118   :  { %760 = vst.msk [vmem:[#allocation0 + $0x54] sm:$0x4] %vm130_vm0, %v2414_v12   ;;  %762 = vst.msk [vmem:[#allocation0 + $0x73] sm:$0x8] %vm130_vm0, %v2414_v12  }
 0x119   :  { %764 = vst.msk [vmem:[#allocation0 + $0x92] sm:$0x10] %vm130_vm0, %v2414_v12   ;;  %766 = vst.msk [vmem:[#allocation0 + $0xb1] sm:$0x20] %vm130_vm0, %v2414_v12  }
 0x11a   :  { %768 = vst.msk [vmem:[#allocation0 + $0xd0] sm:$0x40] %vm130_vm0, %v2414_v12   ;;  %770 = vst.msk [vmem:[#allocation0 + $0xef] sm:$0x80] %vm130_vm0, %v2414_v12  }
 0x11b   :  { %735 = vst.msk [vmem:[#allocation0 + $0x10c] sm:$0x1] %vm130_vm0, %v2410_v13   ;;  %737 = vst.msk [vmem:[#allocation0 + $0x12b] sm:$0x2] %vm130_vm0, %v2410_v13  }
 0x11c   :  { %739 = vst.msk [vmem:[#allocation0 + $0x14a] sm:$0x4] %vm130_vm0, %v2410_v13   ;;  %741 = vst.msk [vmem:[#allocation0 + $0x169] sm:$0x8] %vm130_vm0, %v2410_v13  }
 0x11d   :  { %743 = vst.msk [vmem:[#allocation0 + $0x188] sm:$0x10] %vm130_vm0, %v2410_v13   ;;  %745 = vst.msk [vmem:[#allocation0 + $0x1a7] sm:$0x20] %vm130_vm0, %v2410_v13  }
 0x11e   :  { %747 = vst.msk [vmem:[#allocation0 + $0x1c6] sm:$0x40] %vm130_vm0, %v2410_v13   ;;  %749 = vst.msk [vmem:[#allocation0 + $0x1e5] sm:$0x80] %vm130_vm0, %v2410_v13  }
 0x11f   :  { %714 = vst.msk [vmem:[#allocation0 + $0xc] sm:$0x1] %vm130_vm0, %v2409_v14   ;;  %716 = vst.msk [vmem:[#allocation0 + $0x2b] sm:$0x2] %vm130_vm0, %v2409_v14  }
 0x120   :  { %718 = vst.msk [vmem:[#allocation0 + $0x4a] sm:$0x4] %vm130_vm0, %v2409_v14   ;;  %720 = vst.msk [vmem:[#allocation0 + $0x69] sm:$0x8] %vm130_vm0, %v2409_v14  }
 0x121   :  { %722 = vst.msk [vmem:[#allocation0 + $0x88] sm:$0x10] %vm130_vm0, %v2409_v14   ;;  %724 = vst.msk [vmem:[#allocation0 + $0xa7] sm:$0x20] %vm130_vm0, %v2409_v14  }
 0x122   :  { %726 = vst.msk [vmem:[#allocation0 + $0xc6] sm:$0x40] %vm130_vm0, %v2409_v14   ;;  %728 = vst.msk [vmem:[#allocation0 + $0xe5] sm:$0x80] %vm130_vm0, %v2409_v14  }
 0x123   :  { %860 = vst.msk [vmem:[#allocation0 + $0x10d] sm:$0x1] %vm130_vm0, %v2425_v17   ;;  %862 = vst.msk [vmem:[#allocation0 + $0x12c] sm:$0x2] %vm130_vm0, %v2425_v17  }
 0x124   :  { %864 = vst.msk [vmem:[#allocation0 + $0x14b] sm:$0x4] %vm130_vm0, %v2425_v17   ;;  %866 = vst.msk [vmem:[#allocation0 + $0x16a] sm:$0x8] %vm130_vm0, %v2425_v17  }
 0x125   :  { %868 = vst.msk [vmem:[#allocation0 + $0x189] sm:$0x10] %vm130_vm0, %v2425_v17   ;;  %870 = vst.msk [vmem:[#allocation0 + $0x1a8] sm:$0x20] %vm130_vm0, %v2425_v17  }
 0x126   :  { %872 = vst.msk [vmem:[#allocation0 + $0x1c7] sm:$0x40] %vm130_vm0, %v2425_v17   ;;  %874 = vst.msk [vmem:[#allocation0 + $0x1e6] sm:$0x80] %vm130_vm0, %v2425_v17  }
 0x127   :  { %839 = vst.msk [vmem:[#allocation0 + $0xd] sm:$0x1] %vm130_vm0, %v2424_v18   ;;  %841 = vst.msk [vmem:[#allocation0 + $0x2c] sm:$0x2] %vm130_vm0, %v2424_v18  }
 0x128   :  { %843 = vst.msk [vmem:[#allocation0 + $0x4b] sm:$0x4] %vm130_vm0, %v2424_v18   ;;  %845 = vst.msk [vmem:[#allocation0 + $0x6a] sm:$0x8] %vm130_vm0, %v2424_v18  }
 0x129   :  { %847 = vst.msk [vmem:[#allocation0 + $0x89] sm:$0x10] %vm130_vm0, %v2424_v18   ;;  %849 = vst.msk [vmem:[#allocation0 + $0xa8] sm:$0x20] %vm130_vm0, %v2424_v18  }
 0x12a   :  { %851 = vst.msk [vmem:[#allocation0 + $0xc7] sm:$0x40] %vm130_vm0, %v2424_v18   ;;  %853 = vst.msk [vmem:[#allocation0 + $0xe6] sm:$0x80] %vm130_vm0, %v2424_v18  }
 0x12b   :  { %818 = vst.msk [vmem:[#allocation0 + $0x104] sm:$0x1] %vm130_vm0, %v2420_v19   ;;  %820 = vst.msk [vmem:[#allocation0 + $0x123] sm:$0x2] %vm130_vm0, %v2420_v19  }
 0x12c   :  { %822 = vst.msk [vmem:[#allocation0 + $0x142] sm:$0x4] %vm130_vm0, %v2420_v19   ;;  %824 = vst.msk [vmem:[#allocation0 + $0x161] sm:$0x8] %vm130_vm0, %v2420_v19  }
 0x12d   :  { %826 = vst.msk [vmem:[#allocation0 + $0x180] sm:$0x10] %vm130_vm0, %v2420_v19   ;;  %828 = vst.msk [vmem:[#allocation0 + $0x19f] sm:$0x20] %vm130_vm0, %v2420_v19  }
 0x12e   :  { %830 = vst.msk [vmem:[#allocation0 + $0x1be] sm:$0x40] %vm130_vm0, %v2420_v19   ;;  %832 = vst.msk [vmem:[#allocation0 + $0x1dd] sm:$0x80] %vm130_vm0, %v2420_v19  }
 0x12f   :  { %797 = vst.msk [vmem:[#allocation0 + $0x4] sm:$0x1] %vm130_vm0, %v2419_v20   ;;  %799 = vst.msk [vmem:[#allocation0 + $0x23] sm:$0x2] %vm130_vm0, %v2419_v20  }
 0x130   :  { %801 = vst.msk [vmem:[#allocation0 + $0x42] sm:$0x4] %vm130_vm0, %v2419_v20   ;;  %803 = vst.msk [vmem:[#allocation0 + $0x61] sm:$0x8] %vm130_vm0, %v2419_v20  }
 0x131   :  { %805 = vst.msk [vmem:[#allocation0 + $0x80] sm:$0x10] %vm130_vm0, %v2419_v20   ;;  %807 = vst.msk [vmem:[#allocation0 + $0x9f] sm:$0x20] %vm130_vm0, %v2419_v20  }
 0x132   :  { %809 = vst.msk [vmem:[#allocation0 + $0xbe] sm:$0x40] %vm130_vm0, %v2419_v20   ;;  %811 = vst.msk [vmem:[#allocation0 + $0xdd] sm:$0x80] %vm130_vm0, %v2419_v20  }
 0x133   :  { %943 = vst.msk [vmem:[#allocation0 + $0x105] sm:$0x1] %vm130_vm0, %v2435_v23   ;;  %945 = vst.msk [vmem:[#allocation0 + $0x124] sm:$0x2] %vm130_vm0, %v2435_v23  }
 0x134   :  { %947 = vst.msk [vmem:[#allocation0 + $0x143] sm:$0x4] %vm130_vm0, %v2435_v23   ;;  %949 = vst.msk [vmem:[#allocation0 + $0x162] sm:$0x8] %vm130_vm0, %v2435_v23  }
 0x135   :  { %951 = vst.msk [vmem:[#allocation0 + $0x181] sm:$0x10] %vm130_vm0, %v2435_v23   ;;  %953 = vst.msk [vmem:[#allocation0 + $0x1a0] sm:$0x20] %vm130_vm0, %v2435_v23  }
 0x136   :  { %955 = vst.msk [vmem:[#allocation0 + $0x1bf] sm:$0x40] %vm130_vm0, %v2435_v23   ;;  %957 = vst.msk [vmem:[#allocation0 + $0x1de] sm:$0x80] %vm130_vm0, %v2435_v23  }
 0x137   :  { %922 = vst.msk [vmem:[#allocation0 + $0x5] sm:$0x1] %vm130_vm0, %v2434_v24   ;;  %924 = vst.msk [vmem:[#allocation0 + $0x24] sm:$0x2] %vm130_vm0, %v2434_v24  }
 0x138   :  { %926 = vst.msk [vmem:[#allocation0 + $0x43] sm:$0x4] %vm130_vm0, %v2434_v24   ;;  %928 = vst.msk [vmem:[#allocation0 + $0x62] sm:$0x8] %vm130_vm0, %v2434_v24  }
 0x139   :  { %930 = vst.msk [vmem:[#allocation0 + $0x81] sm:$0x10] %vm130_vm0, %v2434_v24   ;;  %932 = vst.msk [vmem:[#allocation0 + $0xa0] sm:$0x20] %vm130_vm0, %v2434_v24  }
 0x13a   :  { %934 = vst.msk [vmem:[#allocation0 + $0xbf] sm:$0x40] %vm130_vm0, %v2434_v24   ;;  %936 = vst.msk [vmem:[#allocation0 + $0xde] sm:$0x80] %vm130_vm0, %v2434_v24  }
 0x13b   :  { %902 = vst.msk [vmem:[#allocation0 + $0x117] sm:$0x1] %vm130_vm0, %v2430_v25   ;;  %904 = vst.msk [vmem:[#allocation0 + $0x136] sm:$0x2] %vm130_vm0, %v2430_v25  }
 0x13c   :  { %906 = vst.msk [vmem:[#allocation0 + $0x155] sm:$0x4] %vm130_vm0, %v2430_v25   ;;  %908 = vst.msk [vmem:[#allocation0 + $0x174] sm:$0x8] %vm130_vm0, %v2430_v25  }
 0x13d   :  { %910 = vst.msk [vmem:[#allocation0 + $0x193] sm:$0x10] %vm130_vm0, %v2430_v25   ;;  %912 = vst.msk [vmem:[#allocation0 + $0x1b2] sm:$0x20] %vm130_vm0, %v2430_v25  }
 0x13e   :  { %914 = vst.msk [vmem:[#allocation0 + $0x1d1] sm:$0x40] %vm130_vm0, %v2430_v25   ;;  %916 = vst.msk [vmem:[#allocation0 + $0x1f0] sm:$0x80] %vm130_vm0, %v2430_v25  }
 0x13f   :  { %881 = vst.msk [vmem:[#allocation0 + $0x17] sm:$0x1] %vm130_vm0, %v2429_v26   ;;  %883 = vst.msk [vmem:[#allocation0 + $0x36] sm:$0x2] %vm130_vm0, %v2429_v26  }
 0x140   :  { %885 = vst.msk [vmem:[#allocation0 + $0x55] sm:$0x4] %vm130_vm0, %v2429_v26   ;;  %887 = vst.msk [vmem:[#allocation0 + $0x74] sm:$0x8] %vm130_vm0, %v2429_v26  }
 0x141   :  { %889 = vst.msk [vmem:[#allocation0 + $0x93] sm:$0x10] %vm130_vm0, %v2429_v26   ;;  %891 = vst.msk [vmem:[#allocation0 + $0xb2] sm:$0x20] %vm130_vm0, %v2429_v26  }
 0x142   :  { %893 = vst.msk [vmem:[#allocation0 + $0xd1] sm:$0x40] %vm130_vm0, %v2429_v26   ;;  %895 = vst.msk [vmem:[#allocation0 + $0xf0] sm:$0x80] %vm130_vm0, %v2429_v26  }
 0x143   :  { %1027 = vst.msk [vmem:[#allocation0 + $0x118] sm:$0x1] %vm130_vm0, %v2445_v29   ;;  %1029 = vst.msk [vmem:[#allocation0 + $0x137] sm:$0x2] %vm130_vm0, %v2445_v29  }
 0x144   :  { %1031 = vst.msk [vmem:[#allocation0 + $0x156] sm:$0x4] %vm130_vm0, %v2445_v29   ;;  %1033 = vst.msk [vmem:[#allocation0 + $0x175] sm:$0x8] %vm130_vm0, %v2445_v29  }
 0x145   :  { %1035 = vst.msk [vmem:[#allocation0 + $0x194] sm:$0x10] %vm130_vm0, %v2445_v29   ;;  %1037 = vst.msk [vmem:[#allocation0 + $0x1b3] sm:$0x20] %vm130_vm0, %v2445_v29  }
 0x146   :  { %1039 = vst.msk [vmem:[#allocation0 + $0x1d2] sm:$0x40] %vm130_vm0, %v2445_v29   ;;  %1041 = vst.msk [vmem:[#allocation0 + $0x1f1] sm:$0x80] %vm130_vm0, %v2445_v29  }
 0x147   :  { %1006 = vst.msk [vmem:[#allocation0 + $0x18] sm:$0x1] %vm130_vm0, %v2444_v30   ;;  %1008 = vst.msk [vmem:[#allocation0 + $0x37] sm:$0x2] %vm130_vm0, %v2444_v30  }
 0x148   :  { %1010 = vst.msk [vmem:[#allocation0 + $0x56] sm:$0x4] %vm130_vm0, %v2444_v30   ;;  %1012 = vst.msk [vmem:[#allocation0 + $0x75] sm:$0x8] %vm130_vm0, %v2444_v30  }
 0x149   :  { %1014 = vst.msk [vmem:[#allocation0 + $0x94] sm:$0x10] %vm130_vm0, %v2444_v30   ;;  %1016 = vst.msk [vmem:[#allocation0 + $0xb3] sm:$0x20] %vm130_vm0, %v2444_v30  }
 0x14a   :  { %1018 = vst.msk [vmem:[#allocation0 + $0xd2] sm:$0x40] %vm130_vm0, %v2444_v30   ;;  %1020 = vst.msk [vmem:[#allocation0 + $0xf1] sm:$0x80] %vm130_vm0, %v2444_v30  }
 0x14b   :  { %985 = vst.msk [vmem:[#allocation0 + $0x10e] sm:$0x1] %vm130_vm0, %v2440_v31   ;;  %987 = vst.msk [vmem:[#allocation0 + $0x12d] sm:$0x2] %vm130_vm0, %v2440_v31  }
 0x14c   :  { %989 = vst.msk [vmem:[#allocation0 + $0x14c] sm:$0x4] %vm130_vm0, %v2440_v31   ;;  %991 = vst.msk [vmem:[#allocation0 + $0x16b] sm:$0x8] %vm130_vm0, %v2440_v31  }
 0x14d   :  { %993 = vst.msk [vmem:[#allocation0 + $0x18a] sm:$0x10] %vm130_vm0, %v2440_v31   ;;  %995 = vst.msk [vmem:[#allocation0 + $0x1a9] sm:$0x20] %vm130_vm0, %v2440_v31  }
 0x14e   :  { %997 = vst.msk [vmem:[#allocation0 + $0x1c8] sm:$0x40] %vm130_vm0, %v2440_v31   ;;  %999 = vst.msk [vmem:[#allocation0 + $0x1e7] sm:$0x80] %vm130_vm0, %v2440_v31  }
 0x14f   :  { %964 = vst.msk [vmem:[#allocation0 + $0xe] sm:$0x1] %vm130_vm0, %v2439_v32   ;;  %966 = vst.msk [vmem:[#allocation0 + $0x2d] sm:$0x2] %vm130_vm0, %v2439_v32  }
 0x150   :  { %968 = vst.msk [vmem:[#allocation0 + $0x4c] sm:$0x4] %vm130_vm0, %v2439_v32   ;;  %970 = vst.msk [vmem:[#allocation0 + $0x6b] sm:$0x8] %vm130_vm0, %v2439_v32  }
 0x151   :  { %972 = vst.msk [vmem:[#allocation0 + $0x8a] sm:$0x10] %vm130_vm0, %v2439_v32   ;;  %974 = vst.msk [vmem:[#allocation0 + $0xa9] sm:$0x20] %vm130_vm0, %v2439_v32  }
 0x152   :  { %976 = vst.msk [vmem:[#allocation0 + $0xc8] sm:$0x40] %vm130_vm0, %v2439_v32   ;;  %978 = vst.msk [vmem:[#allocation0 + $0xe7] sm:$0x80] %vm130_vm0, %v2439_v32   ;;  %v1733_v56 = vld [vmem:[#allocation0 + $0x108] sm:$0xff] }
 0x153   :  { %1110 = vst.msk [vmem:[#allocation0 + $0x110] sm:$0x1] %vm130_vm0, %v2455_v35   ;;  %1112 = vst.msk [vmem:[#allocation0 + $0x12f] sm:$0x2] %vm130_vm0, %v2455_v35   ;;  %v1761_v60 = vld [vmem:[#allocation0 + $0x128] sm:$0xff] }
 0x154   :  { %1114 = vst.msk [vmem:[#allocation0 + $0x14e] sm:$0x4] %vm130_vm0, %v2455_v35   ;;  %1116 = vst.msk [vmem:[#allocation0 + $0x16d] sm:$0x8] %vm130_vm0, %v2455_v35   ;;  %v1789_v61 = vld [vmem:[#allocation0 + $0x148] sm:$0xff] }
 0x155   :  { %1118 = vst.msk [vmem:[#allocation0 + $0x18c] sm:$0x10] %vm130_vm0, %v2455_v35   ;;  %1120 = vst.msk [vmem:[#allocation0 + $0x1ab] sm:$0x20] %vm130_vm0, %v2455_v35   ;;  %v1817_v62 = vld [vmem:[#allocation0 + $0x168] sm:$0xff] }
 0x156   :  { %1122 = vst.msk [vmem:[#allocation0 + $0x1ca] sm:$0x40] %vm130_vm0, %v2455_v35   ;;  %1124 = vst.msk [vmem:[#allocation0 + $0x1e9] sm:$0x80] %vm130_vm0, %v2455_v35   ;;  %v1510_v48 = vld [vmem:[#allocation0 + $0x8] sm:$0xff] }
 0x157   :  { %1089 = vst.msk [vmem:[#allocation0 + $0x10] sm:$0x1] %vm130_vm0, %v2454_v36   ;;  %1091 = vst.msk [vmem:[#allocation0 + $0x2f] sm:$0x2] %vm130_vm0, %v2454_v36   ;;  %v1537_v49 = vld [vmem:[#allocation0 + $0x28] sm:$0xff] }
 0x158   :  { %1093 = vst.msk [vmem:[#allocation0 + $0x4e] sm:$0x4] %vm130_vm0, %v2454_v36   ;;  %1095 = vst.msk [vmem:[#allocation0 + $0x6d] sm:$0x8] %vm130_vm0, %v2454_v36   ;;  %v1621_v50 = vld [vmem:[#allocation0 + $0x88] sm:$0xff] }
 0x159   :  { %1097 = vst.msk [vmem:[#allocation0 + $0x8c] sm:$0x10] %vm130_vm0, %v2454_v36   ;;  %1099 = vst.msk [vmem:[#allocation0 + $0xab] sm:$0x20] %vm130_vm0, %v2454_v36   ;;  %v1649_v51 = vld [vmem:[#allocation0 + $0xa8] sm:$0xff] }
 0x15a   :  { %1101 = vst.msk [vmem:[#allocation0 + $0xca] sm:$0x40] %vm130_vm0, %v2454_v36   ;;  %1103 = vst.msk [vmem:[#allocation0 + $0xe9] sm:$0x80] %vm130_vm0, %v2454_v36   ;;  %v1565_v52 = vld [vmem:[#allocation0 + $0x48] sm:$0xff] }
 0x15b   :  { %1068 = vst.msk [vmem:[#allocation0 + $0x106] sm:$0x1] %vm130_vm0, %v2450_v37   ;;  %1070 = vst.msk [vmem:[#allocation0 + $0x125] sm:$0x2] %vm130_vm0, %v2450_v37   ;;  %v1593_v53 = vld [vmem:[#allocation0 + $0x68] sm:$0xff] }
 0x15c   :  { %1072 = vst.msk [vmem:[#allocation0 + $0x144] sm:$0x4] %vm130_vm0, %v2450_v37   ;;  %1074 = vst.msk [vmem:[#allocation0 + $0x163] sm:$0x8] %vm130_vm0, %v2450_v37   ;;  %v1677_v54 = vld [vmem:[#allocation0 + $0xc8] sm:$0xff] }
 0x15d   :  { %1076 = vst.msk [vmem:[#allocation0 + $0x182] sm:$0x10] %vm130_vm0, %v2450_v37   ;;  %1078 = vst.msk [vmem:[#allocation0 + $0x1a1] sm:$0x20] %vm130_vm0, %v2450_v37   ;;  %v1705_v55 = vld [vmem:[#allocation0 + $0xe8] sm:$0xff] }
 0x15e   :  { %1080 = vst.msk [vmem:[#allocation0 + $0x1c0] sm:$0x40] %vm130_vm0, %v2450_v37   ;;  %1082 = vst.msk [vmem:[#allocation0 + $0x1df] sm:$0x80] %vm130_vm0, %v2450_v37   ;;  %v1845_v5 = vld [vmem:[#allocation0 + $0x188] sm:$0xff] }
 0x15f   :  { %1047 = vst.msk [vmem:[#allocation0 + $0x6] sm:$0x1] %vm130_vm0, %v2449_v38   ;;  %1049 = vst.msk [vmem:[#allocation0 + $0x25] sm:$0x2] %vm130_vm0, %v2449_v38   ;;  %v1873_v6 = vld [vmem:[#allocation0 + $0x1a8] sm:$0xff] }
 0x160   :  { %1051 = vst.msk [vmem:[#allocation0 + $0x44] sm:$0x4] %vm130_vm0, %v2449_v38   ;;  %1053 = vst.msk [vmem:[#allocation0 + $0x63] sm:$0x8] %vm130_vm0, %v2449_v38   ;;  %v1901_v7 = vld [vmem:[#allocation0 + $0x1c8] sm:$0xff] }
 0x161   :  { %1055 = vst.msk [vmem:[#allocation0 + $0x82] sm:$0x10] %vm130_vm0, %v2449_v38   ;;  %1057 = vst.msk [vmem:[#allocation0 + $0xa1] sm:$0x20] %vm130_vm0, %v2449_v38   ;;  %v1929_v26 = vld [vmem:[#allocation0 + $0x1e8] sm:$0xff] }
 0x162   :  { %1059 = vst.msk [vmem:[#allocation0 + $0xc0] sm:$0x40] %vm130_vm0, %v2449_v38   ;;  %1061 = vst.msk [vmem:[#allocation0 + $0xdf] sm:$0x80] %vm130_vm0, %v2449_v38  }
 0x163   :  { %1193 = vst.msk [vmem:[#allocation0 + $0x107] sm:$0x1] %vm130_vm0, %v2465_v41   ;;  %1195 = vst.msk [vmem:[#allocation0 + $0x126] sm:$0x2] %vm130_vm0, %v2465_v41  }
 0x164   :  { %1197 = vst.msk [vmem:[#allocation0 + $0x145] sm:$0x4] %vm130_vm0, %v2465_v41   ;;  %1199 = vst.msk [vmem:[#allocation0 + $0x164] sm:$0x8] %vm130_vm0, %v2465_v41  }
 0x165   :  { %1201 = vst.msk [vmem:[#allocation0 + $0x183] sm:$0x10] %vm130_vm0, %v2465_v41   ;;  %1203 = vst.msk [vmem:[#allocation0 + $0x1a2] sm:$0x20] %vm130_vm0, %v2465_v41  }
 0x166   :  { %1205 = vst.msk [vmem:[#allocation0 + $0x1c1] sm:$0x40] %vm130_vm0, %v2465_v41   ;;  %1207 = vst.msk [vmem:[#allocation0 + $0x1e0] sm:$0x80] %vm130_vm0, %v2465_v41  }
 0x167   :  { %1172 = vst.msk [vmem:[#allocation0 + $0x7] sm:$0x1] %vm130_vm0, %v2464_v42   ;;  %1174 = vst.msk [vmem:[#allocation0 + $0x26] sm:$0x2] %vm130_vm0, %v2464_v42  }
 0x168   :  { %1176 = vst.msk [vmem:[#allocation0 + $0x45] sm:$0x4] %vm130_vm0, %v2464_v42   ;;  %1178 = vst.msk [vmem:[#allocation0 + $0x64] sm:$0x8] %vm130_vm0, %v2464_v42  }
 0x169   :  { %1180 = vst.msk [vmem:[#allocation0 + $0x83] sm:$0x10] %vm130_vm0, %v2464_v42   ;;  %1182 = vst.msk [vmem:[#allocation0 + $0xa2] sm:$0x20] %vm130_vm0, %v2464_v42  }
 0x16a   :  { %1184 = vst.msk [vmem:[#allocation0 + $0xc1] sm:$0x40] %vm130_vm0, %v2464_v42   ;;  %1186 = vst.msk [vmem:[#allocation0 + $0xe0] sm:$0x80] %vm130_vm0, %v2464_v42   ;;  %v1726_v10 = vld [vmem:[#allocation0 + $0x100] sm:$0xff] }
 0x16b   :  { %1152 = vst.msk [vmem:[#allocation0 + $0x119] sm:$0x1] %vm130_vm0, %v2460_v43   ;;  %1154 = vst.msk [vmem:[#allocation0 + $0x138] sm:$0x2] %vm130_vm0, %v2460_v43   ;;  %v1754_v14 = vld [vmem:[#allocation0 + $0x120] sm:$0xff]  ;;  %v2186_v19 = vpack.c.bf16 %v1733_v56, %v1726_v10 }
 0x16c   :  { %1156 = vst.msk [vmem:[#allocation0 + $0x157] sm:$0x4] %vm130_vm0, %v2460_v43   ;;  %1158 = vst.msk [vmem:[#allocation0 + $0x176] sm:$0x8] %vm130_vm0, %v2460_v43   ;;  %v1782_v15 = vld [vmem:[#allocation0 + $0x140] sm:$0xff]  ;;  %v2196_v23 = vpack.c.bf16 %v1761_v60, %v1754_v14 }
 0x16d   :  { %1160 = vst.msk [vmem:[#allocation0 + $0x195] sm:$0x10] %vm130_vm0, %v2460_v43   ;;  %1162 = vst.msk [vmem:[#allocation0 + $0x1b4] sm:$0x20] %vm130_vm0, %v2460_v43   ;;  %v1810_v16 = vld [vmem:[#allocation0 + $0x160] sm:$0xff]  ;;  %v2206_v24 = vpack.c.bf16 %v1789_v61, %v1782_v15 }
 0x16e   :  { %1164 = vst.msk [vmem:[#allocation0 + $0x1d3] sm:$0x40] %vm130_vm0, %v2460_v43   ;;  %1166 = vst.msk [vmem:[#allocation0 + $0x1f2] sm:$0x80] %vm130_vm0, %v2460_v43   ;;  %v1505_v57 = vld [vmem:[#allocation0] sm:$0xff]  ;;  %v2216_v25 = vpack.c.bf16 %v1817_v62, %v1810_v16 }
 0x16f   :  { %1131 = vst.msk [vmem:[#allocation0 + $0x19] sm:$0x1] %vm130_vm0, %v2459_v44   ;;  %1133 = vst.msk [vmem:[#allocation0 + $0x38] sm:$0x2] %vm130_vm0, %v2459_v44   ;;  %v1530_v58 = vld [vmem:[#allocation0 + $0x20] sm:$0xff]  ;;  %v2106_v2 = vpack.c.bf16 %v1510_v48, %v1505_v57 }
 0x170   :  { %1135 = vst.msk [vmem:[#allocation0 + $0x57] sm:$0x4] %vm130_vm0, %v2459_v44   ;;  %1137 = vst.msk [vmem:[#allocation0 + $0x76] sm:$0x8] %vm130_vm0, %v2459_v44   ;;  %v1558_v59 = vld [vmem:[#allocation0 + $0x40] sm:$0xff]  ;;  %v2116_v3 = vpack.c.bf16 %v1537_v49, %v1530_v58 }
 0x171   :  { %1139 = vst.msk [vmem:[#allocation0 + $0x95] sm:$0x10] %vm130_vm0, %v2459_v44   ;;  %1141 = vst.msk [vmem:[#allocation0 + $0xb4] sm:$0x20] %vm130_vm0, %v2459_v44   ;;  %v1586_v63 = vld [vmem:[#allocation0 + $0x60] sm:$0xff]  ;;  %v2126_v4 = vpack.c.bf16 %v1565_v52, %v1558_v59 }
 0x172   :  { %1143 = vst.msk [vmem:[#allocation0 + $0xd3] sm:$0x40] %vm130_vm0, %v2459_v44   ;;  %1145 = vst.msk [vmem:[#allocation0 + $0xf2] sm:$0x80] %vm130_vm0, %v2459_v44   ;;  %v1614_v0 = vld [vmem:[#allocation0 + $0x80] sm:$0xff]  ;;  %v2136_v11 = vpack.c.bf16 %v1593_v53, %v1586_v63  ;;  %v1747_v40 = vld [vmem:[#allocation0 + $0x118] sm:$0xff] }
 0x173   :  { %1235 = vst.msk [vmem:[#allocation0 + $0x111] sm:$0x1] %vm130_vm0, %v2470_v46   ;;  %1237 = vst.msk [vmem:[#allocation0 + $0x130] sm:$0x2] %vm130_vm0, %v2470_v46   ;;  %v1642_v1 = vld [vmem:[#allocation0 + $0xa0] sm:$0xff]  ;;  %v2146_v12 = vpack.c.bf16 %v1621_v50, %v1614_v0  ;;  %v1775_v42 = vld [vmem:[#allocation0 + $0x138] sm:$0xff] }
 0x174   :  { %1239 = vst.msk [vmem:[#allocation0 + $0x14f] sm:$0x4] %vm130_vm0, %v2470_v46   ;;  %1241 = vst.msk [vmem:[#allocation0 + $0x16e] sm:$0x8] %vm130_vm0, %v2470_v46   ;;  %v1670_v8 = vld [vmem:[#allocation0 + $0xc0] sm:$0xff]  ;;  %v2156_v13 = vpack.c.bf16 %v1649_v51, %v1642_v1  ;;  %v1803_v48 = vld [vmem:[#allocation0 + $0x158] sm:$0xff] }
 0x175   :  { %1243 = vst.msk [vmem:[#allocation0 + $0x18d] sm:$0x10] %vm130_vm0, %v2470_v46   ;;  %1245 = vst.msk [vmem:[#allocation0 + $0x1ac] sm:$0x20] %vm130_vm0, %v2470_v46   ;;  %v1698_v9 = vld [vmem:[#allocation0 + $0xe0] sm:$0xff]  ;;  %v2166_v17 = vpack.c.bf16 %v1677_v54, %v1670_v8  ;;  %v1859_v49 = vld [vmem:[#allocation0 + $0x198] sm:$0xff] }
 0x176   :  { %1247 = vst.msk [vmem:[#allocation0 + $0x1cb] sm:$0x40] %vm130_vm0, %v2470_v46   ;;  %1249 = vst.msk [vmem:[#allocation0 + $0x1ea] sm:$0x80] %vm130_vm0, %v2470_v46   ;;  %v2176_v18 = vpack.c.bf16 %v1705_v55, %v1698_v9  ;;  %v1838_v20 = vld [vmem:[#allocation0 + $0x180] sm:$0xff]  ;;  %v1523_v32 = vld [vmem:[#allocation0 + $0x18] sm:$0xff] }
 0x177   :  { %1214 = vst.msk [vmem:[#allocation0 + $0x11] sm:$0x1] %vm130_vm0, %v2469_v47   ;;  %1216 = vst.msk [vmem:[#allocation0 + $0x30] sm:$0x2] %vm130_vm0, %v2469_v47   ;;  %v1866_v21 = vld [vmem:[#allocation0 + $0x1a0] sm:$0xff]  ;;  %v2226_v28 = vpack.c.bf16 %v1845_v5, %v1838_v20  ;;  %v1551_v33 = vld [vmem:[#allocation0 + $0x38] sm:$0xff] }
 0x178   :  { %1218 = vst.msk [vmem:[#allocation0 + $0x4f] sm:$0x4] %vm130_vm0, %v2469_v47   ;;  %1220 = vst.msk [vmem:[#allocation0 + $0x6e] sm:$0x8] %vm130_vm0, %v2469_v47   ;;  %v1894_v22 = vld [vmem:[#allocation0 + $0x1c0] sm:$0xff]  ;;  %v2236_v29 = vpack.c.bf16 %v1873_v6, %v1866_v21  ;;  %v1579_v34 = vld [vmem:[#allocation0 + $0x58] sm:$0xff] }
 0x179   :  { %1222 = vst.msk [vmem:[#allocation0 + $0x8d] sm:$0x10] %vm130_vm0, %v2469_v47   ;;  %1224 = vst.msk [vmem:[#allocation0 + $0xac] sm:$0x20] %vm130_vm0, %v2469_v47   ;;  %v1922_v27 = vld [vmem:[#allocation0 + $0x1e0] sm:$0xff]  ;;  %v2246_v30 = vpack.c.bf16 %v1901_v7, %v1894_v22  ;;  %v1607_v35 = vld [vmem:[#allocation0 + $0x78] sm:$0xff] }
 0x17a   :  { %1226 = vst.msk [vmem:[#allocation0 + $0xcb] sm:$0x40] %vm130_vm0, %v2469_v47   ;;  %1228 = vst.msk [vmem:[#allocation0 + $0xea] sm:$0x80] %vm130_vm0, %v2469_v47   ;;  %v2256_v31 = vpack.c.bf16 %v1929_v26, %v1922_v27  ;;  %v1635_v36 = vld [vmem:[#allocation0 + $0x98] sm:$0xff]  ;;  %v1740_v63 = vld [vmem:[#allocation0 + $0x110] sm:$0xff] }
 0x17b   :  { %2107 = vst [vmem:[%s3198_s1] sm:$0xff] %v2106_v2   ;;  %2267 = vst [vmem:[%s3198_s1 + $0x10] sm:$0xff] %v2116_v3   ;;  %v1663_v37 = vld [vmem:[#allocation0 + $0xb8] sm:$0xff]  ;;  %v1768_v0 = vld [vmem:[#allocation0 + $0x130] sm:$0xff]  ;;  %v2191_v2 = vpack.c.bf16 %v1747_v40, %v1740_v63 }
 0x17c   :  { %2269 = vst [vmem:[%s3198_s1 + $0x20] sm:$0xff] %v2126_v4   ;;  %2271 = vst [vmem:[%s3198_s1 + $0x30] sm:$0xff] %v2136_v11   ;;  %v1691_v38 = vld [vmem:[#allocation0 + $0xd8] sm:$0xff]  ;;  %v2201_v3 = vpack.c.bf16 %v1775_v42, %v1768_v0  ;;  %v1796_v4 = vld [vmem:[#allocation0 + $0x150] sm:$0xff] }
 0x17d   :  { %2273 = vst [vmem:[%s3198_s1 + $0x40] sm:$0xff] %v2146_v12   ;;  %2275 = vst [vmem:[%s3198_s1 + $0x50] sm:$0xff] %v2156_v13   ;;  %v1719_v41 = vld [vmem:[#allocation0 + $0xf8] sm:$0xff]  ;;  %v1824_v5 = vld [vmem:[#allocation0 + $0x170] sm:$0xff]  ;;  %v2211_v7 = vpack.c.bf16 %v1803_v48, %v1796_v4 }
 0x17e   :  { %2277 = vst [vmem:[%s3198_s1 + $0x60] sm:$0xff] %v2166_v17   ;;  %2279 = vst [vmem:[%s3198_s1 + $0x70] sm:$0xff] %v2176_v18   ;;  %v1516_v39 = vld [vmem:[#allocation0 + $0x10] sm:$0xff]  ;;  %v1831_v47 = vld [vmem:[#allocation0 + $0x178] sm:$0xff] }
 0x17f   :  { %2281 = vst [vmem:[%s3198_s1 + $0x80] sm:$0xff] %v2186_v19   ;;  %2283 = vst [vmem:[%s3198_s1 + $0x90] sm:$0xff] %v2196_v23   ;;  %v2111_v43 = vpack.c.bf16 %v1523_v32, %v1516_v39  ;;  %v1544_v44 = vld [vmem:[#allocation0 + $0x30] sm:$0xff]  ;;  %v1943_v56 = vld [vmem:[#allocation0 + $0x1f8] sm:$0xff]  ;;  %v2221_v8 = vpack.c.bf16 %v1831_v47, %v1824_v5 }
 0x180   :  { %2285 = vst [vmem:[%s3198_s1 + $0xa0] sm:$0xff] %v2206_v24   ;;  %2287 = vst [vmem:[%s3198_s1 + $0xb0] sm:$0xff] %v2216_v25   ;;  %v1572_v45 = vld [vmem:[#allocation0 + $0x50] sm:$0xff]  ;;  %v2121_v50 = vpack.c.bf16 %v1551_v33, %v1544_v44  ;;  %v1887_v57 = vld [vmem:[#allocation0 + $0x1b8] sm:$0xff] }
 0x181   :  { %2289 = vst [vmem:[%s3198_s1 + $0xc0] sm:$0xff] %v2226_v28   ;;  %2291 = vst [vmem:[%s3198_s1 + $0xd0] sm:$0xff] %v2236_v29   ;;  %v1600_v46 = vld [vmem:[#allocation0 + $0x70] sm:$0xff]  ;;  %v2131_v51 = vpack.c.bf16 %v1579_v34, %v1572_v45  ;;  %v1915_v58 = vld [vmem:[#allocation0 + $0x1d8] sm:$0xff] }
 0x182   :  { %2293 = vst [vmem:[%s3198_s1 + $0xe0] sm:$0xff] %v2246_v30   ;;  %2295 = vst [vmem:[%s3198_s1 + $0xf0] sm:$0xff] %v2256_v31   ;;  %v2141_v52 = vpack.c.bf16 %v1607_v35, %v1600_v46  ;;  %v1628_v53 = vld [vmem:[#allocation0 + $0x90] sm:$0xff] }
 0x183   :  { %v1656_v54 = vld [vmem:[#allocation0 + $0xb0] sm:$0xff]  ;;  %2266 = vst [vmem:[%s3198_s1 + $0x8] sm:$0xff] %v2111_v43   ;;  %v2151_v59 = vpack.c.bf16 %v1635_v36, %v1628_v53  ;;  %2268 = vst [vmem:[%s3198_s1 + $0x18] sm:$0xff] %v2121_v50  }
 0x184   :  { %v1684_v55 = vld [vmem:[#allocation0 + $0xd0] sm:$0xff]  ;;  %v2161_v60 = vpack.c.bf16 %v1663_v37, %v1656_v54  ;;  %2270 = vst [vmem:[%s3198_s1 + $0x28] sm:$0xff] %v2131_v51   ;;  %2272 = vst [vmem:[%s3198_s1 + $0x38] sm:$0xff] %v2141_v52  }
 0x185   :  { %v2171_v61 = vpack.c.bf16 %v1691_v38, %v1684_v55  ;;  %v1712_v62 = vld [vmem:[#allocation0 + $0xf0] sm:$0xff]  ;;  %2274 = vst [vmem:[%s3198_s1 + $0x48] sm:$0xff] %v2151_v59   ;;  %2282 = vst [vmem:[%s3198_s1 + $0x88] sm:$0xff] %v2191_v2  }
 0x186   :  { %v2181_v1 = vpack.c.bf16 %v1719_v41, %v1712_v62  ;;  %v1852_v6 = vld [vmem:[#allocation0 + $0x190] sm:$0xff]  ;;  %2276 = vst [vmem:[%s3198_s1 + $0x58] sm:$0xff] %v2161_v60   ;;  %2284 = vst [vmem:[%s3198_s1 + $0x98] sm:$0xff] %v2201_v3  }
 0x187   :  { %2278 = vst [vmem:[%s3198_s1 + $0x68] sm:$0xff] %v2171_v61   ;;  %v2231_v9 = vpack.c.bf16 %v1859_v49, %v1852_v6  ;;  %v1880_v10 = vld [vmem:[#allocation0 + $0x1b0] sm:$0xff]  ;;  %2286 = vst [vmem:[%s3198_s1 + $0xa8] sm:$0xff] %v2211_v7  }
 0x188   :  { %v1908_v11 = vld [vmem:[#allocation0 + $0x1d0] sm:$0xff]  ;;  %2280 = vst [vmem:[%s3198_s1 + $0x78] sm:$0xff] %v2181_v1   ;;  %v2241_v13 = vpack.c.bf16 %v1887_v57, %v1880_v10  ;;  %2288 = vst [vmem:[%s3198_s1 + $0xb8] sm:$0xff] %v2221_v8  }
 0x189   :  { %v1936_v12 = vld [vmem:[#allocation0 + $0x1f0] sm:$0xff]  ;;  %v2251_v14 = vpack.c.bf16 %v1915_v58, %v1908_v11  ;;  %2290 = vst [vmem:[%s3198_s1 + $0xc8] sm:$0xff] %v2231_v9  }
 0x18a   :  { %v2261_v15 = vpack.c.bf16 %v1943_v56, %v1936_v12  ;;  %2292 = vst [vmem:[%s3198_s1 + $0xd8] sm:$0xff] %v2241_v13  }
 0x18b   :  { %2294 = vst [vmem:[%s3198_s1 + $0xe8] sm:$0xff] %v2251_v14  }
 0x18c   :  { %2296 = vst [vmem:[%s3198_s1 + $0xf8] sm:$0xff] %v2261_v15  }

// kernel: forward.4
= control target key start
LH: loop header
LB: loop body
LE: loop exit
PB: predicated region body
PF: predicated region fallthrough
CT: control target
= control target key end

     0   :  { %s736_s12 = smov 0   ;;  %s788_s0 = inlined_call_operand.vmem [shape: bf16[2,256,128], index: 0, kind: input, shape index: {}]   ;;  %s789_s1 = inlined_call_operand.vmem [shape: bf16[2,32,256], index: 1, kind: input, shape index: {}]   ;;  %s790_s2 = inlined_call_operand.vmem [shape: f32[2,32,1], index: 2, kind: input, shape index: {}]   ;;  %s791_s3 = inlined_call_operand.vmem [shape: bf16[2,32,128], index: 3, kind: output, shape index: {}]  }
   0x1 LB: > { %s560_s13 = sadd.s32 4294967295, %s713_s12   ;;  %p564_p0 = scmp.ge.s32.totalorder %s713_s12, 1  ;;  %s713_s12 = sphi %s736_s12, %s13_s12  }
   0x2   : > { %p157_p1 = scmp.lt.s32.totalorder %s713_s12, 3 }
   0x4   : > { %p158_p2 = pnand %p564_p0, %p157_p1 }
   0x5   : > { %p191_p3 = scmp.lt.s32.totalorder (!%p158_p2), %s560_s13, 1  ;;  %v715_v0 = vmov (!%p158_p2), 0  }
   0x6   : > { %161 = sbr.rel (%p158_p2) target bundleno = 290 (0x122), region = 32  ;;  %676 = vset.pattern.permute.xlu1 (!%p158_p2), %v715_v0  ;;  %675 = vset.pattern.permute.xlu0 (!%p158_p2), %v715_v0 }
   0xd   : > { %s793_s13 = smov (!%p191_p3, %s560_s13), 1 }
   0xe   : > { %s603_s14 = sshll.u32 %s793_s13, 7  ;;  %s604_s18 = sshll.u32 %s793_s13, 5 }
   0xf   : > { %s750_s17 = scalar_lea.vmem %s788_s0, %s603_s14  ;;  %s765_s21 = scalar_lea.vmem %s789_s1, %s604_s18 }
  0x10   : > { %v677_v1 = vld [vmem:[%s750_s17 + $0x40] sm:$0xff]   ;;  %v679_v3 = vld [vmem:[%s750_s17 + $0x48] sm:$0xff]   ;;  %v681_v5 = vld [vmem:[%s750_s17 + $0x50] sm:$0xff]   ;;  %s205_s24 = scalar_lea.vmem %s790_s2, %s604_s18  ;;  %s606_s25 = sshll.u32 %s793_s13, 4 }
  0x11   : > { %v678_v2 = vld [vmem:[%s750_s17] sm:$0xff]   ;;  %622 = vmatprep.subr.bf16.mxu0 %v677_v1  ;;  %650 = vmatprep.subr.bf16.mxu1 %v677_v1  ;;  %v680_v4 = vld [vmem:[%s750_s17 + $0x8] sm:$0xff]   ;;  %v682_v6 = vld [vmem:[%s750_s17 + $0x10] sm:$0xff]   ;;  %s210_s28 = scalar_lea.vmem %s791_s3, %s606_s25 }
  0x12   : > { %623 = vmatpush3.bf16.msra.mxu0 %v678_v2  ;;  %658 = vmatpush3.bf16.msra.mxu1 %v678_v2  ;;  %v683_v7 = vld [vmem:[%s750_s17 + $0x58] sm:$0xff]   ;;  %v685_v9 = vld [vmem:[%s750_s17 + $0x60] sm:$0xff]   ;;  %v687_v11 = vld [vmem:[%s750_s17 + $0x68] sm:$0xff]  }
  0x13   : > { %624 = vmatprep.subr.bf16.mxu0 %v679_v3  ;;  %651 = vmatprep.subr.bf16.mxu1 %v679_v3  ;;  %v684_v8 = vld [vmem:[%s750_s17 + $0x18] sm:$0xff]   ;;  %v686_v10 = vld [vmem:[%s750_s17 + $0x20] sm:$0xff]   ;;  %v688_v14 = vld [vmem:[%s750_s17 + $0x28] sm:$0xff]  }
  0x14   : > { %v695_v12 = vld [vmem:[%s765_s21 + $0x4] ss:$8 sps:$4 sm:$0xff]   ;;  %v698_v13 = vld [vmem:[%s765_s21 + $0x14] ss:$8 sps:$4 sm:$0xff]   ;;  %v693_v23 = vld [vmem:[%s765_s21] ss:$8 sps:$4 sm:$0xff]  }
  0x15   : > { %v250_v15 = vld [vmem:[%s205_s24 + $0x10] sm:$0xff]  ;;  %v248_v16 = vld [vmem:[%s205_s24] sm:$0xff]  ;;  %420 = vmatprep.mubr.bf16.mxu0 %v695_v12  ;;  %428 = vmatprep.mubr.bf16.mxu1 %v698_v13  ;;  %v251_v19 = vld [vmem:[%s205_s24 + $0x18] sm:$0xff] }
  0x16   : > { %625 = vmatpush3.bf16.msra.mxu0 %v680_v4  ;;  %659 = vmatpush3.bf16.msra.mxu1 %v680_v4  ;;  %v689_v17 = vld [vmem:[%s750_s17 + $0x70] sm:$0xff]   ;;  %v249_v20 = vld [vmem:[%s205_s24 + $0x8] sm:$0xff]  ;;  %v691_v21 = vld [vmem:[%s750_s17 + $0x78] sm:$0xff]  }
  0x17   : > { %626 = vmatprep.subr.bf16.mxu0 %v681_v5  ;;  %652 = vmatprep.subr.bf16.mxu1 %v681_v5  ;;  %v690_v18 = vld [vmem:[%s750_s17 + $0x30] sm:$0xff]   ;;  %v692_v22 = vld [vmem:[%s750_s17 + $0x38] sm:$0xff]  }
  0x18   : > { %264 = vperm.xlu1 %676, %v250_v15   ;;  %254 = vperm.xlu0 %675, %v248_v16   ;;  %v696_v24 = vld [vmem:[%s765_s21 + $0x10] ss:$8 sps:$4 sm:$0xff]  }
  0x1a   : > { %627 = vmatpush3.bf16.msra.mxu0 %v682_v6  ;;  %660 = vmatpush3.bf16.msra.mxu1 %v682_v6 }
  0x1b   : > { %628 = vmatprep.subr.bf16.mxu0 %v683_v7  ;;  %653 = vmatprep.subr.bf16.mxu1 %v683_v7 }
  0x1c   : > { %269 = vperm.xlu1 %676, %v251_v19   ;;  %259 = vperm.xlu0 %675, %v249_v20  }
  0x1e   : > { %629 = vmatpush3.bf16.msra.mxu0 %v684_v8  ;;  %661 = vmatpush3.bf16.msra.mxu1 %v684_v8 }
  0x1f   : > { %630 = vmatprep.subr.bf16.mxu0 %v685_v9  ;;  %654 = vmatprep.subr.bf16.mxu1 %v685_v9 }
  0x22   : > { %631 = vmatpush3.bf16.msra.mxu0 %v686_v10  ;;  %662 = vmatpush3.bf16.msra.mxu1 %v686_v10 }
  0x23   : > { %632 = vmatprep.subr.bf16.mxu0 %v687_v11  ;;  %655 = vmatprep.subr.bf16.mxu1 %v687_v11 }
  0x26   : > { %633 = vmatpush3.bf16.msra.mxu0 %v688_v14  ;;  %663 = vmatpush3.bf16.msra.mxu1 %v688_v14 }
  0x27   : > { %634 = vmatprep.subr.bf16.mxu0 %v689_v17  ;;  %656 = vmatprep.subr.bf16.mxu1 %v689_v17 }
  0x2a   : > { %635 = vmatpush3.bf16.msra.mxu0 %v690_v18  ;;  %664 = vmatpush3.bf16.msra.mxu1 %v690_v18 }
  0x2b   : > { %636 = vmatprep.subr.bf16.mxu0 %v691_v21  ;;  %657 = vmatprep.subr.bf16.mxu1 %v691_v21 }
  0x2e   : > { %637 = vmatpush3.bf16.msra.mxu0 %v692_v22  ;;  %665 = vmatpush3.bf16.msra.mxu1 %v692_v22 }
  0x31   : > { %421 = vmatmul.mubr.bf16.vlgmr.msra.gmra.mrb[0].mxu0 %v693_v23  ;;  %429 = vmatmul.mubr.bf16.vlgmr.msra.gmra.mrb[0].mxu1 %v696_v24 }
  0x97   : > { %v265_v25 = vpop.permute.xlu1 %264  ;;  %v255_v26 = vpop.permute.xlu0 %254 }
  0x9b   : > { %v270_v41 = vpop.permute.xlu1 %269  ;;  %v260_v42 = vpop.permute.xlu0 %259 }
 0x104   : > { %v638_v27 = vpop.f32.mrb[0].mxu0  ;;  %v644_v28 = vpop.f32.mrb[0].mxu1 }
 0x105   : > { %v639_v29 = vpop.f32.mrb[1].mxu0  ;;  %v645_v30 = vpop.f32.mrb[1].mxu1 }
 0x106   : > { %v640_v31 = vadd.f32 %v639_v29, %v638_v27  ;;  %v646_v32 = vadd.f32 %v645_v30, %v644_v28  ;;  %v641_v33 = vpop.f32.mrb[2].mxu0  ;;  %v647_v34 = vpop.f32.mrb[2].mxu1 }
 0x107   : > { %v642_v35 = vpop.f32.mrb[3].mxu0  ;;  %v648_v36 = vpop.f32.mrb[3].mxu1 }
 0x108   : > { %v423_v37 = vadd.f32 %v640_v31, %v255_v26  ;;  %v431_v38 = vadd.f32 %v646_v32, %v265_v25  ;;  %v643_v39 = vadd.f32 %v642_v35, %v641_v33  ;;  %v649_v40 = vadd.f32 %v648_v36, %v647_v34 }
 0x10a   : > { %v441_v43 = vmin.f32 %v423_v37, 0.0  ;;  %v443_v44 = vmin.f32 %v431_v38, 0.0  ;;  %v426_v45 = vadd.f32 %v643_v39, %v260_v42  ;;  %v434_v46 = vadd.f32 %v649_v40, %v270_v41 }
 0x10b   : > { %vm437_vm0 = vcmp.gt.f32.partialorder %v423_v37, 0.0  ;;  %vm439_vm2 = vcmp.gt.f32.partialorder %v431_v38, 0.0 }
 0x10c   : > { %v445_v47 = vmul.f32 1.442695, %v441_v43  ;;  %v449_v48 = vmul.f32 1.442695, %v443_v44  ;;  %v442_v49 = vmin.f32 %v426_v45, 0.0  ;;  %v444_v50 = vmin.f32 %v434_v46, 0.0 }
 0x10d   : > { %vm438_vm1 = vcmp.gt.f32.partialorder %v426_v45, 0.0  ;;  %vm440_vm3 = vcmp.gt.f32.partialorder %v434_v46, 0.0 }
 0x10e   : > { %699 = vpow2.f32 %v445_v47  ;;  %v447_v51 = vmul.f32 1.442695, %v442_v49  ;;  %v451_v52 = vmul.f32 1.442695, %v444_v50 }
 0x10f   : > { %701 = vpow2.f32 %v449_v48 }
 0x110   : > { %703 = vpow2.f32 %v447_v51 }
 0x111   : > { %705 = vpow2.f32 %v451_v52 }
 0x118   : > { %v700_v53 = vpop.eup %699 }
 0x119   : > { %v702_v54 = vpop.eup %701  ;;  %v593_v55 = vadd.f32 -1.0, %v700_v53 }
 0x11a   : > { %v704_v56 = vpop.eup %703  ;;  %v595_v57 = vadd.f32 -1.0, %v702_v54 }
 0x11b   : > { %v706_v58 = vpop.eup %705  ;;  %v594_v59 = vadd.f32 -1.0, %v704_v56  ;;  %v457_v61 = vsel %vm437_vm0, %v423_v37, %v593_v55 }
 0x11c   : > { %v596_v60 = vadd.f32 -1.0, %v706_v58  ;;  %v459_v63 = vsel %vm439_vm2, %v431_v38, %v595_v57 }
 0x11d   : > { %v458_v62 = vsel %vm438_vm1, %v426_v45, %v594_v59 }
 0x11e   : > { %v614_v0 = vpack.c.bf16 %v458_v62, %v457_v61  ;;  %v460_v1 = vsel %vm440_vm3, %v434_v46, %v596_v60 }
 0x11f   : > { %v619_v2 = vpack.c.bf16 %v460_v1, %v459_v63 }
 0x120   : > { %615 = vst [vmem:[%s210_s28] sm:$0xff] %v614_v0  }
 0x121   : > { %621 = vst [vmem:[%s210_s28 + $0x8] sm:$0xff] %v619_v2  }
 0x122 PF: > { %s13_s12 = sadd.s32 1, %s713_s12  }
 0x123   : > { %p10_p4 = scmp.ge.s32.totalorder %s13_s12, 4  }
 0x125   :  { %12 = sbr.rel (!%p10_p4) target bundleno = 1 (0x1), region = 68 }

// kernel: squeeze.6
= control target key start
LH: loop header
LB: loop body
LE: loop exit
PB: predicated region body
PF: predicated region fallthrough
CT: control target
= control target key end

     0   :  { %s162_s14 = smov 24  ;;  %s167_s15 = smov 96  ;;  %vm159_vm0 = vcmask 1042433   ;;  %vm164_vm1 = vcmask 1044483   ;;  %vm169_vm2 = vcmask 1046533   ;;  %vm173_vm3 = vcmask 1047559   ;;  %s577_s0 = inlined_call_operand.vmem [shape: bf16[1,2,32,64], index: 0, kind: input, shape index: {}]   ;;  %s578_s1 = inlined_call_operand.vmem [shape: bf16[2,2048], index: 1, kind: output, shape index: {}]  }
   0x1   :  { %v451_v0 = vld [vmem:[%s577_s0 + $0x18] sm:$0xff]   ;;  %v452_v1 = vld [vmem:[%s577_s0 + $0x10] sm:$0xff]   ;;  %v448_v2 = vld [vmem:[%s577_s0] sm:$0xff]   ;;  %s220_s16 = smov 6  ;;  %s225_s17 = smov 24  ;;  %vm130_vm4 = vcmask 523264  }
   0x2   :  { %v438_v3 = vunpack.c.h.bf16 %v451_v0  ;;  %v441_v4 = vunpack.c.l.bf16 %v452_v1  ;;  %v449_v5 = vunpack.c.l.bf16 %v448_v2  ;;  %v453_v6 = vld [vmem:[%s577_s0 + $0x8] sm:$0xff]   ;;  %v437_v7 = vunpack.c.l.bf16 %v451_v0  ;;  %s157_s0 = smov 6  ;;  %s230_s18 = smov 96 }
   0x3   :  { %v445_v8 = vunpack.c.l.bf16 %v453_v6  ;;  %v442_v9 = vunpack.c.h.bf16 %v452_v1  ;;  %v450_v10 = vunpack.c.h.bf16 %v448_v2  ;;  %v446_v11 = vunpack.c.h.bf16 %v453_v6  ;;  %s188_s19 = smov 6  ;;  %s193_s20 = smov 24 }
   0x4   :  { %20 = vst [vmem:[#allocation1 + $0x38] sm:$0xff] %v438_v3  ;;  %68 = vst [vmem:[#allocation1 + $0x20] sm:$0xff] %v441_v4  ;;  %s198_s21 = smov 96  ;;  %s480_s22 = smov 6  ;;  %vm177_vm5 = vcmask 1048064   ;;  %v457_v59 = vmov 0.0  }
   0x5   :  { %128 = vst [vmem:[#allocation1] sm:$0xff] %v449_v5  ;;  %36 = vst [vmem:[#allocation1 + $0x30] sm:$0xff] %v437_v7  ;;  %s482_s23 = smov 24  ;;  %s484_s24 = smov 96 }
   0x6   :  { %100 = vst [vmem:[#allocation1 + $0x10] sm:$0xff] %v445_v8  ;;  %52 = vst [vmem:[#allocation1 + $0x28] sm:$0xff] %v442_v9  ;;  %s456_s25 = smov 64  }
   0x7   :  { %115 = vst [vmem:[#allocation1 + $0x8] sm:$0xff] %v450_v10  ;;  %84 = vst [vmem:[#allocation1 + $0x18] sm:$0xff] %v446_v11 }
   0xb   :  { %v172_v17 = vld [vmem:[#allocation1 + $0x20] sm:$0x80]   ;;  %v267_v43 = vld [vmem:[#allocation1 + $0x38] sm:$0x80]  }
   0xc   :  { %v155_v12 = vld [vmem:[#allocation1 + $0x1] sm:$0x1]   ;;  %v235_v25 = vld [vmem:[#allocation1 + $0x30] sm:$0x80]   ;;  %v148_v49 = vld [vmem:[#allocation1 + $0x30] ss:$2 sm:$0xff]  }
   0xd   :  { %v158_v13 = vld [vmem:[#allocation1 + $0x3f] ss:$-30 sm:%s157_s0]   ;;  %v218_v18 = vld [vmem:[#allocation1 + $0x11] sm:$0x1]   ;;  %v203_v33 = vld [vmem:[#allocation1 + $0x28] sm:$0x80]  }
   0xe   :  { %v163_v14 = vld [vmem:[#allocation1 + $0x7d] ss:$-30 sm:%s162_s14]   ;;  %v160_v15 = vsel %vm159_vm0, %v158_v13, %v155_v12  ;;  %v226_v21 = vld [vmem:[#allocation1 + $0x8d] ss:$-30 sm:%s225_s17]   ;;  %v129_v44 = vld [vmem:[#allocation1] ss:$2 sm:$0xff]  }
   0xf   :  { %v168_v16 = vld [vmem:[#allocation1 + $0xbb] ss:$-30 sm:%s167_s15]   ;;  %v165_v19 = vsel %vm164_vm1, %v163_v14, %v160_v15  ;;  %v231_v22 = vld [vmem:[#allocation1 + $0xcb] ss:$-30 sm:%s230_s18]   ;;  %v141_v47 = vld [vmem:[#allocation1 + $0x20] ss:$2 sm:$0xff]  }
  0x10   :  { %v221_v20 = vld [vmem:[#allocation1 + $0x4f] ss:$-30 sm:%s220_s16]   ;;  %v170_v23 = vsel %vm169_vm2, %v168_v16, %v165_v19  ;;  %v186_v26 = vld [vmem:[#allocation1 + $0x9] sm:$0x1]   ;;  %v134_v48 = vld [vmem:[#allocation1 + $0x10] ss:$2 sm:$0xff]  }
  0x11   :  { %v223_v24 = vsel %vm159_vm0, %v221_v20, %v218_v18  ;;  %v189_v27 = vld [vmem:[#allocation1 + $0x47] ss:$-30 sm:%s188_s19]   ;;  %v174_v28 = vsel %vm173_vm3, %v172_v17, %v170_v23  ;;  %v250_v36 = vld [vmem:[#allocation1 + $0x19] sm:$0x1]  }
  0x12   :  { %v228_v29 = vsel %vm164_vm1, %v226_v21, %v223_v24  ;;  %v191_v30 = vsel %vm159_vm0, %v189_v27, %v186_v26  ;;  %v194_v31 = vld [vmem:[#allocation1 + $0x85] ss:$-30 sm:%s193_s20]   ;;  %175 = vrot.lane.b32.xlu0 %v174_v28, %s456_s25  ;;  %v258_v38 = vld [vmem:[#allocation1 + $0x95] ss:$-30 sm:%s482_s23]  }
  0x13   :  { %v199_v32 = vld [vmem:[#allocation1 + $0xc3] ss:$-30 sm:%s198_s21]   ;;  %v233_v34 = vsel %vm169_vm2, %v231_v22, %v228_v29  ;;  %v196_v35 = vsel %vm164_vm1, %v194_v31, %v191_v30  ;;  %v263_v42 = vld [vmem:[#allocation1 + $0xd3] ss:$-30 sm:%s484_s24]  }
  0x14   :  { %v253_v37 = vld [vmem:[#allocation1 + $0x57] ss:$-30 sm:%s480_s22]   ;;  %v237_v39 = vsel %vm173_vm3, %v235_v25, %v233_v34  ;;  %v201_v40 = vsel %vm169_vm2, %v199_v32, %v196_v35  ;;  %131 = vst.msk [vmem:[#allocation0] ss:$8 sm:$0xf] %vm130_vm4, %v129_v44  }
  0x15   :  { %v255_v41 = vsel %vm159_vm0, %v253_v37, %v250_v36  ;;  %238 = vrot.lane.b32.xlu1 %v237_v39, %s456_s25  ;;  %v205_v45 = vsel %vm173_vm3, %v203_v33, %v201_v40  ;;  %132 = vst.msk [vmem:[#allocation0] ss:$8 sm:$0xf0] %vm130_vm4, %v129_v44   ;;  %144 = vst.msk [vmem:[#allocation0 + $0x1] ss:$8 sm:$0xf] %vm130_vm4, %v141_v47  }
  0x16   :  { %v260_v46 = vsel %vm164_vm1, %v258_v38, %v255_v41  ;;  %146 = vst.msk [vmem:[#allocation0 + $0x1] ss:$8 sm:$0xf0] %vm130_vm4, %v141_v47   ;;  %137 = vst.msk [vmem:[#allocation0 + $0x40] ss:$8 sm:$0xf] %vm130_vm4, %v134_v48   ;;  %206 = vrot.lane.b32.xlu0 %v205_v45, %s456_s25 }
  0x17   :  { %v265_v50 = vsel %vm169_vm2, %v263_v42, %v260_v46  ;;  %151 = vst.msk [vmem:[#allocation0 + $0x41] ss:$8 sm:$0xf] %vm130_vm4, %v148_v49   ;;  %139 = vst.msk [vmem:[#allocation0 + $0x40] ss:$8 sm:$0xf0] %vm130_vm4, %v134_v48  }
  0x18   :  { %153 = vst.msk [vmem:[#allocation0 + $0x41] ss:$8 sm:$0xf0] %vm130_vm4, %v148_v49   ;;  %v269_v51 = vsel %vm173_vm3, %v267_v43, %v265_v50 }
  0x19   :  { %270 = vrot.lane.b32.xlu1 %v269_v51, %s456_s25 }
  0x84   :  { %v176_v52 = vpop.permute.xlu0 %175  }
  0x85   :  { %178 = vst.msk [vmem:[#allocation0] sm:$0x3] %vm177_vm5, %v176_v52   ;;  %180 = vst.msk [vmem:[#allocation0 + $0x6] sm:$0xc] %vm177_vm5, %v176_v52  }
  0x86   :  { %182 = vst.msk [vmem:[#allocation0 + $0xc] sm:$0x30] %vm177_vm5, %v176_v52   ;;  %184 = vst.msk [vmem:[#allocation0 + $0x12] sm:$0xc0] %vm177_vm5, %v176_v52  }
  0x87   :  { %v239_v53 = vpop.permute.xlu1 %238  }
  0x88   :  { %242 = vst.msk [vmem:[#allocation0 + $0x40] sm:$0x3] %vm177_vm5, %v239_v53   ;;  %244 = vst.msk [vmem:[#allocation0 + $0x46] sm:$0xc] %vm177_vm5, %v239_v53   ;;  %v207_v54 = vpop.permute.xlu0 %206  }
  0x89   :  { %246 = vst.msk [vmem:[#allocation0 + $0x4c] sm:$0x30] %vm177_vm5, %v239_v53   ;;  %248 = vst.msk [vmem:[#allocation0 + $0x52] sm:$0xc0] %vm177_vm5, %v239_v53  }
  0x8a   :  { %210 = vst.msk [vmem:[#allocation0 + $0x20] sm:$0x3] %vm177_vm5, %v207_v54   ;;  %212 = vst.msk [vmem:[#allocation0 + $0x26] sm:$0xc] %vm177_vm5, %v207_v54  }
  0x8b   :  { %214 = vst.msk [vmem:[#allocation0 + $0x2c] sm:$0x30] %vm177_vm5, %v207_v54   ;;  %216 = vst.msk [vmem:[#allocation0 + $0x32] sm:$0xc0] %vm177_vm5, %v207_v54   ;;  %v271_v55 = vpop.permute.xlu1 %270  }
  0x8c   :  { %274 = vst.msk [vmem:[#allocation0 + $0x60] sm:$0x3] %vm177_vm5, %v271_v55   ;;  %276 = vst.msk [vmem:[#allocation0 + $0x66] sm:$0xc] %vm177_vm5, %v271_v55   ;;  %v285_v56 = vld [vmem:[#allocation0] sm:$0x3] }
  0x8d   :  { %278 = vst.msk [vmem:[#allocation0 + $0x6c] sm:$0x30] %vm177_vm5, %v271_v55   ;;  %280 = vst.msk [vmem:[#allocation0 + $0x72] sm:$0xc0] %vm177_vm5, %v271_v55   ;;  %v290_v57 = vld [vmem:[#allocation0 + $0x8] sm:$0x3]  ;;  %v286_v60 = vpack.c.bf16 %v457_v59, %v285_v56 }
  0x8e   :  { %v296_v58 = vld [vmem:[#allocation0 + $0x10] sm:$0x3]  ;;  %v291_v61 = vpack.c.bf16 %v457_v59, %v290_v57  ;;  %v303_v63 = vld [vmem:[#allocation0 + $0x18] sm:$0x3] }
  0x8f   :  { %v297_v62 = vpack.c.bf16 %v457_v59, %v296_v58  ;;  %v304_v0 = vpack.c.bf16 %v457_v59, %v303_v63  ;;  %v338_v1 = vld [vmem:[#allocation0 + $0x40] sm:$0x3]  ;;  %v345_v2 = vld [vmem:[#allocation0 + $0x48] sm:$0x3]  ;;  %288 = vst [vmem:[%s578_s1] sm:$0x1] %v286_v60 }
  0x90   :  { %v352_v3 = vld [vmem:[#allocation0 + $0x50] sm:$0x3]  ;;  %420 = vst [vmem:[%s578_s1 + $0x1] sm:$0x1] %v291_v61  ;;  %v339_v4 = vpack.c.bf16 %v457_v59, %v338_v1  ;;  %v346_v5 = vpack.c.bf16 %v457_v59, %v345_v2  ;;  %v359_v7 = vld [vmem:[#allocation0 + $0x58] sm:$0x3] }
  0x91   :  { %421 = vst [vmem:[%s578_s1 + $0x2] sm:$0x1] %v297_v62  ;;  %v353_v6 = vpack.c.bf16 %v457_v59, %v352_v3  ;;  %422 = vst [vmem:[%s578_s1 + $0x3] sm:$0x1] %v304_v0  ;;  %v360_v8 = vpack.c.bf16 %v457_v59, %v359_v7  ;;  %v310_v9 = vld [vmem:[#allocation0 + $0x20] sm:$0x3] }
  0x92   :  { %v317_v10 = vld [vmem:[#allocation0 + $0x28] sm:$0x3]  ;;  %v324_v11 = vld [vmem:[#allocation0 + $0x30] sm:$0x3]  ;;  %427 = vst [vmem:[%s578_s1 + $0x8] sm:$0x1] %v339_v4  ;;  %v311_v12 = vpack.c.bf16 %v457_v59, %v310_v9 }
  0x93   :  { %428 = vst [vmem:[%s578_s1 + $0x9] sm:$0x1] %v346_v5  ;;  %429 = vst [vmem:[%s578_s1 + $0xa] sm:$0x1] %v353_v6  ;;  %v318_v13 = vpack.c.bf16 %v457_v59, %v317_v10  ;;  %v325_v14 = vpack.c.bf16 %v457_v59, %v324_v11  ;;  %v331_v15 = vld [vmem:[#allocation0 + $0x38] sm:$0x3] }
  0x94   :  { %430 = vst [vmem:[%s578_s1 + $0xb] sm:$0x1] %v360_v8  ;;  %v332_v16 = vpack.c.bf16 %v457_v59, %v331_v15  ;;  %v366_v17 = vld [vmem:[#allocation0 + $0x60] sm:$0x3]  ;;  %v373_v18 = vld [vmem:[#allocation0 + $0x68] sm:$0x3] }
  0x95   :  { %v380_v19 = vld [vmem:[#allocation0 + $0x70] sm:$0x3]  ;;  %423 = vst [vmem:[%s578_s1 + $0x4] sm:$0x1] %v311_v12  ;;  %424 = vst [vmem:[%s578_s1 + $0x5] sm:$0x1] %v318_v13  ;;  %v367_v20 = vpack.c.bf16 %v457_v59, %v366_v17  ;;  %v374_v21 = vpack.c.bf16 %v457_v59, %v373_v18 }
  0x96   :  { %425 = vst [vmem:[%s578_s1 + $0x6] sm:$0x1] %v325_v14  ;;  %v381_v22 = vpack.c.bf16 %v457_v59, %v380_v19  ;;  %v387_v23 = vld [vmem:[#allocation0 + $0x78] sm:$0x3]  ;;  %426 = vst [vmem:[%s578_s1 + $0x7] sm:$0x1] %v332_v16 }
  0x97   :  { %v388_v24 = vpack.c.bf16 %v457_v59, %v387_v23  ;;  %431 = vst [vmem:[%s578_s1 + $0xc] sm:$0x1] %v367_v20  ;;  %432 = vst [vmem:[%s578_s1 + $0xd] sm:$0x1] %v374_v21 }
  0x98   :  { %433 = vst [vmem:[%s578_s1 + $0xe] sm:$0x1] %v381_v22 }
  0x99   :  { %434 = vst [vmem:[%s578_s1 + $0xf] sm:$0x1] %v388_v24 }

// kernel: forward.5
= control target key start
LH: loop header
LB: loop body
LE: loop exit
PB: predicated region body
PF: predicated region fallthrough
CT: control target
= control target key end

     0   :  { %v4157_v22 = vmov 1966171168   ;;  %v552_v24 = vlaneseq  ;;  %vm3119_vm2 = vcmask 1041408   ;;  %s5117_s1 = inlined_call_operand.vmem [shape: bf16[4096,128], index: 1, kind: input, shape index: {}]   ;;  %s5118_s0 = inlined_call_operand.vmem [shape: bf16[2,4096], index: 0, kind: input, shape index: {}]   ;;  %s5119_s2 = inlined_call_operand.vmem [shape: f32[1,128], index: 2, kind: input, shape index: {}]   ;;  %s5120_s3 = inlined_call_operand.vmem [shape: bf16[128,256], index: 3, kind: input, shape index: {}]   ;;  %s5121_s4 = inlined_call_operand.vmem [shape: f32[1,256], index: 4, kind: input, shape index: {}]   ;;  %s5122_s5 = inlined_call_operand.vmem [shape: f32[2,256], index: 5, kind: output, shape index: {}]  }
   0x1   :  { %v3853_v0 = vld [vmem:[%s5117_s1 + $0x40] sm:$0xff]   ;;  %v3857_v4 = vld [vmem:[%s5117_s1 + $0x48] sm:$0xff]   ;;  %v3861_v8 = vld [vmem:[%s5117_s1 + $0x50] sm:$0xff]   ;;  %v550_v23 = vunpack.c.l.s4 %v4157_v22 }
   0x2   :  { %v3854_v1 = vld [vmem:[%s5117_s1 + $0xc0] sm:$0xff]   ;;  %3499 = vmatprep.subr.bf16.mxu0 %v3853_v0  ;;  %v3858_v5 = vld [vmem:[%s5117_s1 + $0xc8] sm:$0xff]   ;;  %v3862_v9 = vld [vmem:[%s5117_s1 + $0xd0] sm:$0xff]   ;;  %v4268_v30 = vshrl.u32 %v552_v24, 7 }
   0x3   :  { %v3855_v2 = vld [vmem:[%s5117_s1] sm:$0xff]   ;;  %3521 = vmatprep.subr.bf16.mxu1 %v3854_v1  ;;  %v3859_v6 = vld [vmem:[%s5117_s1 + $0x8] sm:$0xff]   ;;  %v3863_v10 = vld [vmem:[%s5117_s1 + $0x10] sm:$0xff]   ;;  %v551_v29 = vunpack.c.0.s8 %v550_v23 }
   0x4   :  { %v3856_v3 = vld [vmem:[%s5117_s1 + $0x80] sm:$0xff]   ;;  %3500 = vmatpush3.bf16.msra.mxu0 %v3855_v2  ;;  %v3860_v7 = vld [vmem:[%s5117_s1 + $0x88] sm:$0xff]   ;;  %v3864_v11 = vld [vmem:[%s5117_s1 + $0x90] sm:$0xff]  }
   0x5   :  { %3522 = vmatpush3.bf16.msra.mxu1 %v3856_v3  ;;  %3501 = vmatprep.subr.bf16.mxu0 %v3857_v4  ;;  %v3865_v12 = vld [vmem:[%s5117_s1 + $0x58] sm:$0xff]   ;;  %v3869_v16 = vld [vmem:[%s5117_s1 + $0x60] sm:$0xff]   ;;  %v3873_v20 = vld [vmem:[%s5117_s1 + $0x68] sm:$0xff]   ;;  %v4283_v35 = vsub.s32 %v551_v29, %v4268_v30 }
   0x6   :  { %3523 = vmatprep.subr.bf16.mxu1 %v3858_v5  ;;  %v3866_v13 = vld [vmem:[%s5117_s1 + $0xd8] sm:$0xff]   ;;  %v3870_v17 = vld [vmem:[%s5117_s1 + $0xe0] sm:$0xff]   ;;  %v3874_v21 = vld [vmem:[%s5117_s1 + $0xe8] sm:$0xff]  }
   0x7   :  { %v3867_v14 = vld [vmem:[%s5117_s1 + $0x18] sm:$0xff]   ;;  %v3871_v18 = vld [vmem:[%s5117_s1 + $0x20] sm:$0xff]   ;;  %v3875_v25 = vld [vmem:[%s5117_s1 + $0x28] sm:$0xff]  }
   0x8   :  { %3502 = vmatpush3.bf16.msra.mxu0 %v3859_v6  ;;  %v3868_v15 = vld [vmem:[%s5117_s1 + $0x98] sm:$0xff]   ;;  %v3872_v19 = vld [vmem:[%s5117_s1 + $0xa0] sm:$0xff]   ;;  %v3876_v26 = vld [vmem:[%s5117_s1 + $0xa8] sm:$0xff]  }
   0x9   :  { %3524 = vmatpush3.bf16.msra.mxu1 %v3860_v7  ;;  %3503 = vmatprep.subr.bf16.mxu0 %v3861_v8  ;;  %v3877_v27 = vld [vmem:[%s5117_s1 + $0x70] sm:$0xff]   ;;  %v3881_v33 = vld [vmem:[%s5117_s1 + $0x78] sm:$0xff]   ;;  %v21_v38 = vld [vmem:[%s5118_s0] sm:$0xff] }
   0xa   :  { %3525 = vmatprep.subr.bf16.mxu1 %v3862_v9  ;;  %v3878_v28 = vld [vmem:[%s5117_s1 + $0xf0] sm:$0xff]   ;;  %v3882_v34 = vld [vmem:[%s5117_s1 + $0xf8] sm:$0xff]   ;;  %v548_v39 = vcombine.high %v21_v38, %v21_v38  ;;  %v555_v40 = vrot.slane %v21_v38, %v4283_v35  ;;  %v3886_v41 = vld [vmem:[%s5117_s1 + $0x140] sm:$0xff]  }
   0xb   :  { %v3879_v31 = vld [vmem:[%s5117_s1 + $0x30] sm:$0xff]   ;;  %v3883_v36 = vld [vmem:[%s5117_s1 + $0x38] sm:$0xff]   ;;  %v3887_v42 = vld [vmem:[%s5117_s1 + $0x1c0] sm:$0xff]  }
   0xc   :  { %3504 = vmatpush3.bf16.msra.mxu0 %v3863_v10  ;;  %v3880_v32 = vld [vmem:[%s5117_s1 + $0xb0] sm:$0xff]   ;;  %v3884_v37 = vld [vmem:[%s5117_s1 + $0xb8] sm:$0xff]   ;;  %v563_v43 = vcombine.high %v555_v40, %v555_v40  ;;  %v571_v44 = vrot.slane %v555_v40, %v4283_v35  ;;  %v4303_v45 = vrot.slane %v548_v39, %v4283_v35  ;;  %v3888_v46 = vld [vmem:[%s5117_s1 + $0x100] sm:$0xff]  }
   0xd   :  { %3526 = vmatpush3.bf16.msra.mxu1 %v3864_v11  ;;  %3505 = vmatprep.subr.bf16.mxu0 %v3865_v12  ;;  %v3889_v48 = vld [vmem:[%s5117_s1 + $0x180] sm:$0xff]   ;;  %v3890_v51 = vld [vmem:[%s5117_s1 + $0x148] sm:$0xff]   ;;  %v3894_v58 = vld [vmem:[%s5117_s1 + $0x150] sm:$0xff]  }
   0xe   :  { %3527 = vmatprep.subr.bf16.mxu1 %v3866_v13  ;;  %v585_v47 = vrot.slane %v563_v43, %v4283_v35  ;;  %v564_v49 = vcombine.high %v4303_v45, %v4303_v45  ;;  %v593_v50 = vcombine.high %v571_v44, %v571_v44  ;;  %v3891_v53 = vld [vmem:[%s5117_s1 + $0x1c8] sm:$0xff]   ;;  %v3895_v59 = vld [vmem:[%s5117_s1 + $0x1d0] sm:$0xff]   ;;  %v3898_v62 = vld [vmem:[%s5117_s1 + $0x158] sm:$0xff]  }
   0xf   :  { %v3892_v55 = vld [vmem:[%s5117_s1 + $0x108] sm:$0xff]   ;;  %v3896_v60 = vld [vmem:[%s5117_s1 + $0x110] sm:$0xff]   ;;  %v3899_v63 = vld [vmem:[%s5117_s1 + $0x1d8] sm:$0xff]  }
  0x10   :  { %3506 = vmatpush3.bf16.msra.mxu0 %v3867_v14  ;;  %2344 = vmatprep.mubr.bf16.mxu0 %v585_v47  ;;  %v595_v52 = vcombine.high %v585_v47, %v585_v47  ;;  %v592_v54 = vrot.slane %v564_v49, %v4283_v35  ;;  %v3893_v56 = vld [vmem:[%s5117_s1 + $0x188] sm:$0xff]   ;;  %v3897_v61 = vld [vmem:[%s5117_s1 + $0x190] sm:$0xff]   ;;  %v3900_v0 = vld [vmem:[%s5117_s1 + $0x118] sm:$0xff]  }
  0x11   :  { %3528 = vmatpush3.bf16.msra.mxu1 %v3868_v15  ;;  %3507 = vmatprep.subr.bf16.mxu0 %v3869_v16  ;;  %v3901_v1 = vld [vmem:[%s5117_s1 + $0x198] sm:$0xff]   ;;  %v3902_v2 = vld [vmem:[%s5117_s1 + $0x160] sm:$0xff]   ;;  %v3906_v6 = vld [vmem:[%s5117_s1 + $0x168] sm:$0xff]  }
  0x12   :  { %3529 = vmatprep.subr.bf16.mxu1 %v3870_v17  ;;  %2384 = vmatprep.mubr.bf16.mxu1 %v595_v52  ;;  %v596_v57 = vcombine.high %v592_v54, %v592_v54  ;;  %v3903_v3 = vld [vmem:[%s5117_s1 + $0x1e0] sm:$0xff]   ;;  %v3907_v7 = vld [vmem:[%s5117_s1 + $0x1e8] sm:$0xff]   ;;  %v3910_v10 = vld [vmem:[%s5117_s1 + $0x170] sm:$0xff]  }
  0x13   :  { %v3904_v4 = vld [vmem:[%s5117_s1 + $0x120] sm:$0xff]   ;;  %v3908_v8 = vld [vmem:[%s5117_s1 + $0x128] sm:$0xff]   ;;  %v3911_v11 = vld [vmem:[%s5117_s1 + $0x1f0] sm:$0xff]  }
  0x14   :  { %3508 = vmatpush3.bf16.msra.mxu0 %v3871_v18  ;;  %v3905_v5 = vld [vmem:[%s5117_s1 + $0x1a0] sm:$0xff]   ;;  %v3909_v9 = vld [vmem:[%s5117_s1 + $0x1a8] sm:$0xff]   ;;  %v3912_v12 = vld [vmem:[%s5117_s1 + $0x130] sm:$0xff]   ;;  %v578_v18 = vrot.slane %v4303_v45, %v4283_v35 }
  0x15   :  { %3530 = vmatpush3.bf16.msra.mxu1 %v3872_v19  ;;  %3509 = vmatprep.subr.bf16.mxu0 %v3873_v20  ;;  %v3913_v13 = vld [vmem:[%s5117_s1 + $0x1b0] sm:$0xff]   ;;  %v3914_v14 = vld [vmem:[%s5117_s1 + $0x178] sm:$0xff]   ;;  %v3918_v19 = vld [vmem:[%s5117_s1 + $0x240] sm:$0xff]  }
  0x16   :  { %3531 = vmatprep.subr.bf16.mxu1 %v3874_v21  ;;  %v3915_v15 = vld [vmem:[%s5117_s1 + $0x1f8] sm:$0xff]   ;;  %v3919_v20 = vld [vmem:[%s5117_s1 + $0x2c0] sm:$0xff]   ;;  %v594_v23 = vcombine.high %v578_v18, %v578_v18  ;;  %v3926_v29 = vld [vmem:[%s5117_s1 + $0x250] sm:$0xff]  }
  0x17   :  { %v3916_v16 = vld [vmem:[%s5117_s1 + $0x138] sm:$0xff]   ;;  %v3920_v21 = vld [vmem:[%s5117_s1 + $0x200] sm:$0xff]   ;;  %v3938_v43 = vld [vmem:[%s5117_s1 + $0x268] sm:$0xff]  }
  0x18   :  { %3510 = vmatpush3.bf16.msra.mxu0 %v3875_v25  ;;  %v3917_v17 = vld [vmem:[%s5117_s1 + $0x1b8] sm:$0xff]   ;;  %v3921_v22 = vld [vmem:[%s5117_s1 + $0x280] sm:$0xff]   ;;  %v3922_v25 = vld [vmem:[%s5117_s1 + $0x248] sm:$0xff]  }
  0x19   :  { %3532 = vmatpush3.bf16.msra.mxu1 %v3876_v26  ;;  %3511 = vmatprep.subr.bf16.mxu0 %v3877_v27  ;;  %v3923_v26 = vld [vmem:[%s5117_s1 + $0x2c8] sm:$0xff]   ;;  %v3933_v38 = vld [vmem:[%s5117_s1 + $0x298] sm:$0xff]   ;;  %v3934_v39 = vld [vmem:[%s5117_s1 + $0x260] sm:$0xff]  }
  0x1a   :  { %3533 = vmatprep.subr.bf16.mxu1 %v3878_v28  ;;  %v3924_v27 = vld [vmem:[%s5117_s1 + $0x208] sm:$0xff]   ;;  %v3935_v40 = vld [vmem:[%s5117_s1 + $0x2e0] sm:$0xff]   ;;  %v3942_v47 = vld [vmem:[%s5117_s1 + $0x270] sm:$0xff]  }
  0x1b   :  { %v3925_v28 = vld [vmem:[%s5117_s1 + $0x288] sm:$0xff]   ;;  %v3944_v49 = vld [vmem:[%s5117_s1 + $0x230] sm:$0xff]   ;;  %v3947_v52 = vld [vmem:[%s5117_s1 + $0x2f8] sm:$0xff]  }
  0x1c   :  { %3512 = vmatpush3.bf16.msra.mxu0 %v3879_v31  ;;  %v3927_v31 = vld [vmem:[%s5117_s1 + $0x2d0] sm:$0xff]   ;;  %v3940_v45 = vld [vmem:[%s5117_s1 + $0x228] sm:$0xff]  }
  0x1d   :  { %3534 = vmatpush3.bf16.msra.mxu1 %v3880_v32  ;;  %3513 = vmatprep.subr.bf16.mxu0 %v3881_v33  ;;  %v3928_v32 = vld [vmem:[%s5117_s1 + $0x210] sm:$0xff]  }
  0x1e   :  { %3535 = vmatprep.subr.bf16.mxu1 %v3882_v34  ;;  %v3929_v33 = vld [vmem:[%s5117_s1 + $0x290] sm:$0xff]   ;;  %v3930_v34 = vld [vmem:[%s5117_s1 + $0x258] sm:$0xff]  }
  0x20   :  { %3514 = vmatpush3.bf16.msra.mxu0 %v3883_v36  ;;  %v3931_v36 = vld [vmem:[%s5117_s1 + $0x2d8] sm:$0xff]  }
  0x21   :  { %3536 = vmatpush3.bf16.msra.mxu1 %v3884_v37  ;;  %3543 = vmatprep.subr.bf16.mxu0 %v3886_v41  ;;  %v3932_v37 = vld [vmem:[%s5117_s1 + $0x218] sm:$0xff]   ;;  %v3936_v41 = vld [vmem:[%s5117_s1 + $0x220] sm:$0xff]  }
  0x22   :  { %3565 = vmatprep.subr.bf16.mxu1 %v3887_v42  ;;  %v3937_v42 = vld [vmem:[%s5117_s1 + $0x2a0] sm:$0xff]  }
  0x23   :  { %2345 = vmatmul.mubr.bf16.vlgmr.msra.gmra.mrb[0].mxu0 %v571_v44  ;;  %v3939_v44 = vld [vmem:[%s5117_s1 + $0x2e8] sm:$0xff]  }
  0x24   :  { %3544 = vmatpush3.bf16.msra.mxu0 %v3888_v46  ;;  %2385 = vmatmul.mubr.bf16.vlgmr.msra.gmra.mrb[0].mxu1 %v593_v50  ;;  %v3941_v46 = vld [vmem:[%s5117_s1 + $0x2a8] sm:$0xff]   ;;  %v3945_v50 = vld [vmem:[%s5117_s1 + $0x2b0] sm:$0xff]  }
  0x25   :  { %3545 = vmatprep.subr.bf16.mxu0 %v3890_v51  ;;  %3566 = vmatpush3.bf16.msra.mxu1 %v3889_v48  ;;  %v3943_v48 = vld [vmem:[%s5117_s1 + $0x2f0] sm:$0xff]   ;;  %v3946_v51 = vld [vmem:[%s5117_s1 + $0x278] sm:$0xff]  }
  0x26   :  { %2424 = vmatprep.mubr.bf16.mxu0 %v592_v54  ;;  %3567 = vmatprep.subr.bf16.mxu1 %v3891_v53  ;;  %v3948_v53 = vld [vmem:[%s5117_s1 + $0x238] sm:$0xff]   ;;  %v22_v54 = vld [vmem:[%s5118_s0 + $0x8] sm:$0xff] }
  0x27   :  { %2464 = vmatprep.mubr.bf16.mxu1 %v596_v57  ;;  %v597_v57 = vcombine.high %v22_v54, %v22_v54 }
  0x28   :  { %3546 = vmatpush3.bf16.msra.mxu0 %v3892_v55  ;;  %v3949_v55 = vld [vmem:[%s5117_s1 + $0x2b8] sm:$0xff]  }
  0x29   :  { %3547 = vmatprep.subr.bf16.mxu0 %v3894_v58  ;;  %3568 = vmatpush3.bf16.msra.mxu1 %v3893_v56  ;;  %v604_v56 = vrot.slane %v22_v54, %v4283_v35  ;;  %v3950_v58 = vld [vmem:[%s5117_s1 + $0x340] sm:$0xff]   ;;  %v3997_v54 = vld [vmem:[%s5117_s1 + $0x418] sm:$0xff]  }
  0x2a   :  { %3569 = vmatprep.subr.bf16.mxu1 %v3895_v59 }
  0x2b   :  { %v612_v59 = vcombine.high %v604_v56, %v604_v56 }
  0x2c   :  { %3548 = vmatpush3.bf16.msra.mxu0 %v3896_v60  ;;  %v620_v60 = vrot.slane %v604_v56, %v4283_v35  ;;  %v3999_v56 = vld [vmem:[%s5117_s1 + $0x460] sm:$0xff]  }
  0x2d   :  { %3549 = vmatprep.subr.bf16.mxu0 %v3898_v62  ;;  %3570 = vmatpush3.bf16.msra.mxu1 %v3897_v61  ;;  %v3951_v61 = vld [vmem:[%s5117_s1 + $0x3c0] sm:$0xff]   ;;  %v4509_v62 = vrot.slane %v597_v57, %v4283_v35 }
  0x2e   :  { %3571 = vmatprep.subr.bf16.mxu1 %v3899_v63  ;;  %v3952_v63 = vld [vmem:[%s5117_s1 + $0x300] sm:$0xff]  }
  0x2f   :  { %v4000_v57 = vld [vmem:[%s5117_s1 + $0x4e0] sm:$0xff]  }
  0x30   :  { %3550 = vmatpush3.bf16.msra.mxu0 %v3900_v0  ;;  %v634_v0 = vrot.slane %v612_v59, %v4283_v35  ;;  %v4002_v59 = vld [vmem:[%s5117_s1 + $0x4a0] sm:$0xff]  }
  0x31   :  { %3551 = vmatprep.subr.bf16.mxu0 %v3902_v2  ;;  %3572 = vmatpush3.bf16.msra.mxu1 %v3901_v1  ;;  %v3953_v1 = vld [vmem:[%s5117_s1 + $0x380] sm:$0xff]   ;;  %v613_v2 = vcombine.high %v4509_v62, %v4509_v62 }
  0x32   :  { %3573 = vmatprep.subr.bf16.mxu1 %v3903_v3  ;;  %v642_v3 = vcombine.high %v620_v60, %v620_v60 }
  0x34   :  { %3552 = vmatpush3.bf16.msra.mxu0 %v3904_v4  ;;  %v3954_v4 = vld [vmem:[%s5117_s1 + $0x348] sm:$0xff]  }
  0x35   :  { %3553 = vmatprep.subr.bf16.mxu0 %v3906_v6  ;;  %3574 = vmatpush3.bf16.msra.mxu1 %v3905_v5  ;;  %v644_v5 = vcombine.high %v634_v0, %v634_v0  ;;  %v3955_v6 = vld [vmem:[%s5117_s1 + $0x3c8] sm:$0xff]  }
  0x36   :  { %3575 = vmatprep.subr.bf16.mxu1 %v3907_v7  ;;  %v641_v7 = vrot.slane %v613_v2, %v4283_v35  ;;  %v4009_v2 = vld [vmem:[%s5117_s1 + $0x430] sm:$0xff]  }
  0x38   :  { %3554 = vmatpush3.bf16.msra.mxu0 %v3908_v8  ;;  %v3956_v8 = vld [vmem:[%s5117_s1 + $0x308] sm:$0xff]  }
  0x39   :  { %3555 = vmatprep.subr.bf16.mxu0 %v3910_v10  ;;  %3576 = vmatpush3.bf16.msra.mxu1 %v3909_v9  ;;  %v3957_v9 = vld [vmem:[%s5117_s1 + $0x388] sm:$0xff]   ;;  %v645_v10 = vcombine.high %v641_v7, %v641_v7 }
  0x3a   :  { %3577 = vmatprep.subr.bf16.mxu1 %v3911_v11  ;;  %v3958_v11 = vld [vmem:[%s5117_s1 + $0x350] sm:$0xff]  }
  0x3c   :  { %3556 = vmatpush3.bf16.msra.mxu0 %v3912_v12  ;;  %v3959_v12 = vld [vmem:[%s5117_s1 + $0x3d0] sm:$0xff]  }
  0x3d   :  { %3557 = vmatprep.subr.bf16.mxu0 %v3914_v14  ;;  %3578 = vmatpush3.bf16.msra.mxu1 %v3913_v13  ;;  %v3960_v13 = vld [vmem:[%s5117_s1 + $0x310] sm:$0xff]  }
  0x3e   :  { %3579 = vmatprep.subr.bf16.mxu1 %v3915_v15  ;;  %v3961_v14 = vld [vmem:[%s5117_s1 + $0x390] sm:$0xff]   ;;  %v3962_v15 = vld [vmem:[%s5117_s1 + $0x358] sm:$0xff]  }
  0x40   :  { %3558 = vmatpush3.bf16.msra.mxu0 %v3916_v16  ;;  %v3963_v16 = vld [vmem:[%s5117_s1 + $0x3d8] sm:$0xff]  }
  0x41   :  { %3587 = vmatprep.subr.bf16.mxu0 %v3918_v19  ;;  %3580 = vmatpush3.bf16.msra.mxu1 %v3917_v17  ;;  %v3964_v17 = vld [vmem:[%s5117_s1 + $0x318] sm:$0xff]   ;;  %v3966_v19 = vld [vmem:[%s5117_s1 + $0x360] sm:$0xff]  }
  0x42   :  { %3609 = vmatprep.subr.bf16.mxu1 %v3919_v20  ;;  %v3967_v20 = vld [vmem:[%s5117_s1 + $0x3e0] sm:$0xff]  }
  0x43   :  { %2425 = vmatmul.mubr.bf16.vlgmr.msra.gmra.mrb[4].mxu0 %v578_v18  ;;  %v3965_v18 = vld [vmem:[%s5117_s1 + $0x398] sm:$0xff]  }
  0x44   :  { %3588 = vmatpush3.bf16.msra.mxu0 %v3920_v21  ;;  %2465 = vmatmul.mubr.bf16.vlgmr.msra.gmra.mrb[4].mxu1 %v594_v23  ;;  %v3968_v21 = vld [vmem:[%s5117_s1 + $0x320] sm:$0xff]   ;;  %v3970_v23 = vld [vmem:[%s5117_s1 + $0x368] sm:$0xff]  }
  0x45   :  { %3589 = vmatprep.subr.bf16.mxu0 %v3922_v25  ;;  %3610 = vmatpush3.bf16.msra.mxu1 %v3921_v22  ;;  %v3969_v22 = vld [vmem:[%s5117_s1 + $0x3a0] sm:$0xff]   ;;  %v3971_v25 = vld [vmem:[%s5117_s1 + $0x3e8] sm:$0xff]  }
  0x46   :  { %3611 = vmatprep.subr.bf16.mxu1 %v3923_v26  ;;  %2504 = vmatprep.mubr.bf16.mxu0 %v634_v0  ;;  %v3972_v26 = vld [vmem:[%s5117_s1 + $0x328] sm:$0xff]   ;;  %v4007_v0 = vld [vmem:[%s5117_s1 + $0x470] sm:$0xff]  }
  0x47   :  { %2544 = vmatprep.mubr.bf16.mxu1 %v644_v5  ;;  %v4012_v5 = vld [vmem:[%s5117_s1 + $0x4f8] sm:$0xff]  }
  0x48   :  { %3590 = vmatpush3.bf16.msra.mxu0 %v3924_v27  ;;  %v3973_v27 = vld [vmem:[%s5117_s1 + $0x3a8] sm:$0xff]  }
  0x49   :  { %3591 = vmatprep.subr.bf16.mxu0 %v3926_v29  ;;  %3612 = vmatpush3.bf16.msra.mxu1 %v3925_v28  ;;  %v3974_v28 = vld [vmem:[%s5117_s1 + $0x370] sm:$0xff]  }
  0x4a   :  { %3613 = vmatprep.subr.bf16.mxu1 %v3927_v31  ;;  %v3975_v29 = vld [vmem:[%s5117_s1 + $0x3f0] sm:$0xff]  }
  0x4b   :  { %v3976_v31 = vld [vmem:[%s5117_s1 + $0x330] sm:$0xff]  }
  0x4c   :  { %3592 = vmatpush3.bf16.msra.mxu0 %v3928_v32  ;;  %v3977_v32 = vld [vmem:[%s5117_s1 + $0x3b0] sm:$0xff]  }
  0x4d   :  { %3593 = vmatprep.subr.bf16.mxu0 %v3930_v34  ;;  %3614 = vmatpush3.bf16.msra.mxu1 %v3929_v33  ;;  %v3978_v33 = vld [vmem:[%s5117_s1 + $0x378] sm:$0xff]  }
  0x4e   :  { %3615 = vmatprep.subr.bf16.mxu1 %v3931_v36  ;;  %v3979_v34 = vld [vmem:[%s5117_s1 + $0x3f8] sm:$0xff]  }
  0x4f   :  { %v3980_v36 = vld [vmem:[%s5117_s1 + $0x338] sm:$0xff]  }
  0x50   :  { %3594 = vmatpush3.bf16.msra.mxu0 %v3932_v37  ;;  %v3981_v37 = vld [vmem:[%s5117_s1 + $0x3b8] sm:$0xff]  }
  0x51   :  { %3595 = vmatprep.subr.bf16.mxu0 %v3934_v39  ;;  %3616 = vmatpush3.bf16.msra.mxu1 %v3933_v38  ;;  %v627_v38 = vrot.slane %v4509_v62, %v4283_v35  ;;  %v3983_v39 = vld [vmem:[%s5117_s1 + $0x440] sm:$0xff]   ;;  %v4005_v62 = vld [vmem:[%s5117_s1 + $0x428] sm:$0xff]  }
  0x52   :  { %3617 = vmatprep.subr.bf16.mxu1 %v3935_v40  ;;  %v3984_v40 = vld [vmem:[%s5117_s1 + $0x4c0] sm:$0xff]  }
  0x54   :  { %3596 = vmatpush3.bf16.msra.mxu0 %v3936_v41  ;;  %v3985_v41 = vld [vmem:[%s5117_s1 + $0x400] sm:$0xff]  }
  0x55   :  { %3597 = vmatprep.subr.bf16.mxu0 %v3938_v43  ;;  %3618 = vmatpush3.bf16.msra.mxu1 %v3937_v42  ;;  %v3986_v42 = vld [vmem:[%s5117_s1 + $0x480] sm:$0xff]   ;;  %v643_v43 = vcombine.high %v627_v38, %v627_v38 }
  0x56   :  { %3619 = vmatprep.subr.bf16.mxu1 %v3939_v44  ;;  %v3987_v44 = vld [vmem:[%s5117_s1 + $0x448] sm:$0xff]  }
  0x58   :  { %3598 = vmatpush3.bf16.msra.mxu0 %v3940_v45  ;;  %v3988_v45 = vld [vmem:[%s5117_s1 + $0x4c8] sm:$0xff]  }
  0x59   :  { %3599 = vmatprep.subr.bf16.mxu0 %v3942_v47  ;;  %3620 = vmatpush3.bf16.msra.mxu1 %v3941_v46  ;;  %v3989_v46 = vld [vmem:[%s5117_s1 + $0x408] sm:$0xff]  }
  0x5a   :  { %3621 = vmatprep.subr.bf16.mxu1 %v3943_v48  ;;  %v3990_v47 = vld [vmem:[%s5117_s1 + $0x488] sm:$0xff]   ;;  %v3991_v48 = vld [vmem:[%s5117_s1 + $0x450] sm:$0xff]  }
  0x5c   :  { %3600 = vmatpush3.bf16.msra.mxu0 %v3944_v49  ;;  %v3992_v49 = vld [vmem:[%s5117_s1 + $0x4d0] sm:$0xff]  }
  0x5d   :  { %3601 = vmatprep.subr.bf16.mxu0 %v3946_v51  ;;  %3622 = vmatpush3.bf16.msra.mxu1 %v3945_v50  ;;  %v3993_v50 = vld [vmem:[%s5117_s1 + $0x410] sm:$0xff]  }
  0x5e   :  { %3623 = vmatprep.subr.bf16.mxu1 %v3947_v52  ;;  %v3994_v51 = vld [vmem:[%s5117_s1 + $0x490] sm:$0xff]   ;;  %v3995_v52 = vld [vmem:[%s5117_s1 + $0x458] sm:$0xff]  }
  0x60   :  { %3602 = vmatpush3.bf16.msra.mxu0 %v3948_v53  ;;  %v3996_v53 = vld [vmem:[%s5117_s1 + $0x4d8] sm:$0xff]  }
  0x61   :  { %3631 = vmatprep.subr.bf16.mxu0 %v3950_v58  ;;  %3624 = vmatpush3.bf16.msra.mxu1 %v3949_v55  ;;  %v3998_v55 = vld [vmem:[%s5117_s1 + $0x498] sm:$0xff]   ;;  %v4001_v58 = vld [vmem:[%s5117_s1 + $0x420] sm:$0xff]  }
  0x62   :  { %3653 = vmatprep.subr.bf16.mxu1 %v3951_v61  ;;  %v4004_v61 = vld [vmem:[%s5117_s1 + $0x4e8] sm:$0xff]  }
  0x63   :  { %2505 = vmatmul.mubr.bf16.vlgmr.msra.gmra.mrb[8].mxu0 %v620_v60  ;;  %v4003_v60 = vld [vmem:[%s5117_s1 + $0x468] sm:$0xff]  }
  0x64   :  { %3632 = vmatpush3.bf16.msra.mxu0 %v3952_v63  ;;  %2545 = vmatmul.mubr.bf16.vlgmr.msra.gmra.mrb[8].mxu1 %v642_v3  ;;  %v4006_v63 = vld [vmem:[%s5117_s1 + $0x4a8] sm:$0xff]   ;;  %v4010_v3 = vld [vmem:[%s5117_s1 + $0x4b0] sm:$0xff]  }
  0x65   :  { %3633 = vmatprep.subr.bf16.mxu0 %v3954_v4  ;;  %3654 = vmatpush3.bf16.msra.mxu1 %v3953_v1  ;;  %v4008_v1 = vld [vmem:[%s5117_s1 + $0x4f0] sm:$0xff]   ;;  %v4011_v4 = vld [vmem:[%s5117_s1 + $0x478] sm:$0xff]  }
  0x66   :  { %2584 = vmatprep.mubr.bf16.mxu0 %v641_v7  ;;  %3655 = vmatprep.subr.bf16.mxu1 %v3955_v6  ;;  %v4013_v6 = vld [vmem:[%s5117_s1 + $0x438] sm:$0xff]   ;;  %v23_v7 = vld [vmem:[%s5118_s0 + $0x10] sm:$0xff] }
  0x67   :  { %2624 = vmatprep.mubr.bf16.mxu1 %v645_v10  ;;  %v646_v10 = vcombine.high %v23_v7, %v23_v7 }
  0x68   :  { %3634 = vmatpush3.bf16.msra.mxu0 %v3956_v8  ;;  %v4014_v8 = vld [vmem:[%s5117_s1 + $0x4b8] sm:$0xff]  }
  0x69   :  { %3635 = vmatprep.subr.bf16.mxu0 %v3958_v11  ;;  %3656 = vmatpush3.bf16.msra.mxu1 %v3957_v9  ;;  %v653_v9 = vrot.slane %v23_v7, %v4283_v35  ;;  %v4015_v11 = vld [vmem:[%s5117_s1 + $0x540] sm:$0xff]   ;;  %v4062_v7 = vld [vmem:[%s5117_s1 + $0x618] sm:$0xff]  }
  0x6a   :  { %3657 = vmatprep.subr.bf16.mxu1 %v3959_v12 }
  0x6b   :  { %v661_v12 = vcombine.high %v653_v9, %v653_v9 }
  0x6c   :  { %3636 = vmatpush3.bf16.msra.mxu0 %v3960_v13  ;;  %v669_v13 = vrot.slane %v653_v9, %v4283_v35  ;;  %v4064_v9 = vld [vmem:[%s5117_s1 + $0x660] sm:$0xff]  }
  0x6d   :  { %3637 = vmatprep.subr.bf16.mxu0 %v3962_v15  ;;  %3658 = vmatpush3.bf16.msra.mxu1 %v3961_v14  ;;  %v4016_v14 = vld [vmem:[%s5117_s1 + $0x5c0] sm:$0xff]   ;;  %v4715_v15 = vrot.slane %v646_v10, %v4283_v35 }
  0x6e   :  { %3659 = vmatprep.subr.bf16.mxu1 %v3963_v16  ;;  %v4017_v16 = vld [vmem:[%s5117_s1 + $0x500] sm:$0xff]  }
  0x6f   :  { %v4065_v10 = vld [vmem:[%s5117_s1 + $0x6e0] sm:$0xff]  }
  0x70   :  { %3638 = vmatpush3.bf16.msra.mxu0 %v3964_v17  ;;  %v683_v17 = vrot.slane %v661_v12, %v4283_v35  ;;  %v4067_v12 = vld [vmem:[%s5117_s1 + $0x6a0] sm:$0xff]  }
  0x71   :  { %3639 = vmatprep.subr.bf16.mxu0 %v3966_v19  ;;  %3660 = vmatpush3.bf16.msra.mxu1 %v3965_v18  ;;  %v4018_v18 = vld [vmem:[%s5117_s1 + $0x580] sm:$0xff]   ;;  %v662_v19 = vcombine.high %v4715_v15, %v4715_v15 }
  0x72   :  { %3661 = vmatprep.subr.bf16.mxu1 %v3967_v20  ;;  %v691_v20 = vcombine.high %v669_v13, %v669_v13 }
  0x74   :  { %3640 = vmatpush3.bf16.msra.mxu0 %v3968_v21  ;;  %v4019_v21 = vld [vmem:[%s5117_s1 + $0x548] sm:$0xff]  }
  0x75   :  { %3641 = vmatprep.subr.bf16.mxu0 %v3970_v23  ;;  %3662 = vmatpush3.bf16.msra.mxu1 %v3969_v22  ;;  %v693_v22 = vcombine.high %v683_v17, %v683_v17  ;;  %v4020_v23 = vld [vmem:[%s5117_s1 + $0x5c8] sm:$0xff]  }
  0x76   :  { %3663 = vmatprep.subr.bf16.mxu1 %v3971_v25  ;;  %v690_v25 = vrot.slane %v662_v19, %v4283_v35  ;;  %v4074_v19 = vld [vmem:[%s5117_s1 + $0x630] sm:$0xff]  }
  0x78   :  { %3642 = vmatpush3.bf16.msra.mxu0 %v3972_v26  ;;  %v4021_v26 = vld [vmem:[%s5117_s1 + $0x508] sm:$0xff]  }
  0x79   :  { %3643 = vmatprep.subr.bf16.mxu0 %v3974_v28  ;;  %3664 = vmatpush3.bf16.msra.mxu1 %v3973_v27  ;;  %v4022_v27 = vld [vmem:[%s5117_s1 + $0x588] sm:$0xff]   ;;  %v694_v28 = vcombine.high %v690_v25, %v690_v25 }
  0x7a   :  { %3665 = vmatprep.subr.bf16.mxu1 %v3975_v29  ;;  %v4023_v29 = vld [vmem:[%s5117_s1 + $0x550] sm:$0xff]  }
  0x7c   :  { %3644 = vmatpush3.bf16.msra.mxu0 %v3976_v31  ;;  %v4024_v31 = vld [vmem:[%s5117_s1 + $0x5d0] sm:$0xff]  }
  0x7d   :  { %3645 = vmatprep.subr.bf16.mxu0 %v3978_v33  ;;  %3666 = vmatpush3.bf16.msra.mxu1 %v3977_v32  ;;  %v4025_v32 = vld [vmem:[%s5117_s1 + $0x510] sm:$0xff]  }
  0x7e   :  { %3667 = vmatprep.subr.bf16.mxu1 %v3979_v34  ;;  %v4026_v33 = vld [vmem:[%s5117_s1 + $0x590] sm:$0xff]   ;;  %v4027_v34 = vld [vmem:[%s5117_s1 + $0x558] sm:$0xff]  }
  0x80   :  { %3646 = vmatpush3.bf16.msra.mxu0 %v3980_v36  ;;  %v4028_v36 = vld [vmem:[%s5117_s1 + $0x5d8] sm:$0xff]  }
  0x81   :  { %3675 = vmatprep.subr.bf16.mxu0 %v3983_v39  ;;  %3668 = vmatpush3.bf16.msra.mxu1 %v3981_v37  ;;  %v4029_v37 = vld [vmem:[%s5117_s1 + $0x518] sm:$0xff]   ;;  %v4031_v39 = vld [vmem:[%s5117_s1 + $0x560] sm:$0xff]  }
  0x82   :  { %3697 = vmatprep.subr.bf16.mxu1 %v3984_v40  ;;  %v4032_v40 = vld [vmem:[%s5117_s1 + $0x5e0] sm:$0xff]  }
  0x83   :  { %2585 = vmatmul.mubr.bf16.vlgmr.msra.gmra.mrb[12].mxu0 %v627_v38  ;;  %v4030_v38 = vld [vmem:[%s5117_s1 + $0x598] sm:$0xff]  }
  0x84   :  { %3676 = vmatpush3.bf16.msra.mxu0 %v3985_v41  ;;  %2625 = vmatmul.mubr.bf16.vlgmr.msra.gmra.mrb[12].mxu1 %v643_v43  ;;  %v4033_v41 = vld [vmem:[%s5117_s1 + $0x520] sm:$0xff]   ;;  %v4035_v43 = vld [vmem:[%s5117_s1 + $0x568] sm:$0xff]  }
  0x85   :  { %3677 = vmatprep.subr.bf16.mxu0 %v3987_v44  ;;  %3698 = vmatpush3.bf16.msra.mxu1 %v3986_v42  ;;  %v4034_v42 = vld [vmem:[%s5117_s1 + $0x5a0] sm:$0xff]   ;;  %v4036_v44 = vld [vmem:[%s5117_s1 + $0x5e8] sm:$0xff]  }
  0x86   :  { %3699 = vmatprep.subr.bf16.mxu1 %v3988_v45  ;;  %2664 = vmatprep.mubr.bf16.mxu0 %v683_v17  ;;  %v4037_v45 = vld [vmem:[%s5117_s1 + $0x528] sm:$0xff]   ;;  %v4072_v17 = vld [vmem:[%s5117_s1 + $0x670] sm:$0xff]  }
  0x87   :  { %2704 = vmatprep.mubr.bf16.mxu1 %v693_v22  ;;  %v4077_v22 = vld [vmem:[%s5117_s1 + $0x6f8] sm:$0xff]  }
  0x88   :  { %3678 = vmatpush3.bf16.msra.mxu0 %v3989_v46  ;;  %v4038_v46 = vld [vmem:[%s5117_s1 + $0x5a8] sm:$0xff]  }
  0x89   :  { %3679 = vmatprep.subr.bf16.mxu0 %v3991_v48  ;;  %3700 = vmatpush3.bf16.msra.mxu1 %v3990_v47  ;;  %v4039_v47 = vld [vmem:[%s5117_s1 + $0x570] sm:$0xff]  }
  0x8a   :  { %3701 = vmatprep.subr.bf16.mxu1 %v3992_v49  ;;  %v4040_v48 = vld [vmem:[%s5117_s1 + $0x5f0] sm:$0xff]  }
  0x8b   :  { %v4041_v49 = vld [vmem:[%s5117_s1 + $0x530] sm:$0xff]  }
  0x8c   :  { %3680 = vmatpush3.bf16.msra.mxu0 %v3993_v50  ;;  %v4042_v50 = vld [vmem:[%s5117_s1 + $0x5b0] sm:$0xff]  }
  0x8d   :  { %3681 = vmatprep.subr.bf16.mxu0 %v3995_v52  ;;  %3702 = vmatpush3.bf16.msra.mxu1 %v3994_v51  ;;  %v4043_v51 = vld [vmem:[%s5117_s1 + $0x578] sm:$0xff]  }
  0x8e   :  { %3703 = vmatprep.subr.bf16.mxu1 %v3996_v53  ;;  %v4044_v52 = vld [vmem:[%s5117_s1 + $0x5f8] sm:$0xff]  }
  0x8f   :  { %v4045_v53 = vld [vmem:[%s5117_s1 + $0x538] sm:$0xff]  }
  0x90   :  { %3682 = vmatpush3.bf16.msra.mxu0 %v3997_v54  ;;  %v4046_v54 = vld [vmem:[%s5117_s1 + $0x5b8] sm:$0xff]  }
  0x91   :  { %3683 = vmatprep.subr.bf16.mxu0 %v3999_v56  ;;  %3704 = vmatpush3.bf16.msra.mxu1 %v3998_v55  ;;  %v676_v55 = vrot.slane %v4715_v15, %v4283_v35  ;;  %v4048_v56 = vld [vmem:[%s5117_s1 + $0x640] sm:$0xff]   ;;  %v4070_v15 = vld [vmem:[%s5117_s1 + $0x628] sm:$0xff]  }
  0x92   :  { %3705 = vmatprep.subr.bf16.mxu1 %v4000_v57  ;;  %v4049_v57 = vld [vmem:[%s5117_s1 + $0x6c0] sm:$0xff]  }
  0x94   :  { %3684 = vmatpush3.bf16.msra.mxu0 %v4001_v58  ;;  %v4050_v58 = vld [vmem:[%s5117_s1 + $0x600] sm:$0xff]  }
  0x95   :  { %3685 = vmatprep.subr.bf16.mxu0 %v4003_v60  ;;  %3706 = vmatpush3.bf16.msra.mxu1 %v4002_v59  ;;  %v4051_v59 = vld [vmem:[%s5117_s1 + $0x680] sm:$0xff]   ;;  %v692_v60 = vcombine.high %v676_v55, %v676_v55 }
  0x96   :  { %3707 = vmatprep.subr.bf16.mxu1 %v4004_v61  ;;  %v4052_v61 = vld [vmem:[%s5117_s1 + $0x648] sm:$0xff]  }
  0x98   :  { %3686 = vmatpush3.bf16.msra.mxu0 %v4005_v62  ;;  %v4053_v62 = vld [vmem:[%s5117_s1 + $0x6c8] sm:$0xff]  }
  0x99   :  { %3687 = vmatprep.subr.bf16.mxu0 %v4007_v0  ;;  %3708 = vmatpush3.bf16.msra.mxu1 %v4006_v63  ;;  %v4054_v63 = vld [vmem:[%s5117_s1 + $0x608] sm:$0xff]  }
  0x9a   :  { %3709 = vmatprep.subr.bf16.mxu1 %v4008_v1  ;;  %v4055_v0 = vld [vmem:[%s5117_s1 + $0x688] sm:$0xff]   ;;  %v4056_v1 = vld [vmem:[%s5117_s1 + $0x650] sm:$0xff]  }
  0x9c   :  { %3688 = vmatpush3.bf16.msra.mxu0 %v4009_v2  ;;  %v4057_v2 = vld [vmem:[%s5117_s1 + $0x6d0] sm:$0xff]  }
  0x9d   :  { %3689 = vmatprep.subr.bf16.mxu0 %v4011_v4  ;;  %3710 = vmatpush3.bf16.msra.mxu1 %v4010_v3  ;;  %v4058_v3 = vld [vmem:[%s5117_s1 + $0x610] sm:$0xff]  }
  0x9e   :  { %3711 = vmatprep.subr.bf16.mxu1 %v4012_v5  ;;  %v4059_v4 = vld [vmem:[%s5117_s1 + $0x690] sm:$0xff]   ;;  %v4060_v5 = vld [vmem:[%s5117_s1 + $0x658] sm:$0xff]  }
  0xa0   :  { %3690 = vmatpush3.bf16.msra.mxu0 %v4013_v6  ;;  %v4061_v6 = vld [vmem:[%s5117_s1 + $0x6d8] sm:$0xff]  }
  0xa1   :  { %3719 = vmatprep.subr.bf16.mxu0 %v4015_v11  ;;  %3712 = vmatpush3.bf16.msra.mxu1 %v4014_v8  ;;  %v4063_v8 = vld [vmem:[%s5117_s1 + $0x698] sm:$0xff]   ;;  %v4066_v11 = vld [vmem:[%s5117_s1 + $0x620] sm:$0xff]  }
  0xa2   :  { %3741 = vmatprep.subr.bf16.mxu1 %v4016_v14  ;;  %v4069_v14 = vld [vmem:[%s5117_s1 + $0x6e8] sm:$0xff]  }
  0xa3   :  { %2665 = vmatmul.mubr.bf16.vlgmr.msra.gmra.mrb[16].mxu0 %v669_v13  ;;  %v4068_v13 = vld [vmem:[%s5117_s1 + $0x668] sm:$0xff]  }
  0xa4   :  { %3720 = vmatpush3.bf16.msra.mxu0 %v4017_v16  ;;  %2705 = vmatmul.mubr.bf16.vlgmr.msra.gmra.mrb[16].mxu1 %v691_v20  ;;  %v4071_v16 = vld [vmem:[%s5117_s1 + $0x6a8] sm:$0xff]   ;;  %v4075_v20 = vld [vmem:[%s5117_s1 + $0x6b0] sm:$0xff]  }
  0xa5   :  { %3721 = vmatprep.subr.bf16.mxu0 %v4019_v21  ;;  %3742 = vmatpush3.bf16.msra.mxu1 %v4018_v18  ;;  %v4073_v18 = vld [vmem:[%s5117_s1 + $0x6f0] sm:$0xff]   ;;  %v4076_v21 = vld [vmem:[%s5117_s1 + $0x678] sm:$0xff]  }
  0xa6   :  { %2744 = vmatprep.mubr.bf16.mxu0 %v690_v25  ;;  %3743 = vmatprep.subr.bf16.mxu1 %v4020_v23  ;;  %v4078_v23 = vld [vmem:[%s5117_s1 + $0x638] sm:$0xff]  }
  0xa7   :  { %2784 = vmatprep.mubr.bf16.mxu1 %v694_v28  ;;  %v24_v25 = vld [vmem:[%s5118_s0 + $0x18] sm:$0xff] }
  0xa8   :  { %3722 = vmatpush3.bf16.msra.mxu0 %v4021_v26  ;;  %v702_v26 = vrot.slane %v24_v25, %v4283_v35  ;;  %v695_v28 = vcombine.high %v24_v25, %v24_v25 }
  0xa9   :  { %3723 = vmatprep.subr.bf16.mxu0 %v4023_v29  ;;  %3744 = vmatpush3.bf16.msra.mxu1 %v4022_v27  ;;  %v4080_v27 = vld [vmem:[%s5117_s1 + $0x740] sm:$0xff]   ;;  %v4079_v29 = vld [vmem:[%s5117_s1 + $0x6b8] sm:$0xff]  }
  0xaa   :  { %3745 = vmatprep.subr.bf16.mxu1 %v4024_v31  ;;  %v710_v31 = vcombine.high %v702_v26, %v702_v26 }
  0xac   :  { %3724 = vmatpush3.bf16.msra.mxu0 %v4025_v32  ;;  %v718_v32 = vrot.slane %v702_v26, %v4283_v35 }
  0xad   :  { %3725 = vmatprep.subr.bf16.mxu0 %v4027_v34  ;;  %3746 = vmatpush3.bf16.msra.mxu1 %v4026_v33  ;;  %v4081_v33 = vld [vmem:[%s5117_s1 + $0x7c0] sm:$0xff]   ;;  %v4921_v34 = vrot.slane %v695_v28, %v4283_v35 }
  0xae   :  { %3747 = vmatprep.subr.bf16.mxu1 %v4028_v36  ;;  %v732_v36 = vrot.slane %v710_v31, %v4283_v35 }
  0xb0   :  { %3726 = vmatpush3.bf16.msra.mxu0 %v4029_v37  ;;  %v4082_v37 = vld [vmem:[%s5117_s1 + $0x700] sm:$0xff]  }
  0xb1   :  { %3727 = vmatprep.subr.bf16.mxu0 %v4031_v39  ;;  %3748 = vmatpush3.bf16.msra.mxu1 %v4030_v38  ;;  %v711_v38 = vcombine.high %v4921_v34, %v4921_v34  ;;  %v740_v39 = vcombine.high %v718_v32, %v718_v32 }
  0xb2   :  { %3749 = vmatprep.subr.bf16.mxu1 %v4032_v40  ;;  %v4084_v40 = vld [vmem:[%s5117_s1 + $0x748] sm:$0xff]  }
  0xb4   :  { %3728 = vmatpush3.bf16.msra.mxu0 %v4033_v41  ;;  %v742_v41 = vcombine.high %v732_v36, %v732_v36 }
  0xb5   :  { %3729 = vmatprep.subr.bf16.mxu0 %v4035_v43  ;;  %3750 = vmatpush3.bf16.msra.mxu1 %v4034_v42  ;;  %v4083_v42 = vld [vmem:[%s5117_s1 + $0x780] sm:$0xff]   ;;  %v739_v43 = vrot.slane %v711_v38, %v4283_v35 }
  0xb6   :  { %3751 = vmatprep.subr.bf16.mxu1 %v4036_v44  ;;  %v4085_v44 = vld [vmem:[%s5117_s1 + $0x7c8] sm:$0xff]  }
  0xb8   :  { %3730 = vmatpush3.bf16.msra.mxu0 %v4037_v45  ;;  %v4086_v45 = vld [vmem:[%s5117_s1 + $0x708] sm:$0xff]  }
  0xb9   :  { %3731 = vmatprep.subr.bf16.mxu0 %v4039_v47  ;;  %3752 = vmatpush3.bf16.msra.mxu1 %v4038_v46  ;;  %v743_v46 = vcombine.high %v739_v43, %v739_v43  ;;  %v4088_v47 = vld [vmem:[%s5117_s1 + $0x750] sm:$0xff]  }
  0xba   :  { %3753 = vmatprep.subr.bf16.mxu1 %v4040_v48  ;;  %v4087_v48 = vld [vmem:[%s5117_s1 + $0x788] sm:$0xff]  }
  0xbc   :  { %3732 = vmatpush3.bf16.msra.mxu0 %v4041_v49  ;;  %v4089_v49 = vld [vmem:[%s5117_s1 + $0x7d0] sm:$0xff]  }
  0xbd   :  { %3733 = vmatprep.subr.bf16.mxu0 %v4043_v51  ;;  %3754 = vmatpush3.bf16.msra.mxu1 %v4042_v50  ;;  %v4090_v50 = vld [vmem:[%s5117_s1 + $0x710] sm:$0xff]   ;;  %v4092_v51 = vld [vmem:[%s5117_s1 + $0x758] sm:$0xff]  }
  0xbe   :  { %3755 = vmatprep.subr.bf16.mxu1 %v4044_v52  ;;  %v4091_v52 = vld [vmem:[%s5117_s1 + $0x790] sm:$0xff]  }
  0xc0   :  { %3734 = vmatpush3.bf16.msra.mxu0 %v4045_v53  ;;  %v4093_v53 = vld [vmem:[%s5117_s1 + $0x7d8] sm:$0xff]  }
  0xc1   :  { %3763 = vmatprep.subr.bf16.mxu0 %v4048_v56  ;;  %3756 = vmatpush3.bf16.msra.mxu1 %v4046_v54  ;;  %v4094_v54 = vld [vmem:[%s5117_s1 + $0x718] sm:$0xff]  }
  0xc2   :  { %3785 = vmatprep.subr.bf16.mxu1 %v4049_v57  ;;  %v4095_v56 = vld [vmem:[%s5117_s1 + $0x798] sm:$0xff]   ;;  %v4097_v57 = vld [vmem:[%s5117_s1 + $0x7e0] sm:$0xff]  }
  0xc3   :  { %2745 = vmatmul.mubr.bf16.vlgmr.msra.gmra.mrb[20].mxu0 %v676_v55  ;;  %v4096_v55 = vld [vmem:[%s5117_s1 + $0x760] sm:$0xff]  }
  0xc4   :  { %3764 = vmatpush3.bf16.msra.mxu0 %v4050_v58  ;;  %2785 = vmatmul.mubr.bf16.vlgmr.msra.gmra.mrb[20].mxu1 %v692_v60  ;;  %v4098_v58 = vld [vmem:[%s5117_s1 + $0x720] sm:$0xff]  }
  0xc5   :  { %3765 = vmatprep.subr.bf16.mxu0 %v4052_v61  ;;  %3786 = vmatpush3.bf16.msra.mxu1 %v4051_v59  ;;  %v4100_v59 = vld [vmem:[%s5117_s1 + $0x768] sm:$0xff]   ;;  %v4099_v60 = vld [vmem:[%s5117_s1 + $0x7a0] sm:$0xff]  }
  0xc6   :  { %3787 = vmatprep.subr.bf16.mxu1 %v4053_v62  ;;  %2824 = vmatprep.mubr.bf16.mxu0 %v732_v36  ;;  %v4101_v61 = vld [vmem:[%s5117_s1 + $0x7e8] sm:$0xff]   ;;  %v3224_v62 = vld [vmem:[%s5119_s2] ss:$0 sm:$0xff] }
  0xc7   :  { %2864 = vmatprep.mubr.bf16.mxu1 %v742_v41 }
  0xc8   :  { %3766 = vmatpush3.bf16.msra.mxu0 %v4054_v63  ;;  %v4102_v63 = vld [vmem:[%s5117_s1 + $0x728] sm:$0xff]  }
  0xc9   :  { %3767 = vmatprep.subr.bf16.mxu0 %v4056_v1  ;;  %3788 = vmatpush3.bf16.msra.mxu1 %v4055_v0  ;;  %v4104_v1 = vld [vmem:[%s5117_s1 + $0x770] sm:$0xff]  }
  0xca   :  { %3789 = vmatprep.subr.bf16.mxu1 %v4057_v2 }
  0xcc   :  { %3768 = vmatpush3.bf16.msra.mxu0 %v4058_v3  ;;  %v4103_v3 = vld [vmem:[%s5117_s1 + $0x7a8] sm:$0xff]  }
  0xcd   :  { %3769 = vmatprep.subr.bf16.mxu0 %v4060_v5  ;;  %3790 = vmatpush3.bf16.msra.mxu1 %v4059_v4 }
  0xce   :  { %3791 = vmatprep.subr.bf16.mxu1 %v4061_v6 }
  0xd0   :  { %3770 = vmatpush3.bf16.msra.mxu0 %v4062_v7  ;;  %v4105_v7 = vld [vmem:[%s5117_s1 + $0x7f0] sm:$0xff]  }
  0xd1   :  { %3771 = vmatprep.subr.bf16.mxu0 %v4064_v9  ;;  %3792 = vmatpush3.bf16.msra.mxu1 %v4063_v8  ;;  %v4106_v8 = vld [vmem:[%s5117_s1 + $0x730] sm:$0xff]  }
  0xd2   :  { %3793 = vmatprep.subr.bf16.mxu1 %v4065_v10 }
  0xd4   :  { %3772 = vmatpush3.bf16.msra.mxu0 %v4066_v11 }
  0xd5   :  { %3773 = vmatprep.subr.bf16.mxu0 %v4068_v13  ;;  %3794 = vmatpush3.bf16.msra.mxu1 %v4067_v12 }
  0xd6   :  { %3795 = vmatprep.subr.bf16.mxu1 %v4069_v14  ;;  %v4108_v14 = vld [vmem:[%s5117_s1 + $0x778] sm:$0xff]  }
  0xd8   :  { %3774 = vmatpush3.bf16.msra.mxu0 %v4070_v15 }
  0xd9   :  { %3775 = vmatprep.subr.bf16.mxu0 %v4072_v17  ;;  %3796 = vmatpush3.bf16.msra.mxu1 %v4071_v16  ;;  %v4107_v16 = vld [vmem:[%s5117_s1 + $0x7b0] sm:$0xff]  }
  0xda   :  { %3797 = vmatprep.subr.bf16.mxu1 %v4073_v18  ;;  %v4109_v18 = vld [vmem:[%s5117_s1 + $0x7f8] sm:$0xff]  }
  0xdc   :  { %3776 = vmatpush3.bf16.msra.mxu0 %v4074_v19  ;;  %v4110_v19 = vld [vmem:[%s5117_s1 + $0x738] sm:$0xff]  }
  0xdd   :  { %3777 = vmatprep.subr.bf16.mxu0 %v4076_v21  ;;  %3798 = vmatpush3.bf16.msra.mxu1 %v4075_v20  ;;  %v725_v20 = vrot.slane %v4921_v34, %v4283_v35  ;;  %v4111_v21 = vld [vmem:[%s5117_s1 + $0x7b8] sm:$0xff]  }
  0xde   :  { %3799 = vmatprep.subr.bf16.mxu1 %v4077_v22 }
  0xdf   :  { %v741_v22 = vcombine.high %v725_v20, %v725_v20 }
  0xe0   :  { %3778 = vmatpush3.bf16.msra.mxu0 %v4078_v23 }
  0xe1   :  { %3807 = vmatprep.subr.bf16.mxu0 %v4080_v27  ;;  %3800 = vmatpush3.bf16.msra.mxu1 %v4079_v29 }
  0xe2   :  { %3829 = vmatprep.subr.bf16.mxu1 %v4081_v33 }
  0xe3   :  { %2825 = vmatmul.mubr.bf16.vlgmr.msra.gmra.mrb[24].mxu0 %v718_v32 }
  0xe4   :  { %3808 = vmatpush3.bf16.msra.mxu0 %v4082_v37  ;;  %2865 = vmatmul.mubr.bf16.vlgmr.msra.gmra.mrb[24].mxu1 %v740_v39 }
  0xe5   :  { %3809 = vmatprep.subr.bf16.mxu0 %v4084_v40  ;;  %3830 = vmatpush3.bf16.msra.mxu1 %v4083_v42 }
  0xe6   :  { %2904 = vmatprep.mubr.bf16.mxu0 %v739_v43  ;;  %3831 = vmatprep.subr.bf16.mxu1 %v4085_v44 }
  0xe7   :  { %2944 = vmatprep.mubr.bf16.mxu1 %v743_v46 }
  0xe8   :  { %3810 = vmatpush3.bf16.msra.mxu0 %v4086_v45 }
  0xe9   :  { %3811 = vmatprep.subr.bf16.mxu0 %v4088_v47  ;;  %3832 = vmatpush3.bf16.msra.mxu1 %v4087_v48 }
  0xea   :  { %3833 = vmatprep.subr.bf16.mxu1 %v4089_v49  ;;  %v4113_v49 = vld [vmem:[%s5120_s3] ss:$8 sps:$4 sm:$0xff]  }
  0xec   :  { %3812 = vmatpush3.bf16.msra.mxu0 %v4090_v50  ;;  %v4115_v50 = vld [vmem:[%s5120_s3 + $0x4] ss:$8 sps:$4 sm:$0xff]  }
  0xed   :  { %3813 = vmatprep.subr.bf16.mxu0 %v4092_v51  ;;  %3834 = vmatpush3.bf16.msra.mxu1 %v4091_v52 }
  0xee   :  { %3835 = vmatprep.subr.bf16.mxu1 %v4093_v53  ;;  %v4118_v53 = vld [vmem:[%s5120_s3 + $0x14] ss:$8 sps:$4 sm:$0xff]  }
  0xf0   :  { %3814 = vmatpush3.bf16.msra.mxu0 %v4094_v54 }
  0xf1   :  { %3815 = vmatprep.subr.bf16.mxu0 %v4096_v55  ;;  %3836 = vmatpush3.bf16.msra.mxu1 %v4095_v56 }
  0xf2   :  { %3837 = vmatprep.subr.bf16.mxu1 %v4097_v57  ;;  %v4116_v57 = vld [vmem:[%s5120_s3 + $0x10] ss:$8 sps:$4 sm:$0xff]  }
  0xf4   :  { %3816 = vmatpush3.bf16.msra.mxu0 %v4098_v58 }
  0xf5   :  { %3817 = vmatprep.subr.bf16.mxu0 %v4100_v59  ;;  %3838 = vmatpush3.bf16.msra.mxu1 %v4099_v60 }
  0xf6   :  { %v3515_v0 = vpop.f32.mrb[0].mxu0  ;;  %3839 = vmatprep.subr.bf16.mxu1 %v4101_v61 }
  0xf7   :  { %v3516_v2 = vpop.f32.mrb[1].mxu0  ;;  %v3537_v4 = vpop.f32.mrb[0].mxu1 }
  0xf8   :  { %v3517_v5 = vadd.f32 %v3516_v2, %v3515_v0  ;;  %v3518_v6 = vpop.f32.mrb[2].mxu0  ;;  %v3538_v9 = vpop.f32.mrb[1].mxu1  ;;  %3818 = vmatpush3.bf16.msra.mxu0 %v4102_v63  ;;  %v4121_v0 = vld [vmem:[%s5120_s3 + $0x24] ss:$8 sps:$4 sm:$0xff]   ;;  %v4119_v2 = vld [vmem:[%s5120_s3 + $0x20] ss:$8 sps:$4 sm:$0xff]  }
  0xf9   :  { %v3519_v10 = vpop.f32.mrb[3].mxu0  ;;  %v3539_v12 = vadd.f32 %v3538_v9, %v3537_v4  ;;  %v3540_v13 = vpop.f32.mrb[2].mxu1  ;;  %3819 = vmatprep.subr.bf16.mxu0 %v4104_v1  ;;  %3840 = vmatpush3.bf16.msra.mxu1 %v4103_v3  ;;  %v4124_v3 = vld [vmem:[%s5120_s3 + $0x34] ss:$8 sps:$4 sm:$0xff]   ;;  %v4122_v4 = vld [vmem:[%s5120_s3 + $0x30] ss:$8 sps:$4 sm:$0xff]  }
  0xfa   :  { %v2347_v11 = vadd.f32 %v3517_v5, %v3224_v62  ;;  %v3541_v15 = vpop.f32.mrb[3].mxu1  ;;  %3841 = vmatprep.subr.bf16.mxu1 %v4105_v7  ;;  %v4127_v5 = vld [vmem:[%s5120_s3 + $0x44] ss:$8 sps:$4 sm:$0xff]   ;;  %v4125_v6 = vld [vmem:[%s5120_s3 + $0x40] ss:$8 sps:$4 sm:$0xff]   ;;  %v4158_v13 = vmov 0  }
  0xfb   :  { %v4130_v7 = vld [vmem:[%s5120_s3 + $0x54] ss:$8 sps:$4 sm:$0xff]   ;;  %v4133_v9 = vld [vmem:[%s5120_s3 + $0x64] ss:$8 sps:$4 sm:$0xff]   ;;  %v4131_v10 = vld [vmem:[%s5120_s3 + $0x60] ss:$8 sps:$4 sm:$0xff]  }
  0xfc   :  { %v2387_v17 = vadd.f32 %v3539_v12, %v2347_v11  ;;  %3820 = vmatpush3.bf16.msra.mxu0 %v4106_v8  ;;  %v4128_v8 = vld [vmem:[%s5120_s3 + $0x50] ss:$8 sps:$4 sm:$0xff]   ;;  %v4136_v11 = vld [vmem:[%s5120_s3 + $0x74] ss:$8 sps:$4 sm:$0xff]  }
  0xfd   :  { %3821 = vmatprep.subr.bf16.mxu0 %v4108_v14  ;;  %3842 = vmatpush3.bf16.msra.mxu1 %v4107_v16  ;;  %v4134_v12 = vld [vmem:[%s5120_s3 + $0x70] ss:$8 sps:$4 sm:$0xff]  }
  0xfe   :  { %3843 = vmatprep.subr.bf16.mxu1 %v4109_v18 }
 0x100   :  { %3822 = vmatpush3.bf16.msra.mxu0 %v4110_v19 }
 0x101   :  { %3844 = vmatpush3.bf16.msra.mxu1 %v4111_v21  ;;  %3067 = vmatprep.subr.bf16.mxu0 %v4115_v50 }
 0x103   :  { %2905 = vmatmul.mubr.bf16.vlgmr.msra.gmra.mrb[28].mxu0 %v725_v20 }
 0x104   :  { %2945 = vmatmul.mubr.bf16.vlgmr.msra.gmra.mrb[28].mxu1 %v741_v22  ;;  %3068 = vmatpush1.bf16.msra.mxu0 %v4113_v49 }
 0x105   :  { %3069 = vmatprep.subr.bf16.mxu0 %v4118_v53  ;;  %3099 = vmatprep.mubr.bf16.mxu0 %v4158_v13 }
 0x108   :  { %3070 = vmatpush1.bf16.msra.mxu0 %v4116_v57 }
 0x109   :  { %3071 = vmatprep.subr.bf16.mxu0 %v4121_v0 }
 0x10c   :  { %3072 = vmatpush1.bf16.msra.mxu0 %v4119_v2 }
 0x10d   :  { %3073 = vmatprep.subr.bf16.mxu0 %v4124_v3 }
 0x110   :  { %3074 = vmatpush1.bf16.msra.mxu0 %v4122_v4 }
 0x111   :  { %3075 = vmatprep.subr.bf16.mxu0 %v4127_v5 }
 0x114   :  { %3076 = vmatpush1.bf16.msra.mxu0 %v4125_v6  ;;  %v2979_v6 = vsub.s32 0, %v4268_v30 }
 0x115   :  { %3077 = vmatprep.subr.bf16.mxu0 %v4130_v7  ;;  %v5072_v7 = vand.u32 127, %v552_v24 }
 0x116   :  { %v3559_v23 = vpop.f32.mrb[4].mxu0 }
 0x117   :  { %v3560_v25 = vpop.f32.mrb[5].mxu0  ;;  %v3581_v26 = vpop.f32.mrb[4].mxu1  ;;  %vm3113_vm1 = vcmp.lt.s32.totalorder %v5072_v7, 12  ;;  %vm3144_vm4 = vcmp.ge.s32.totalorder %v5072_v7, 64 }
 0x118   :  { %v3561_v27 = vadd.f32 %v3560_v25, %v3559_v23  ;;  %v3562_v28 = vpop.f32.mrb[6].mxu0  ;;  %v3582_v29 = vpop.f32.mrb[5].mxu1  ;;  %3078 = vmatpush1.bf16.msra.mxu0 %v4128_v8  ;;  %v2975_v8 = vld [vmem:[%s5121_s4] sm:$0x3] }
 0x119   :  { %v3563_v31 = vpop.f32.mrb[7].mxu0  ;;  %v3583_v35 = vadd.f32 %v3582_v29, %v3581_v26  ;;  %v3584_v33 = vpop.f32.mrb[6].mxu1  ;;  %3079 = vmatprep.subr.bf16.mxu0 %v4133_v9  ;;  %v2983_v9 = vsub.s32 1, %v4268_v30 }
 0x11a   :  { %v2427_v32 = vadd.f32 %v3561_v27, %v2387_v17  ;;  %v3585_v34 = vpop.f32.mrb[7].mxu1 }
 0x11c   :  { %v2467_v36 = vadd.f32 %v3583_v35, %v2427_v32  ;;  %3080 = vmatpush1.bf16.msra.mxu0 %v4131_v10  ;;  %v2980_v10 = vrot.slane %v2975_v8, %v2979_v6 }
 0x11d   :  { %3081 = vmatprep.subr.bf16.mxu0 %v4136_v11  ;;  %v5079_v11 = vadd.s32 128, %v5072_v7 }
 0x11f   :  { %vm3179_vm3 = vcmp.lt.s32.totalorder %v5079_v11, 192 }
 0x120   :  { %3082 = vmatpush1.bf16.msra.mxu0 %v4134_v12  ;;  %v2984_v12 = vrot.slane %v2975_v8, %v2983_v9 }
 0x136   :  { %v3603_v37 = vpop.f32.mrb[8].mxu0 }
 0x137   :  { %v3604_v38 = vpop.f32.mrb[9].mxu0  ;;  %v3625_v39 = vpop.f32.mrb[8].mxu1 }
 0x138   :  { %v3605_v40 = vadd.f32 %v3604_v38, %v3603_v37  ;;  %v3606_v41 = vpop.f32.mrb[10].mxu0  ;;  %v3626_v42 = vpop.f32.mrb[9].mxu1 }
 0x139   :  { %v3607_v43 = vpop.f32.mrb[11].mxu0  ;;  %v3627_v45 = vadd.f32 %v3626_v42, %v3625_v39  ;;  %v3628_v46 = vpop.f32.mrb[10].mxu1 }
 0x13a   :  { %v2507_v44 = vadd.f32 %v3605_v40, %v2467_v36  ;;  %v3629_v47 = vpop.f32.mrb[11].mxu1 }
 0x13c   :  { %v2547_v48 = vadd.f32 %v3627_v45, %v2507_v44 }
 0x156   :  { %v3647_v51 = vpop.f32.mrb[12].mxu0 }
 0x157   :  { %v3648_v52 = vpop.f32.mrb[13].mxu0  ;;  %v3669_v54 = vpop.f32.mrb[12].mxu1 }
 0x158   :  { %v3649_v55 = vadd.f32 %v3648_v52, %v3647_v51  ;;  %v3650_v56 = vpop.f32.mrb[14].mxu0  ;;  %v3670_v58 = vpop.f32.mrb[13].mxu1 }
 0x159   :  { %v3651_v59 = vpop.f32.mrb[15].mxu0  ;;  %v3671_v61 = vadd.f32 %v3670_v58, %v3669_v54  ;;  %v3672_v62 = vpop.f32.mrb[14].mxu1 }
 0x15a   :  { %v2587_v60 = vadd.f32 %v3649_v55, %v2547_v48  ;;  %v3673_v63 = vpop.f32.mrb[15].mxu1 }
 0x15c   :  { %v2627_v1 = vadd.f32 %v3671_v61, %v2587_v60 }
 0x176   :  { %v3691_v14 = vpop.f32.mrb[16].mxu0 }
 0x177   :  { %v3692_v15 = vpop.f32.mrb[17].mxu0  ;;  %v3713_v16 = vpop.f32.mrb[16].mxu1 }
 0x178   :  { %v3693_v17 = vadd.f32 %v3692_v15, %v3691_v14  ;;  %v3694_v18 = vpop.f32.mrb[18].mxu0  ;;  %v3714_v19 = vpop.f32.mrb[17].mxu1 }
 0x179   :  { %v3695_v20 = vpop.f32.mrb[19].mxu0  ;;  %v3715_v22 = vadd.f32 %v3714_v19, %v3713_v16  ;;  %v3716_v23 = vpop.f32.mrb[18].mxu1 }
 0x17a   :  { %v2667_v21 = vadd.f32 %v3693_v17, %v2627_v1  ;;  %v3717_v25 = vpop.f32.mrb[19].mxu1 }
 0x17c   :  { %v2707_v26 = vadd.f32 %v3715_v22, %v2667_v21 }
 0x196   :  { %v3735_v27 = vpop.f32.mrb[20].mxu0 }
 0x197   :  { %v3736_v28 = vpop.f32.mrb[21].mxu0  ;;  %v3757_v29 = vpop.f32.mrb[20].mxu1 }
 0x198   :  { %v3737_v31 = vadd.f32 %v3736_v28, %v3735_v27  ;;  %v3738_v32 = vpop.f32.mrb[22].mxu0  ;;  %v3758_v35 = vpop.f32.mrb[21].mxu1 }
 0x199   :  { %v3739_v33 = vpop.f32.mrb[23].mxu0  ;;  %v3759_v36 = vadd.f32 %v3758_v35, %v3757_v29  ;;  %v3760_v37 = vpop.f32.mrb[22].mxu1 }
 0x19a   :  { %v2747_v34 = vadd.f32 %v3737_v31, %v2707_v26  ;;  %v3761_v38 = vpop.f32.mrb[23].mxu1 }
 0x19c   :  { %v2787_v39 = vadd.f32 %v3759_v36, %v2747_v34 }
 0x1b6   :  { %v3779_v40 = vpop.f32.mrb[24].mxu0 }
 0x1b7   :  { %v3780_v41 = vpop.f32.mrb[25].mxu0  ;;  %v3801_v42 = vpop.f32.mrb[24].mxu1 }
 0x1b8   :  { %v3781_v43 = vadd.f32 %v3780_v41, %v3779_v40  ;;  %v3782_v44 = vpop.f32.mrb[26].mxu0  ;;  %v3802_v45 = vpop.f32.mrb[25].mxu1 }
 0x1b9   :  { %v3783_v46 = vpop.f32.mrb[27].mxu0  ;;  %v3803_v48 = vadd.f32 %v3802_v45, %v3801_v42  ;;  %v3804_v49 = vpop.f32.mrb[26].mxu1 }
 0x1ba   :  { %v2827_v47 = vadd.f32 %v3781_v43, %v2787_v39  ;;  %v3805_v50 = vpop.f32.mrb[27].mxu1 }
 0x1bc   :  { %v2867_v51 = vadd.f32 %v3803_v48, %v2827_v47 }
 0x1d6   :  { %v3823_v52 = vpop.f32.mrb[28].mxu0 }
 0x1d7   :  { %v3824_v53 = vpop.f32.mrb[29].mxu0  ;;  %v3845_v54 = vpop.f32.mrb[28].mxu1 }
 0x1d8   :  { %v3825_v55 = vadd.f32 %v3824_v53, %v3823_v52  ;;  %v3826_v56 = vpop.f32.mrb[30].mxu0  ;;  %v3846_v57 = vpop.f32.mrb[29].mxu1 }
 0x1d9   :  { %v3827_v58 = vpop.f32.mrb[31].mxu0  ;;  %v3847_v60 = vadd.f32 %v3846_v57, %v3845_v54  ;;  %v3848_v61 = vpop.f32.mrb[30].mxu1 }
 0x1da   :  { %v2907_v59 = vadd.f32 %v3825_v55, %v2867_v51  ;;  %v3849_v62 = vpop.f32.mrb[31].mxu1 }
 0x1dc   :  { %v2947_v63 = vadd.f32 %v3847_v60, %v2907_v59 }
 0x1de   :  { %v2953_v0 = vmin.f32 %v2947_v63, 0.0  ;;  %vm2952_vm0 = vcmp.gt.f32.partialorder %v2947_v63, 0.0 }
 0x1e0   :  { %v2954_v1 = vmul.f32 1.442695, %v2953_v0 }
 0x1e2   :  { %4137 = vpow2.f32 %v2954_v1 }
 0x1ec   :  { %v4138_v2 = vpop.eup %4137 }
 0x1ed   :  { %v3481_v3 = vadd.f32 -1.0, %v4138_v2 }
 0x1ef   :  { %v2957_v4 = vsel %vm2952_vm0, %v2947_v63, %v3481_v3 }
 0x1f0   :  { %v2958_v5 = vpack.c.bf16 %v2957_v4, %v2957_v4 }
 0x1f2   :  { %3100 = vmatmul.mubr.bf16.vlgmr.msra.gmra.mrb[32].mxu0 %v2958_v5 }
 0x2c5   :  { %v3101_v13 = vpop.f32.mrb[32].mxu0 }
 0x2c6   :  { %v5082_v14 = vadd.f32 %v3101_v13, %v2980_v10  ;;  %v3103_v15 = vpop.f32.mrb[33].mxu0 }
 0x2c7   :  { %v5085_v24 = vadd.f32 %v3103_v15, %v2984_v12  ;;  %v3105_v16 = vpop.f32.mrb[34].mxu0 }
 0x2c8   :  { %v3106_v30 = vpop.f32.mrb[35].mxu0  ;;  %v3117_v17 = vsel %vm3113_vm1, %v5082_v14, -inf  ;;  %v3150_v21 = vsel %vm3144_vm4, %v5082_v14, -inf }
 0x2c9   :  { %v3120_v18 = vsel %vm3119_vm2, %v3117_v17, -inf  ;;  %v3183_v19 = vsel %vm3179_vm3, %v5085_v24, -inf  ;;  %v3152_v22 = vsel %vm3119_vm2, %v3150_v21, -inf }
 0x2ca   :  { %3123 = vmax.xlane.f32.xlu0 %v3120_v18  ;;  %v3185_v20 = vsel %vm3119_vm2, %v3183_v19, -inf }
 0x2cb   :  { %3187 = vmax.xlane.f32.xlu1 %v3185_v20 }
 0x2ce   :  { %3155 = vmax.xlane.f32.xlu0 %v3152_v22 }
 0x357   :  { %v3124_v23 = vpop.xlane.xlu0 %3123 }
 0x358   :  { %v3125_v25 = vsub.f32 %v3117_v17, %v3124_v23  ;;  %v3126_v26 = vsub.f32 -inf, %v3124_v23  ;;  %v3188_v27 = vpop.xlane.xlu1 %3187 }
 0x359   :  { %v3189_v28 = vsub.f32 -inf, %v3188_v27  ;;  %v3190_v29 = vsub.f32 %v3183_v19, %v3188_v27 }
 0x35a   :  { %v3127_v31 = vmul.f32 1.442695, %v3125_v25  ;;  %v3129_v32 = vmul.f32 1.442695, %v3126_v26 }
 0x35b   :  { %v3191_v35 = vmul.f32 1.442695, %v3189_v28  ;;  %v3193_v33 = vmul.f32 1.442695, %v3190_v29  ;;  %v3156_v34 = vpop.xlane.xlu0 %3155 }
 0x35c   :  { %4139 = vpow2.f32 %v3127_v31  ;;  %v3157_v36 = vsub.f32 %v3150_v21, %v3156_v34  ;;  %v3158_v37 = vsub.f32 -inf, %v3156_v34 }
 0x35d   :  { %4141 = vpow2.f32 %v3129_v32 }
 0x35e   :  { %4143 = vpow2.f32 %v3191_v35  ;;  %v3159_v38 = vmul.f32 1.442695, %v3157_v36  ;;  %v3161_v39 = vmul.f32 1.442695, %v3158_v37 }
 0x35f   :  { %4145 = vpow2.f32 %v3193_v33 }
 0x360   :  { %4147 = vpow2.f32 %v3159_v38 }
 0x361   :  { %4149 = vpow2.f32 %v3161_v39 }
 0x366   :  { %v4140_v40 = vpop.eup %4139 }
 0x367   :  { %v4142_v41 = vpop.eup %4141  ;;  %v3131_v42 = vsel %vm3119_vm2, %v4140_v40, 0.0 }
 0x368   :  { %v4144_v43 = vpop.eup %4143  ;;  %v3132_v44 = vsel %vm3119_vm2, %v4142_v41, 0.0 }
 0x369   :  { %v4146_v45 = vpop.eup %4145  ;;  %v3133_v46 = vadd.f32 %v3132_v44, %v3131_v42  ;;  %v3195_v48 = vsel %vm3119_vm2, %v4144_v43, 0.0 }
 0x36a   :  { %v4148_v47 = vpop.eup %4147  ;;  %v3196_v49 = vsel %vm3119_vm2, %v4146_v45, 0.0 }
 0x36b   :  { %v4150_v50 = vpop.eup %4149  ;;  %3134 = vadd.xlane.f32.xlu1 %v3133_v46  ;;  %v3163_v51 = vsel %vm3119_vm2, %v4148_v47, 0.0  ;;  %v3197_v53 = vadd.f32 %v3196_v49, %v3195_v48 }
 0x36c   :  { %v3164_v52 = vsel %vm3119_vm2, %v4150_v50, 0.0 }
 0x36d   :  { %v3165_v54 = vadd.f32 %v3164_v52, %v3163_v51 }
 0x36f   :  { %3198 = vadd.xlane.f32.xlu1 %v3197_v53  ;;  %3166 = vadd.xlane.f32.xlu0 %v3165_v54 }
 0x3f8   :  { %v3135_v55 = vpop.xlane.xlu1 %3134 }
 0x3f9   :  { %4151 = vrcp.f32 %v3135_v55 }
 0x3fc   :  { %v3199_v56 = vpop.xlane.xlu1 %3198  ;;  %v3167_v57 = vpop.xlane.xlu0 %3166 }
 0x3fd   :  { %4153 = vrcp.f32 %v3199_v56 }
 0x3fe   :  { %4155 = vrcp.f32 %v3167_v57 }
 0x403   :  { %v4152_v58 = vpop.eup %4151 }
 0x404   :  { %v3137_v59 = vmul.f32 %v4152_v58, %v3135_v55 }
 0x406   :  { %v3138_v60 = vsub.f32 2.0, %v3137_v59 }
 0x407   :  { %v4154_v61 = vpop.eup %4153 }
 0x408   :  { %v4156_v62 = vpop.eup %4155  ;;  %v3139_v63 = vmul.f32 %v4152_v58, %v3138_v60  ;;  %v3201_v0 = vmul.f32 %v4154_v61, %v3199_v56 }
 0x409   :  { %v3169_v1 = vmul.f32 %v4156_v62, %v3167_v57 }
 0x40a   :  { %v3202_v2 = vsub.f32 2.0, %v3201_v0  ;;  %v3140_v4 = vmul.f32 %v4140_v40, %v3139_v63 }
 0x40b   :  { %v3170_v3 = vsub.f32 2.0, %v3169_v1 }
 0x40c   :  { %v3203_v5 = vmul.f32 %v4154_v61, %v3202_v2  ;;  %v3142_v10 = vsel %vm3113_vm1, %v3140_v4, %v5082_v14 }
 0x40d   :  { %v3171_v6 = vmul.f32 %v4156_v62, %v3170_v3 }
 0x40e   :  { %v3205_v8 = vmul.f32 %v4146_v45, %v3203_v5 }
 0x40f   :  { %v3172_v9 = vmul.f32 %v4148_v47, %v3171_v6 }
 0x410   :  { %v3207_v12 = vsel %vm3179_vm3, %v3205_v8, %v5085_v24 }
 0x411   :  { %v3174_v13 = vsel %vm3144_vm4, %v3172_v9, %v3142_v10 }
 0x412   :  { %v3210_v15 = vcombine.low %v3174_v13, %v3207_v12 }
 0x414   :  { %3498 = vst.sshfl [vmem:[%s5122_s5] sm:$0x33 pattern:$0x76325410] %v3210_v15 }

</bundles_post_ra>
